<compile_context>
chip_gen: v7x
topology: tpu7x:2x2x1
jax: 0.10.0
libtpu: 0.0.40
codegen_flags: <defaults>
</compile_context>

<pallas_src>
from functools import partial

import jax
import jax.numpy as jnp
from jax import lax
from jax.experimental import pallas as pl
from jax.experimental.pallas import tpu as pltpu

OBS_NORMALIZATIONS = {
    'agent': 1, 'agent:hp': 1, 'agent:frozen': 1, 'agent:energy': 255,
    'agent:orientation': 1, 'agent:shield': 1, 'agent:inv:r1': 5,
    'agent:inv:r2': 5, 'agent:inv:r3': 5, 'wall': 1, 'wall:hp': 10,
    'generator': 1, 'generator:hp': 30, 'generator:r1': 30,
    'generator:ready': 1, 'converter': 1, 'converter:hp': 30,
    'converter:input_resource': 5, 'converter:output_resource': 5,
    'converter:output_energy': 100, 'converter:ready': 1, 'altar': 1,
    'altar:hp': 30, 'altar:ready': 1, 'last_action': 10,
    'last_action_argument': 10, 'agent:kinship': 10,
}
GRID_FEATURES = list(OBS_NORMALIZATIONS.keys())

NUM_OBJECTS = len(GRID_FEATURES)          # 27 input channels
CNN_CHANNELS = 32                         # cfg.cnn_channels
OUTPUT_DIM = 32                           # cfg.fc.output_dim
FC_LAYERS = 2                             # cfg.fc.layers
H = W = 11                                # spatial size implied by Linear(C, D) after flatten
K1, S1 = 5, 3
K2, S2 = 3, 1
OH1 = (H - K1) // S1 + 1                  # 3
P1 = OH1 * OH1                            # 9 conv1 output positions (== conv2 taps)
P1C = P1 * CNN_CHANNELS                   # 288 fused conv1 output columns
KFLAT = NUM_OBJECTS * H * W               # 3267 flattened obs features
KPAD = 3328                               # 26 * 128 (lane-aligned K for the conv1 dot)

# Batch-tile cap.  At TB=512: obs stream double buffer ~6.5 MiB, dense conv1
# weight ~1.9 MiB (x2 buffers), out + temporaries ~2-3 MiB -> ~13 MiB peak,
# well inside the explicit 32 MiB scoped-VMEM limit on every generation.
TB_CAP = 512


def _round_up(x, m):
    return ((x + m - 1) // m) * m


def _choose_tiling(B, tb_cap=TB_CAP):
    """Pick (TB, num_tiles, B_pad): TB <= tb_cap, multiple of 16 (bf16 sublanes),
    minimal batch padding, preferring >=2 / even tile counts (v7x megacore)."""
    n = pl.cdiv(B, tb_cap)
    if B >= 32:
        n = max(n, 2)          # >=2 tiles so "parallel" can feed both v7x cores
    if n % 2 and n > 1:
        n += 1                 # even tile count keeps the 2-core split balanced
    tb = max(16, _round_up(pl.cdiv(B, n), 16))
    n = pl.cdiv(B, tb)
    return tb, n, n * tb


def simple_conv_agent_kernel(x_ref, w1_ref, b1_ref, w2_ref, b2_ref,
                             wl1_ref, bl1_ref, wl2_ref, bl2_ref, out_ref):
    # conv1 (5x5 / stride 3, obs_norm folded in) as ONE dense MXU matmul over
    # the raw flattened obs: [TB, 3328] bf16 x [3328, 288] bf16 -> f32 accum.
    h1 = jnp.dot(x_ref[...], w1_ref[...], preferred_element_type=jnp.float32)
    h1 = jnp.maximum(h1 + b1_ref[...], 0.0).astype(jnp.bfloat16)
    # conv2 (3x3 / stride 1 -> 1x1): single fused [TB, 288] x [288, 32] matmul.
    h2 = jnp.dot(h1, w2_ref[...], preferred_element_type=jnp.float32)
    h2 = jnp.maximum(h2 + b2_ref[...], 0.0)
    # Flatten is a no-op (spatial already 1x1); fc stack (tiny, kept f32).
    h3 = jnp.dot(h2, wl1_ref[...], preferred_element_type=jnp.float32)
    h3 = jnp.maximum(h3 + bl1_ref[...], 0.0)
    h4 = jnp.dot(h3, wl2_ref[...], preferred_element_type=jnp.float32)
    out_ref[...] = jnp.maximum(h4 + bl2_ref[...], 0.0)


def _build_dense_conv1_weight(conv1_w, obs_norm):
    """[Cout, Cin, 5, 5] -> dense [KPAD, P1*Cout] acting on flat (ci, h, w) obs.

    Column p*Cout + co holds, at row ci*121 + (oh*3+kh)*11 + (ow*3+kw), the
    value conv1_w[co, ci, kh, kw] / obs_norm[ci]; all other rows are zero.
    obs_norm is folded in so the kernel never divides.
    """
    wk = (conv1_w / obs_norm[None, :, None, None])          # (Cout, Cin, 5, 5)
    wk = jnp.transpose(wk, (1, 2, 3, 0))                    # (ci, kh, kw, co)
    w1d = jnp.zeros((NUM_OBJECTS, H, W, P1, CNN_CHANNELS), jnp.float32)
    for oh in range(OH1):
        for ow in range(OH1):
            p = oh * OH1 + ow
            w1d = w1d.at[:, oh * S1:oh * S1 + K1, ow * S1:ow * S1 + K1, p, :].set(wk)
    w1d = w1d.reshape(KFLAT, P1C)
    w1d = jnp.pad(w1d, ((0, KPAD - KFLAT), (0, 0)))
    return w1d.astype(jnp.bfloat16)                          # (3328, 288)


@partial(jax.jit, static_argnames=("tb_cap",))
def simple_conv_agent_forward(obs, params, tb_cap=TB_CAP):
    """obs: float32 NCHW [B, 27, 11, 11] -> [B, OUTPUT_DIM] float32."""
    B = obs.shape[0]
    TB, num_tiles, B_pad = _choose_tiling(B, tb_cap)

    # Flatten NCHW -> [B, 3267] (free, contiguous), cast bf16, zero-pad K to
    # 3328 lanes and the batch to B_pad rows.  One fused XLA producer; the old
    # im2col/patches intermediate never exists.
    x = obs.reshape(B, KFLAT).astype(jnp.bfloat16)
    x = jnp.pad(x, ((0, B_pad - B), (0, KPAD - KFLAT)))       # [B_pad, 3328] bf16

    # Weight / bias prep (obs_norm folded into the dense conv1 weight).
    w1d = _build_dense_conv1_weight(params["conv1_w"], params["obs_norm"])
    b1 = jnp.tile(params["conv1_b"], (P1,)).reshape(1, P1C)   # same bias per position
    # conv2 weight [Cout, Cin, 3, 3] -> rows ordered ((kh*3+kw)*C + ci), bf16.
    w2 = jnp.transpose(params["conv2_w"], (2, 3, 1, 0)).reshape(P1C, CNN_CHANNELS)
    w2 = w2.astype(jnp.bfloat16)
    b2 = params["conv2_b"].reshape(1, CNN_CHANNELS)
    wl1 = params["fc1_w"].T                                   # [C, D] f32
    bl1 = params["fc1_b"].reshape(1, OUTPUT_DIM)
    wl2 = params["fc2_w"].T                                   # [D, D] f32
    bl2 = params["fc2_b"].reshape(1, OUTPUT_DIM)

    flops = 2 * B_pad * (KPAD * P1C + P1C * CNN_CHANNELS
                         + CNN_CHANNELS * OUTPUT_DIM + OUTPUT_DIM * OUTPUT_DIM)
    bytes_accessed = (B_pad * KPAD * 2 + B_pad * OUTPUT_DIM * 4
                      + w1d.size * 2 + w2.size * 2
                      + (wl1.size + wl2.size) * 4
                      + (b1.size + b2.size + bl1.size + bl2.size) * 4)

    def bcast(shape):   # weights/biases: same block every grid step (DMA'd once)
        return pl.BlockSpec(shape, lambda i: (0, 0))

    out_pad = pl.pallas_call(
        simple_conv_agent_kernel,
        out_shape=jax.ShapeDtypeStruct((B_pad, OUTPUT_DIM), jnp.float32),
        grid=(num_tiles,),
        in_specs=[
            pl.BlockSpec((TB, KPAD), lambda i: (i, 0)),        # obs stream (batch-tiled)
            bcast((KPAD, P1C)), bcast((1, P1C)),               # dense conv1 w/b
            bcast((P1C, CNN_CHANNELS)), bcast((1, CNN_CHANNELS)),
            bcast((CNN_CHANNELS, OUTPUT_DIM)), bcast((1, OUTPUT_DIM)),
            bcast((OUTPUT_DIM, OUTPUT_DIM)), bcast((1, OUTPUT_DIM)),
        ],
        out_specs=pl.BlockSpec((TB, OUTPUT_DIM), lambda i: (i, 0)),
        compiler_params=pltpu.CompilerParams(
            dimension_semantics=("parallel",),     # batch axis -> both TCs on v7x
            vmem_limit_bytes=32 * 1024 * 1024),    # TB=512 needs ~13 MiB; safe on all gens
        cost_estimate=pl.CostEstimate(flops=flops, transcendentals=0,
                                      bytes_accessed=bytes_accessed),
    )(x, w1d, b1, w2, b2, wl1, bl1, wl2, bl2)
    return out_pad[:B]


def reference_forward(obs, params):
    """Pure-JAX f32 reference matching the PyTorch forward."""
    x = obs / params["obs_norm"].reshape(1, NUM_OBJECTS, 1, 1)
    h = lax.conv_general_dilated(x, params["conv1_w"], (S1, S1), "VALID",
                                 dimension_numbers=("NCHW", "OIHW", "NCHW"))
    h = jnp.maximum(h + params["conv1_b"].reshape(1, -1, 1, 1), 0.0)
    h = lax.conv_general_dilated(h, params["conv2_w"], (S2, S2), "VALID",
                                 dimension_numbers=("NCHW", "OIHW", "NCHW"))
    h = jnp.maximum(h + params["conv2_b"].reshape(1, -1, 1, 1), 0.0)
    h = h.reshape(obs.shape[0], -1)                                      # Flatten
    h = jnp.maximum(h @ params["fc1_w"].T + params["fc1_b"], 0.0)
    h = jnp.maximum(h @ params["fc2_w"].T + params["fc2_b"], 0.0)
    return h


def init_params(key):
    ks = jax.random.split(key, 8)
    scale = 0.1
    return {
        "obs_norm": jnp.asarray([OBS_NORMALIZATIONS[k] for k in GRID_FEATURES],
                                dtype=jnp.float32),
        "conv1_w": scale * jax.random.normal(ks[0], (CNN_CHANNELS, NUM_OBJECTS, K1, K1), jnp.float32),
        "conv1_b": scale * jax.random.normal(ks[1], (CNN_CHANNELS,), jnp.float32),
        "conv2_w": scale * jax.random.normal(ks[2], (CNN_CHANNELS, CNN_CHANNELS, K2, K2), jnp.float32),
        "conv2_b": scale * jax.random.normal(ks[3], (CNN_CHANNELS,), jnp.float32),
        "fc1_w": scale * jax.random.normal(ks[4], (OUTPUT_DIM, CNN_CHANNELS), jnp.float32),
        "fc1_b": scale * jax.random.normal(ks[5], (OUTPUT_DIM,), jnp.float32),
        "fc2_w": scale * jax.random.normal(ks[6], (OUTPUT_DIM, OUTPUT_DIM), jnp.float32),
        "fc2_b": scale * jax.random.normal(ks[7], (OUTPUT_DIM,), jnp.float32),
    }


if __name__ == "__main__":
    key = jax.random.PRNGKey(0)
    k_obs, k_obs2, k_params = jax.random.split(key, 3)
    params = init_params(k_params)

    # 1) Small-shape check (single grid step).
    B = 2
    obs = jax.random.uniform(k_obs, (B, NUM_OBJECTS, H, W), jnp.float32, 0.0, 5.0)
    out = jax.block_until_ready(simple_conv_agent_forward(obs, params))
    ref = jax.block_until_ready(reference_forward(obs, params))
    assert out.shape == (B, OUTPUT_DIM)
    # bf16 obs/weight stream -> looser tolerance than a pure-f32 pipeline.
    assert jnp.allclose(out, ref, rtol=2e-2, atol=2e-2), (
        f"max abs err = {jnp.max(jnp.abs(out - ref))}")

    # 2) Multi-tile check: B > TB and B not a multiple of TB (exercises the
    #    batch-tiled index_map, the zero-padded tail, and weight residency).
    B2 = 70
    obs2 = jax.random.uniform(k_obs2, (B2, NUM_OBJECTS, H, W), jnp.float32, 0.0, 5.0)
    out2 = jax.block_until_ready(simple_conv_agent_forward(obs2, params, tb_cap=32))
    ref2 = jax.block_until_ready(reference_forward(obs2, params))
    assert out2.shape == (B2, OUTPUT_DIM)
    assert jnp.allclose(out2, ref2, rtol=2e-2, atol=2e-2), (
        f"max abs err = {jnp.max(jnp.abs(out2 - ref2))}")

    print("KERNEL_OK")
</pallas_src>

<mosaic_0001>
module attributes {stable_mosaic.version = 11 : i64} {
  func.func @simple_conv_agent_kernel(%arg0: i32, %arg1: memref<16x3328xbf16, #tpu.memory_space<vmem>>, %arg2: memref<3328x288xbf16, #tpu.memory_space<vmem>>, %arg3: memref<1x288xf32, #tpu.memory_space<vmem>>, %arg4: memref<288x32xbf16, #tpu.memory_space<vmem>>, %arg5: memref<1x32xf32, #tpu.memory_space<vmem>>, %arg6: memref<32x32xf32, #tpu.memory_space<vmem>>, %arg7: memref<1x32xf32, #tpu.memory_space<vmem>>, %arg8: memref<32x32xf32, #tpu.memory_space<vmem>>, %arg9: memref<1x32xf32, #tpu.memory_space<vmem>>, %arg10: memref<16x32xf32, #tpu.memory_space<vmem>>) attributes {dimension_semantics = [#tpu.dimension_semantics<parallel>], iteration_bounds = array<i64: 1>, scalar_prefetch = 0 : i64, scratch_operands = 0 : i64, tpu.core_type = #tpu.core_type<tc>, window_params = [{transform_indices = @transform_0, window_bounds = array<i64: 16, 3328>}, {pipeline_mode = #tpu.pipeline_mode<synchronous>, transform_indices = @transform_1, window_bounds = array<i64: 3328, 288>}, {pipeline_mode = #tpu.pipeline_mode<synchronous>, transform_indices = @transform_2, window_bounds = array<i64: 1, 288>}, {pipeline_mode = #tpu.pipeline_mode<synchronous>, transform_indices = @transform_3, window_bounds = array<i64: 288, 32>}, {pipeline_mode = #tpu.pipeline_mode<synchronous>, transform_indices = @transform_4, window_bounds = array<i64: 1, 32>}, {pipeline_mode = #tpu.pipeline_mode<synchronous>, transform_indices = @transform_5, window_bounds = array<i64: 32, 32>}, {pipeline_mode = #tpu.pipeline_mode<synchronous>, transform_indices = @transform_6, window_bounds = array<i64: 1, 32>}, {pipeline_mode = #tpu.pipeline_mode<synchronous>, transform_indices = @transform_7, window_bounds = array<i64: 32, 32>}, {pipeline_mode = #tpu.pipeline_mode<synchronous>, transform_indices = @transform_8, window_bounds = array<i64: 1, 32>}, {transform_indices = @transform_9, window_bounds = array<i64: 16, 32>}]} {
    %c0 = arith.constant 0 : index
    %c0_0 = arith.constant 0 : index
    %0 = vector.load %arg1[%c0, %c0_0] : memref<16x3328xbf16, #tpu.memory_space<vmem>>, vector<16x3328xbf16>
    %c0_1 = arith.constant 0 : index
    %c0_2 = arith.constant 0 : index
    %1 = vector.load %arg2[%c0_1, %c0_2] : memref<3328x288xbf16, #tpu.memory_space<vmem>>, vector<3328x288xbf16>
    %cst = arith.constant dense<0.000000e+00> : vector<16x288xf32>
    %2 = tpu.matmul %0, %1, %cst {dimension_numbers = #tpu.dot_dimension_numbers<[1], [0], [0], [1], [0, 0, 1, 1], [], []>} : vector<16x3328xbf16>, vector<3328x288xbf16>, vector<16x288xf32> -> vector<16x288xf32>
    %c0_3 = arith.constant 0 : index
    %c0_4 = arith.constant 0 : index
    %3 = vector.load %arg3[%c0_3, %c0_4] : memref<1x288xf32, #tpu.memory_space<vmem>>, vector<1x288xf32>
    %4 = vector.broadcast %3 : vector<1x288xf32> to vector<16x288xf32>
    %5 = arith.addf %2, %4 : vector<16x288xf32>
    %cst_5 = arith.constant 0.000000e+00 : f32
    %6 = vector.broadcast %cst_5 : f32 to vector<16x288xf32>
    %7 = arith.maximumf %5, %6 : vector<16x288xf32>
    %8 = arith.truncf %7 : vector<16x288xf32> to vector<16x288xbf16>
    %c0_6 = arith.constant 0 : index
    %c0_7 = arith.constant 0 : index
    %9 = vector.load %arg4[%c0_6, %c0_7] : memref<288x32xbf16, #tpu.memory_space<vmem>>, vector<288x32xbf16>
    %cst_8 = arith.constant dense<0.000000e+00> : vector<16x32xf32>
    %10 = tpu.matmul %8, %9, %cst_8 {dimension_numbers = #tpu.dot_dimension_numbers<[1], [0], [0], [1], [0, 0, 1, 1], [], []>} : vector<16x288xbf16>, vector<288x32xbf16>, vector<16x32xf32> -> vector<16x32xf32>
    %c0_9 = arith.constant 0 : index
    %c0_10 = arith.constant 0 : index
    %11 = vector.load %arg5[%c0_9, %c0_10] : memref<1x32xf32, #tpu.memory_space<vmem>>, vector<1x32xf32>
    %12 = vector.broadcast %11 : vector<1x32xf32> to vector<16x32xf32>
    %13 = arith.addf %10, %12 : vector<16x32xf32>
    %cst_11 = arith.constant 0.000000e+00 : f32
    %14 = vector.broadcast %cst_11 : f32 to vector<16x32xf32>
    %15 = arith.maximumf %13, %14 : vector<16x32xf32>
    %c0_12 = arith.constant 0 : index
    %c0_13 = arith.constant 0 : index
    %16 = vector.load %arg6[%c0_12, %c0_13] : memref<32x32xf32, #tpu.memory_space<vmem>>, vector<32x32xf32>
    %cst_14 = arith.constant dense<0.000000e+00> : vector<16x32xf32>
    %17 = tpu.matmul %15, %16, %cst_14 {dimension_numbers = #tpu.dot_dimension_numbers<[1], [0], [0], [1], [0, 0, 1, 1], [], []>} : vector<16x32xf32>, vector<32x32xf32>, vector<16x32xf32> -> vector<16x32xf32>
    %c0_15 = arith.constant 0 : index
    %c0_16 = arith.constant 0 : index
    %18 = vector.load %arg7[%c0_15, %c0_16] : memref<1x32xf32, #tpu.memory_space<vmem>>, vector<1x32xf32>
    %19 = vector.broadcast %18 : vector<1x32xf32> to vector<16x32xf32>
    %20 = arith.addf %17, %19 : vector<16x32xf32>
    %cst_17 = arith.constant 0.000000e+00 : f32
    %21 = vector.broadcast %cst_17 : f32 to vector<16x32xf32>
    %22 = arith.maximumf %20, %21 : vector<16x32xf32>
    %c0_18 = arith.constant 0 : index
    %c0_19 = arith.constant 0 : index
    %23 = vector.load %arg8[%c0_18, %c0_19] : memref<32x32xf32, #tpu.memory_space<vmem>>, vector<32x32xf32>
    %cst_20 = arith.constant dense<0.000000e+00> : vector<16x32xf32>
    %24 = tpu.matmul %22, %23, %cst_20 {dimension_numbers = #tpu.dot_dimension_numbers<[1], [0], [0], [1], [0, 0, 1, 1], [], []>} : vector<16x32xf32>, vector<32x32xf32>, vector<16x32xf32> -> vector<16x32xf32>
    %c0_21 = arith.constant 0 : index
    %c0_22 = arith.constant 0 : index
    %25 = vector.load %arg9[%c0_21, %c0_22] : memref<1x32xf32, #tpu.memory_space<vmem>>, vector<1x32xf32>
    %26 = vector.broadcast %25 : vector<1x32xf32> to vector<16x32xf32>
    %27 = arith.addf %24, %26 : vector<16x32xf32>
    %cst_23 = arith.constant 0.000000e+00 : f32
    %28 = vector.broadcast %cst_23 : f32 to vector<16x32xf32>
    %29 = arith.maximumf %27, %28 : vector<16x32xf32>
    %c0_24 = arith.constant 0 : index
    %c0_25 = arith.constant 0 : index
    %30 = vector.load %arg10[%c0_24, %c0_25] : memref<16x32xf32, #tpu.memory_space<vmem>>, vector<16x32xf32>
    tpu.vector_store %arg10[%c0_24, %c0_25], %29 {strides = array<i32>} : memref<16x32xf32, #tpu.memory_space<vmem>>, vector<16x32xf32>,
    return
  }
  func.func @transform_0(%arg0: i32) -> (i32, i32) {
    %c0_i32 = arith.constant 0 : i32
    %c0_i32_0 = arith.constant 0 : i32
    return %arg0, %c0_i32 : i32, i32
  }
  func.func @transform_1(%arg0: i32) -> (i32, i32) {
    %c0_i32 = arith.constant 0 : i32
    %c0_i32_0 = arith.constant 0 : i32
    %c0_i32_1 = arith.constant 0 : i32
    return %c0_i32, %c0_i32_0 : i32, i32
  }
  func.func @transform_2(%arg0: i32) -> (i32, i32) {
    %c0_i32 = arith.constant 0 : i32
    %c0_i32_0 = arith.constant 0 : i32
    %c0_i32_1 = arith.constant 0 : i32
    return %c0_i32, %c0_i32_0 : i32, i32
  }
  func.func @transform_3(%arg0: i32) -> (i32, i32) {
    %c0_i32 = arith.constant 0 : i32
    %c0_i32_0 = arith.constant 0 : i32
    %c0_i32_1 = arith.constant 0 : i32
    return %c0_i32, %c0_i32_0 : i32, i32
  }
  func.func @transform_4(%arg0: i32) -> (i32, i32) {
    %c0_i32 = arith.constant 0 : i32
    %c0_i32_0 = arith.constant 0 : i32
    %c0_i32_1 = arith.constant 0 : i32
    return %c0_i32, %c0_i32_0 : i32, i32
  }
  func.func @transform_5(%arg0: i32) -> (i32, i32) {
    %c0_i32 = arith.constant 0 : i32
    %c0_i32_0 = arith.constant 0 : i32
    %c0_i32_1 = arith.constant 0 : i32
    return %c0_i32, %c0_i32_0 : i32, i32
  }
  func.func @transform_6(%arg0: i32) -> (i32, i32) {
    %c0_i32 = arith.constant 0 : i32
    %c0_i32_0 = arith.constant 0 : i32
    %c0_i32_1 = arith.constant 0 : i32
    return %c0_i32, %c0_i32_0 : i32, i32
  }
  func.func @transform_7(%arg0: i32) -> (i32, i32) {
    %c0_i32 = arith.constant 0 : i32
    %c0_i32_0 = arith.constant 0 : i32
    %c0_i32_1 = arith.constant 0 : i32
    return %c0_i32, %c0_i32_0 : i32, i32
  }
  func.func @transform_8(%arg0: i32) -> (i32, i32) {
    %c0_i32 = arith.constant 0 : i32
    %c0_i32_0 = arith.constant 0 : i32
    %c0_i32_1 = arith.constant 0 : i32
    return %c0_i32, %c0_i32_0 : i32, i32
  }
  func.func @transform_9(%arg0: i32) -> (i32, i32) {
    %c0_i32 = arith.constant 0 : i32
    %c0_i32_0 = arith.constant 0 : i32
    return %arg0, %c0_i32 : i32, i32
  }
}

</mosaic_0001>

<bundles_post_ra>
// kernel: tile.8
= control target key start
LH: loop header
LB: loop body
LE: loop exit
PB: predicated region body
PF: predicated region fallthrough
CT: control target
= control target key end

     0   :  { %s28_s0 = inlined_call_operand.vmem [shape: f32[32], index: 0, kind: input, shape index: {}]   ;;  %s29_s1 = inlined_call_operand.vmem [shape: f32[9,32], index: 1, kind: output, shape index: {}]  }
   0x1   :  { %v4_v0 = vld [vmem:[%s28_s0] ss:$0 sm:$0xff] }
   0x2   :  { %5 = vst [vmem:[%s29_s1] sm:$0xff] %v4_v0  ;;  %8 = vst [vmem:[%s29_s1 + $0x8] sm:$0xff] %v4_v0 }

// kernel: tile.9
= control target key start
LH: loop header
LB: loop body
LE: loop exit
PB: predicated region body
PF: predicated region fallthrough
CT: control target
= control target key end

     0   :  { %s6_s6 = smov 3  ;;  %s13_s11 = smov 3  ;;  %vm3_vm0 = vcmask 261120   ;;  %vm10_vm1 = vcmask 1048320   ;;  %vm17_vm2 = vcmask 785920   ;;  %vm24_vm3 = vcmask 523520   ;;  %s86_s0 = inlined_call_operand.vmem [shape: f32[9,32], index: 0, kind: input, shape index: {}]   ;;  %s87_s1 = inlined_call_operand.vmem [shape: f32[1,288], index: 1, kind: output, shape index: {}]  }
   0x1   :  { %v2_v0 = vld [vmem:[%s86_s0] ss:$4 sm:$0x7]   ;;  %v44_v1 = vld [vmem:[%s86_s0 + $0x3] ss:$4 sm:%s6_s6]   ;;  %s52_s12 = smov 96  }
   0x2   :  { %8 = vrot.lane.b32.xlu0 %v44_v1, %s52_s12  ;;  %s20_s13 = smov 3  ;;  %4 = vst.msk [vmem:[#allocation0] ss:$8 sm:$0x7] %vm3_vm0, %v2_v0   ;;  %v45_v2 = vld [vmem:[%s86_s0 + $0x2] ss:$4 sm:%s13_s11]  }
   0x3   :  { %v46_v3 = vld [vmem:[%s86_s0 + $0x1] ss:$4 sm:%s20_s13]   ;;  %s53_s0 = smov 32   ;;  %s54_s18 = smov 64  }
   0x4   :  { %22 = vrot.lane.b32.xlu1 %v46_v3, %s53_s0 }
   0x6   :  { %15 = vrot.lane.b32.xlu0 %v45_v2, %s54_s18 }
   0x9   :  { %v38_v4 = vld [vmem:[#allocation0 + $0x10] sm:$0x1] }
   0xa   :  { %48 = vst [vmem:[%s87_s1 + $0x2] sm:$0x1] %v38_v4 }
  0x74   :  { %v9_v5 = vpop.permute.xlu0 %8  }
  0x75   :  { %11 = vst.msk [vmem:[#allocation0] ss:$8 sm:$0x3] %vm10_vm1, %v9_v5  }
  0x76   :  { %v23_v6 = vpop.permute.xlu1 %22  }
  0x78   :  { %v16_v7 = vpop.permute.xlu0 %15  }
  0x79   :  { %18 = vst.msk [vmem:[#allocation0] ss:$8 sm:$0x3] %vm17_vm2, %v16_v7  }
  0x7a   :  { %25 = vst.msk [vmem:[#allocation0] ss:$8 sm:$0x3] %vm24_vm3, %v23_v6  }
  0x81   :  { %v29_v8 = vld [vmem:[#allocation0] sm:$0x1]  ;;  %v33_v9 = vld [vmem:[#allocation0 + $0x8] sm:$0x1] }
  0x82   :  { %31 = vst [vmem:[%s87_s1] sm:$0x1] %v29_v8  ;;  %47 = vst [vmem:[%s87_s1 + $0x1] sm:$0x1] %v33_v9 }

// kernel: simple_conv_agent_forward.1
= control target key start
LH: loop header
LB: loop body
LE: loop exit
PB: predicated region body
PF: predicated region fallthrough
CT: control target
= control target key end

     0   :  { %vm7905_vm0 = vmmov 0   ;;  %vm5618_vm1 = vcmask 261120   ;;  %s10136_s1 = inlined_call_operand.vmem [shape: bf16[3328,288], index: 1, kind: input, shape index: {}]   ;;  %s10137_s0 = inlined_call_operand.vmem [shape: bf16[16,3328], index: 0, kind: input, shape index: {}]   ;;  %s10138_s2 = inlined_call_operand.vmem [shape: f32[1,288], index: 2, kind: input, shape index: {}]   ;;  %s10139_s3 = inlined_call_operand.vmem [shape: bf16[288,32], index: 3, kind: input, shape index: {}]   ;;  %s10140_s5 = inlined_call_operand.vmem [shape: f32[32,32], index: 5, kind: input, shape index: {}]   ;;  %s10141_s7 = inlined_call_operand.vmem [shape: f32[32,32], index: 7, kind: input, shape index: {}]   ;;  %s10142_s4 = inlined_call_operand.vmem [shape: f32[1,32], index: 4, kind: input, shape index: {}]   ;;  %s10143_s6 = inlined_call_operand.vmem [shape: f32[1,32], index: 6, kind: input, shape index: {}]   ;;  %s10144_s8 = inlined_call_operand.vmem [shape: f32[1,32], index: 8, kind: input, shape index: {}]   ;;  %s10145_s9 = inlined_call_operand.vmem [shape: f32[16,32], index: 9, kind: output, shape index: {}]  }
   0x1   :  { %v6999_v0 = vld [vmem:[%s10136_s1 + $0x4] ss:$12 sps:$4 sm:$0xff]   ;;  %v7003_v2 = vld [vmem:[%s10136_s1] ss:$12 sps:$4 sm:$0xff]   ;;  %v7005_v4 = vld [vmem:[%s10136_s1 + $0x1c] ss:$12 sps:$4 sm:$0xff]  }
   0x2   :  { %v7001_v1 = vld [vmem:[%s10136_s1 + $0x484] ss:$12 sps:$4 sm:$0xff]   ;;  %4366 = vmatprep.subr.bf16.mxu1 %v6999_v0  ;;  %v7004_v3 = vld [vmem:[%s10136_s1 + $0x480] ss:$12 sps:$4 sm:$0xff]   ;;  %v7007_v5 = vld [vmem:[%s10136_s1 + $0x49c] ss:$12 sps:$4 sm:$0xff]  }
   0x3   :  { %4495 = vmatprep.subr.bf16.mxu0 %v7001_v1  ;;  %4367 = vmatpush1.bf16.msra.mxu1 %v7003_v2  ;;  %v7009_v6 = vld [vmem:[%s10136_s1 + $0x18] ss:$12 sps:$4 sm:$0xff]   ;;  %v7011_v8 = vld [vmem:[%s10136_s1 + $0x34] ss:$12 sps:$4 sm:$0xff]   ;;  %v7015_v10 = vld [vmem:[%s10136_s1 + $0x30] ss:$12 sps:$4 sm:$0xff]  }
   0x4   :  { %4496 = vmatpush1.bf16.msra.mxu0 %v7004_v3  ;;  %4368 = vmatprep.subr.bf16.mxu1 %v7005_v4  ;;  %v7010_v7 = vld [vmem:[%s10136_s1 + $0x498] ss:$12 sps:$4 sm:$0xff]   ;;  %v7013_v9 = vld [vmem:[%s10136_s1 + $0x4b4] ss:$12 sps:$4 sm:$0xff]   ;;  %v7016_v11 = vld [vmem:[%s10136_s1 + $0x4b0] ss:$12 sps:$4 sm:$0xff]  }
   0x5   :  { %4497 = vmatprep.subr.bf16.mxu0 %v7007_v5  ;;  %v7017_v12 = vld [vmem:[%s10136_s1 + $0x4c] ss:$12 sps:$4 sm:$0xff]   ;;  %v7021_v14 = vld [vmem:[%s10136_s1 + $0x48] ss:$12 sps:$4 sm:$0xff]   ;;  %v7023_v16 = vld [vmem:[%s10136_s1 + $0x64] ss:$12 sps:$4 sm:$0xff]  }
   0x6   :  { %v7019_v13 = vld [vmem:[%s10136_s1 + $0x4cc] ss:$12 sps:$4 sm:$0xff]   ;;  %v7022_v15 = vld [vmem:[%s10136_s1 + $0x4c8] ss:$12 sps:$4 sm:$0xff]   ;;  %v7025_v17 = vld [vmem:[%s10136_s1 + $0x4e4] ss:$12 sps:$4 sm:$0xff]  }
   0x7   :  { %4369 = vmatpush1.bf16.msra.mxu1 %v7009_v6  ;;  %v7027_v18 = vld [vmem:[%s10136_s1 + $0x60] ss:$12 sps:$4 sm:$0xff]   ;;  %v7029_v20 = vld [vmem:[%s10136_s1 + $0x7c] ss:$12 sps:$4 sm:$0xff]   ;;  %v7033_v22 = vld [vmem:[%s10136_s1 + $0x78] ss:$12 sps:$4 sm:$0xff]  }
   0x8   :  { %4498 = vmatpush1.bf16.msra.mxu0 %v7010_v7  ;;  %4370 = vmatprep.subr.bf16.mxu1 %v7011_v8  ;;  %v7028_v19 = vld [vmem:[%s10136_s1 + $0x4e0] ss:$12 sps:$4 sm:$0xff]   ;;  %v7031_v21 = vld [vmem:[%s10136_s1 + $0x4fc] ss:$12 sps:$4 sm:$0xff]   ;;  %v7034_v23 = vld [vmem:[%s10136_s1 + $0x4f8] ss:$12 sps:$4 sm:$0xff]  }
   0x9   :  { %4499 = vmatprep.subr.bf16.mxu0 %v7013_v9  ;;  %v7035_v24 = vld [vmem:[%s10136_s1 + $0x94] ss:$12 sps:$4 sm:$0xff]   ;;  %v7039_v26 = vld [vmem:[%s10136_s1 + $0x90] ss:$12 sps:$4 sm:$0xff]   ;;  %v7041_v28 = vld [vmem:[%s10136_s1 + $0xac] ss:$12 sps:$4 sm:$0xff]  }
   0xa   :  { %v7037_v25 = vld [vmem:[%s10136_s1 + $0x514] ss:$12 sps:$4 sm:$0xff]   ;;  %v7040_v27 = vld [vmem:[%s10136_s1 + $0x510] ss:$12 sps:$4 sm:$0xff]   ;;  %v7043_v29 = vld [vmem:[%s10136_s1 + $0x52c] ss:$12 sps:$4 sm:$0xff]  }
   0xb   :  { %4371 = vmatpush1.bf16.msra.mxu1 %v7015_v10  ;;  %v7045_v30 = vld [vmem:[%s10136_s1 + $0xa8] ss:$12 sps:$4 sm:$0xff]   ;;  %v7047_v32 = vld [vmem:[%s10136_s1 + $0xc4] ss:$12 sps:$4 sm:$0xff]   ;;  %v7051_v34 = vld [vmem:[%s10136_s1 + $0xc0] ss:$12 sps:$4 sm:$0xff]  }
   0xc   :  { %4500 = vmatpush1.bf16.msra.mxu0 %v7016_v11  ;;  %4372 = vmatprep.subr.bf16.mxu1 %v7017_v12  ;;  %v7046_v31 = vld [vmem:[%s10136_s1 + $0x528] ss:$12 sps:$4 sm:$0xff]   ;;  %v7049_v33 = vld [vmem:[%s10136_s1 + $0x544] ss:$12 sps:$4 sm:$0xff]   ;;  %v7052_v35 = vld [vmem:[%s10136_s1 + $0x540] ss:$12 sps:$4 sm:$0xff]  }
   0xd   :  { %4501 = vmatprep.subr.bf16.mxu0 %v7019_v13  ;;  %v7053_v36 = vld [vmem:[%s10136_s1 + $0xdc] ss:$12 sps:$4 sm:$0xff]   ;;  %v7057_v38 = vld [vmem:[%s10136_s1 + $0xd8] ss:$12 sps:$4 sm:$0xff]   ;;  %v7059_v40 = vld [vmem:[%s10136_s1 + $0xf4] ss:$12 sps:$4 sm:$0xff]  }
   0xe   :  { %v7055_v37 = vld [vmem:[%s10136_s1 + $0x55c] ss:$12 sps:$4 sm:$0xff]   ;;  %v7058_v39 = vld [vmem:[%s10136_s1 + $0x558] ss:$12 sps:$4 sm:$0xff]   ;;  %v7061_v41 = vld [vmem:[%s10136_s1 + $0x574] ss:$12 sps:$4 sm:$0xff]  }
   0xf   :  { %4373 = vmatpush1.bf16.msra.mxu1 %v7021_v14  ;;  %v7063_v42 = vld [vmem:[%s10136_s1 + $0xf0] ss:$12 sps:$4 sm:$0xff]   ;;  %v7065_v44 = vld [vmem:[%s10136_s1 + $0x10c] ss:$12 sps:$4 sm:$0xff]   ;;  %v7069_v46 = vld [vmem:[%s10136_s1 + $0x108] ss:$12 sps:$4 sm:$0xff]  }
  0x10   :  { %4502 = vmatpush1.bf16.msra.mxu0 %v7022_v15  ;;  %4374 = vmatprep.subr.bf16.mxu1 %v7023_v16  ;;  %v7064_v43 = vld [vmem:[%s10136_s1 + $0x570] ss:$12 sps:$4 sm:$0xff]   ;;  %v7067_v45 = vld [vmem:[%s10136_s1 + $0x58c] ss:$12 sps:$4 sm:$0xff]   ;;  %v7070_v47 = vld [vmem:[%s10136_s1 + $0x588] ss:$12 sps:$4 sm:$0xff]  }
  0x11   :  { %4503 = vmatprep.subr.bf16.mxu0 %v7025_v17  ;;  %v7097_v48 = vld [vmem:[%s10137_s0 + $0x4] ss:$104 sps:$4 sm:$0xff]   ;;  %v7077_v54 = vld [vmem:[%s10136_s1 + $0x13c] ss:$12 sps:$4 sm:$0xff]   ;;  %v7083_v58 = vld [vmem:[%s10136_s1 + $0x154] ss:$12 sps:$4 sm:$0xff]  }
  0x12   :  { %v7071_v49 = vld [vmem:[%s10136_s1 + $0x124] ss:$12 sps:$4 sm:$0xff]   ;;  %4398 = vmatprep.mubr.bf16.mxu1 %v7097_v48  ;;  %v7075_v52 = vld [vmem:[%s10136_s1 + $0x120] ss:$12 sps:$4 sm:$0xff]   ;;  %v7079_v55 = vld [vmem:[%s10136_s1 + $0x5bc] ss:$12 sps:$4 sm:$0xff]  }
  0x13   :  { %4375 = vmatpush1.bf16.msra.mxu1 %v7027_v18  ;;  %v7073_v50 = vld [vmem:[%s10136_s1 + $0x5a4] ss:$12 sps:$4 sm:$0xff]   ;;  %v7076_v53 = vld [vmem:[%s10136_s1 + $0x5a0] ss:$12 sps:$4 sm:$0xff]   ;;  %v7093_v0 = vld [vmem:[%s10136_s1 + $0x168] ss:$12 sps:$4 sm:$0xff]  }
  0x14   :  { %4504 = vmatpush1.bf16.msra.mxu0 %v7028_v19  ;;  %4376 = vmatprep.subr.bf16.mxu1 %v7029_v20  ;;  %v7103_v51 = vld [vmem:[%s10137_s0 + $0x1c] ss:$104 sps:$4 sm:$0xff]   ;;  %v7085_v59 = vld [vmem:[%s10136_s1 + $0x5d4] ss:$12 sps:$4 sm:$0xff]   ;;  %v7089_v62 = vld [vmem:[%s10136_s1 + $0x16c] ss:$12 sps:$4 sm:$0xff]  }
  0x15   :  { %4505 = vmatprep.subr.bf16.mxu0 %v7031_v21  ;;  %4527 = vmatprep.mubr.bf16.mxu0 %v7103_v51  ;;  %v7081_v56 = vld [vmem:[%s10136_s1 + $0x138] ss:$12 sps:$4 sm:$0xff]   ;;  %v7087_v60 = vld [vmem:[%s10136_s1 + $0x150] ss:$12 sps:$4 sm:$0xff]   ;;  %v7094_v1 = vld [vmem:[%s10136_s1 + $0x5e8] ss:$12 sps:$4 sm:$0xff]  }
  0x16   :  { %v7082_v57 = vld [vmem:[%s10136_s1 + $0x5b8] ss:$12 sps:$4 sm:$0xff]   ;;  %v7088_v61 = vld [vmem:[%s10136_s1 + $0x5d0] ss:$12 sps:$4 sm:$0xff]   ;;  %v7095_v4 = vld [vmem:[%s10137_s0] ss:$104 sps:$4 sm:$0xff]  }
  0x17   :  { %4377 = vmatpush1.bf16.msra.mxu1 %v7033_v22  ;;  %v7091_v63 = vld [vmem:[%s10136_s1 + $0x5ec] ss:$12 sps:$4 sm:$0xff]   ;;  %v7100_v2 = vld [vmem:[%s10136_s1 + $0x184] ss:$12 sps:$4 sm:$0xff]   ;;  %v7109_v8 = vld [vmem:[%s10136_s1 + $0x19c] ss:$12 sps:$4 sm:$0xff]  }
  0x18   :  { %4506 = vmatpush1.bf16.msra.mxu0 %v7034_v23  ;;  %4378 = vmatprep.subr.bf16.mxu1 %v7035_v24  ;;  %v7106_v3 = vld [vmem:[%s10136_s1 + $0x604] ss:$12 sps:$4 sm:$0xff]   ;;  %v7098_v5 = vld [vmem:[%s10136_s1 + $0x180] ss:$12 sps:$4 sm:$0xff]   ;;  %v7112_v9 = vld [vmem:[%s10136_s1 + $0x61c] ss:$12 sps:$4 sm:$0xff]  }
  0x19   :  { %4507 = vmatprep.subr.bf16.mxu0 %v7037_v25  ;;  %v7101_v6 = vld [vmem:[%s10137_s0 + $0x18] ss:$104 sps:$4 sm:$0xff]   ;;  %v7113_v14 = vld [vmem:[%s10136_s1 + $0x1b0] ss:$12 sps:$4 sm:$0xff]   ;;  %v7119_v18 = vld [vmem:[%s10136_s1 + $0x1c8] ss:$12 sps:$4 sm:$0xff]  }
  0x1a   :  { %v7104_v7 = vld [vmem:[%s10136_s1 + $0x600] ss:$12 sps:$4 sm:$0xff]   ;;  %v7107_v10 = vld [vmem:[%s10136_s1 + $0x198] ss:$12 sps:$4 sm:$0xff]   ;;  %v7116_v15 = vld [vmem:[%s10136_s1 + $0x630] ss:$12 sps:$4 sm:$0xff]  }
  0x1b   :  { %4379 = vmatpush1.bf16.msra.mxu1 %v7039_v26  ;;  %v7110_v11 = vld [vmem:[%s10136_s1 + $0x618] ss:$12 sps:$4 sm:$0xff]   ;;  %v7115_v12 = vld [vmem:[%s10136_s1 + $0x1b4] ss:$12 sps:$4 sm:$0xff]   ;;  %v7133_v24 = vld [vmem:[%s10136_s1 + $0x1fc] ss:$12 sps:$4 sm:$0xff]  }
  0x1c   :  { %4508 = vmatpush1.bf16.msra.mxu0 %v7040_v27  ;;  %4380 = vmatprep.subr.bf16.mxu1 %v7041_v28  ;;  %v7118_v13 = vld [vmem:[%s10136_s1 + $0x634] ss:$12 sps:$4 sm:$0xff]   ;;  %v7121_v16 = vld [vmem:[%s10136_s1 + $0x1cc] ss:$12 sps:$4 sm:$0xff]   ;;  %v7127_v20 = vld [vmem:[%s10136_s1 + $0x1e4] ss:$12 sps:$4 sm:$0xff]  }
  0x1d   :  { %4509 = vmatprep.subr.bf16.mxu0 %v7043_v29  ;;  %v7124_v17 = vld [vmem:[%s10136_s1 + $0x64c] ss:$12 sps:$4 sm:$0xff]   ;;  %v7122_v19 = vld [vmem:[%s10136_s1 + $0x648] ss:$12 sps:$4 sm:$0xff]   ;;  %v7130_v21 = vld [vmem:[%s10136_s1 + $0x664] ss:$12 sps:$4 sm:$0xff]  }
  0x1e   :  { %v7125_v22 = vld [vmem:[%s10136_s1 + $0x1e0] ss:$12 sps:$4 sm:$0xff]   ;;  %v7136_v25 = vld [vmem:[%s10136_s1 + $0x67c] ss:$12 sps:$4 sm:$0xff]   ;;  %v7131_v26 = vld [vmem:[%s10136_s1 + $0x1f8] ss:$12 sps:$4 sm:$0xff]  }
  0x1f   :  { %4381 = vmatpush1.bf16.msra.mxu1 %v7045_v30  ;;  %v7128_v23 = vld [vmem:[%s10136_s1 + $0x660] ss:$12 sps:$4 sm:$0xff]   ;;  %v7134_v27 = vld [vmem:[%s10136_s1 + $0x678] ss:$12 sps:$4 sm:$0xff]   ;;  %v7137_v30 = vld [vmem:[%s10136_s1 + $0x210] ss:$12 sps:$4 sm:$0xff]  }
  0x20   :  { %4510 = vmatpush1.bf16.msra.mxu0 %v7046_v31  ;;  %4382 = vmatprep.subr.bf16.mxu1 %v7047_v32  ;;  %v7139_v28 = vld [vmem:[%s10136_s1 + $0x214] ss:$12 sps:$4 sm:$0xff]   ;;  %v7140_v31 = vld [vmem:[%s10136_s1 + $0x690] ss:$12 sps:$4 sm:$0xff]   ;;  %v7145_v32 = vld [vmem:[%s10136_s1 + $0x22c] ss:$12 sps:$4 sm:$0xff]  }
  0x21   :  { %4511 = vmatprep.subr.bf16.mxu0 %v7049_v33  ;;  %v7142_v29 = vld [vmem:[%s10136_s1 + $0x694] ss:$12 sps:$4 sm:$0xff]   ;;  %v7148_v33 = vld [vmem:[%s10136_s1 + $0x6ac] ss:$12 sps:$4 sm:$0xff]   ;;  %v7161_v48 = vld [vmem:[%s10136_s1 + $0x270] ss:$12 sps:$4 sm:$0xff]  }
  0x22   :  { %v7172_v51 = vld [vmem:[%s10136_s1 + $0x70c] ss:$12 sps:$4 sm:$0xff]  }
  0x23   :  { %4383 = vmatpush1.bf16.msra.mxu1 %v7051_v34  ;;  %v7199_v34 = vld [vmem:[%s10137_s0 + $0xc] ss:$104 sps:$4 sm:$0xff]  }
  0x24   :  { %4512 = vmatpush1.bf16.msra.mxu0 %v7052_v35  ;;  %4384 = vmatprep.subr.bf16.mxu1 %v7053_v36  ;;  %v7143_v35 = vld [vmem:[%s10136_s1 + $0x228] ss:$12 sps:$4 sm:$0xff]  }
  0x25   :  { %4513 = vmatprep.subr.bf16.mxu0 %v7055_v37  ;;  %v7146_v36 = vld [vmem:[%s10136_s1 + $0x6a8] ss:$12 sps:$4 sm:$0xff]   ;;  %v7205_v37 = vld [vmem:[%s10137_s0 + $0x24] ss:$104 sps:$4 sm:$0xff]  }
  0x27   :  { %4385 = vmatpush1.bf16.msra.mxu1 %v7057_v38  ;;  %v7151_v38 = vld [vmem:[%s10136_s1 + $0x244] ss:$12 sps:$4 sm:$0xff]  }
  0x28   :  { %4514 = vmatpush1.bf16.msra.mxu0 %v7058_v39  ;;  %4386 = vmatprep.subr.bf16.mxu1 %v7059_v40  ;;  %v7154_v39 = vld [vmem:[%s10136_s1 + $0x6c4] ss:$12 sps:$4 sm:$0xff]   ;;  %v7149_v40 = vld [vmem:[%s10136_s1 + $0x240] ss:$12 sps:$4 sm:$0xff]  }
  0x29   :  { %4515 = vmatprep.subr.bf16.mxu0 %v7061_v41  ;;  %v7152_v41 = vld [vmem:[%s10136_s1 + $0x6c0] ss:$12 sps:$4 sm:$0xff]  }
  0x2b   :  { %4387 = vmatpush1.bf16.msra.mxu1 %v7063_v42  ;;  %v7157_v42 = vld [vmem:[%s10136_s1 + $0x25c] ss:$12 sps:$4 sm:$0xff]  }
  0x2c   :  { %4516 = vmatpush1.bf16.msra.mxu0 %v7064_v43  ;;  %4388 = vmatprep.subr.bf16.mxu1 %v7065_v44  ;;  %v7160_v43 = vld [vmem:[%s10136_s1 + $0x6dc] ss:$12 sps:$4 sm:$0xff]   ;;  %v7155_v44 = vld [vmem:[%s10136_s1 + $0x258] ss:$12 sps:$4 sm:$0xff]  }
  0x2d   :  { %4517 = vmatprep.subr.bf16.mxu0 %v7067_v45  ;;  %v7158_v45 = vld [vmem:[%s10136_s1 + $0x6d8] ss:$12 sps:$4 sm:$0xff]  }
  0x2f   :  { %4389 = vmatpush1.bf16.msra.mxu1 %v7069_v46  ;;  %v7163_v46 = vld [vmem:[%s10136_s1 + $0x274] ss:$12 sps:$4 sm:$0xff]  }
  0x30   :  { %4518 = vmatpush1.bf16.msra.mxu0 %v7070_v47  ;;  %4390 = vmatprep.subr.bf16.mxu1 %v7071_v49  ;;  %v7166_v47 = vld [vmem:[%s10136_s1 + $0x6f4] ss:$12 sps:$4 sm:$0xff]   ;;  %v7164_v49 = vld [vmem:[%s10136_s1 + $0x6f0] ss:$12 sps:$4 sm:$0xff]  }
  0x31   :  { %4519 = vmatprep.subr.bf16.mxu0 %v7073_v50  ;;  %v7169_v50 = vld [vmem:[%s10136_s1 + $0x28c] ss:$12 sps:$4 sm:$0xff]  }
  0x33   :  { %4391 = vmatpush1.bf16.msra.mxu1 %v7075_v52  ;;  %v7167_v52 = vld [vmem:[%s10136_s1 + $0x288] ss:$12 sps:$4 sm:$0xff]  }
  0x34   :  { %4520 = vmatpush1.bf16.msra.mxu0 %v7076_v53  ;;  %4392 = vmatprep.subr.bf16.mxu1 %v7077_v54  ;;  %v7170_v53 = vld [vmem:[%s10136_s1 + $0x708] ss:$12 sps:$4 sm:$0xff]   ;;  %v7175_v54 = vld [vmem:[%s10136_s1 + $0x2a4] ss:$12 sps:$4 sm:$0xff]  }
  0x35   :  { %4521 = vmatprep.subr.bf16.mxu0 %v7079_v55  ;;  %v7178_v55 = vld [vmem:[%s10136_s1 + $0x724] ss:$12 sps:$4 sm:$0xff]  }
  0x37   :  { %4393 = vmatpush1.bf16.msra.mxu1 %v7081_v56  ;;  %v7173_v56 = vld [vmem:[%s10136_s1 + $0x2a0] ss:$12 sps:$4 sm:$0xff]  }
  0x38   :  { %4522 = vmatpush1.bf16.msra.mxu0 %v7082_v57  ;;  %4394 = vmatprep.subr.bf16.mxu1 %v7083_v58  ;;  %v7176_v57 = vld [vmem:[%s10136_s1 + $0x720] ss:$12 sps:$4 sm:$0xff]   ;;  %v7181_v58 = vld [vmem:[%s10136_s1 + $0x2bc] ss:$12 sps:$4 sm:$0xff]  }
  0x39   :  { %4523 = vmatprep.subr.bf16.mxu0 %v7085_v59  ;;  %v7184_v59 = vld [vmem:[%s10136_s1 + $0x73c] ss:$12 sps:$4 sm:$0xff]  }
  0x3b   :  { %4395 = vmatpush1.bf16.msra.mxu1 %v7087_v60  ;;  %v7179_v60 = vld [vmem:[%s10136_s1 + $0x2b8] ss:$12 sps:$4 sm:$0xff]  }
  0x3c   :  { %4524 = vmatpush1.bf16.msra.mxu0 %v7088_v61  ;;  %4396 = vmatprep.subr.bf16.mxu1 %v7089_v62  ;;  %v7182_v61 = vld [vmem:[%s10136_s1 + $0x738] ss:$12 sps:$4 sm:$0xff]   ;;  %v7187_v62 = vld [vmem:[%s10136_s1 + $0x2d4] ss:$12 sps:$4 sm:$0xff]  }
  0x3d   :  { %4525 = vmatprep.subr.bf16.mxu0 %v7091_v63  ;;  %v7190_v63 = vld [vmem:[%s10136_s1 + $0x754] ss:$12 sps:$4 sm:$0xff]  }
  0x3f   :  { %4397 = vmatpush1.bf16.msra.mxu1 %v7093_v0  ;;  %v7185_v0 = vld [vmem:[%s10136_s1 + $0x2d0] ss:$12 sps:$4 sm:$0xff]  }
  0x40   :  { %4526 = vmatpush1.bf16.msra.mxu0 %v7094_v1  ;;  %4409 = vmatprep.subr.bf16.mxu1 %v7100_v2  ;;  %v7188_v1 = vld [vmem:[%s10136_s1 + $0x750] ss:$12 sps:$4 sm:$0xff]   ;;  %v7193_v2 = vld [vmem:[%s10136_s1 + $0x2ec] ss:$12 sps:$4 sm:$0xff]  }
  0x41   :  { %4538 = vmatprep.subr.bf16.mxu0 %v7106_v3  ;;  %v7196_v3 = vld [vmem:[%s10136_s1 + $0x76c] ss:$12 sps:$4 sm:$0xff]  }
  0x42   :  { %4399 = vmatmul.mubr.bf16.vlgmr.msra.gmra.mrb[0].mxu1 %v7095_v4  ;;  %v7191_v4 = vld [vmem:[%s10136_s1 + $0x2e8] ss:$12 sps:$4 sm:$0xff]  }
  0x43   :  { %4528 = vmatmul.mubr.bf16.vlgmr.msra.gmra.mrb[0].mxu0 %v7101_v6  ;;  %4410 = vmatpush1.bf16.msra.mxu1 %v7098_v5  ;;  %v7194_v5 = vld [vmem:[%s10136_s1 + $0x768] ss:$12 sps:$4 sm:$0xff]   ;;  %v7202_v6 = vld [vmem:[%s10136_s1 + $0x304] ss:$12 sps:$4 sm:$0xff]  }
  0x44   :  { %4539 = vmatpush1.bf16.msra.mxu0 %v7104_v7  ;;  %4411 = vmatprep.subr.bf16.mxu1 %v7109_v8  ;;  %v7208_v7 = vld [vmem:[%s10136_s1 + $0x784] ss:$12 sps:$4 sm:$0xff]  }
  0x45   :  { %4540 = vmatprep.subr.bf16.mxu0 %v7112_v9  ;;  %4441 = vmatprep.mubr.bf16.mxu1 %v7199_v34  ;;  %v7197_v8 = vld [vmem:[%s10137_s0 + $0x8] ss:$104 sps:$4 sm:$0xff]   ;;  %v7200_v9 = vld [vmem:[%s10136_s1 + $0x300] ss:$12 sps:$4 sm:$0xff]  }
  0x46   :  { %4570 = vmatprep.mubr.bf16.mxu0 %v7205_v37  ;;  %v7241_v34 = vld [vmem:[%s10136_s1 + $0x394] ss:$12 sps:$4 sm:$0xff]   ;;  %v7242_v37 = vld [vmem:[%s10136_s1 + $0x810] ss:$12 sps:$4 sm:$0xff]  }
  0x47   :  { %4412 = vmatpush1.bf16.msra.mxu1 %v7107_v10  ;;  %v7203_v10 = vld [vmem:[%s10137_s0 + $0x20] ss:$104 sps:$4 sm:$0xff]  }
  0x48   :  { %4541 = vmatpush1.bf16.msra.mxu0 %v7110_v11  ;;  %4413 = vmatprep.subr.bf16.mxu1 %v7115_v12  ;;  %v7206_v11 = vld [vmem:[%s10136_s1 + $0x780] ss:$12 sps:$4 sm:$0xff]   ;;  %v7211_v12 = vld [vmem:[%s10136_s1 + $0x31c] ss:$12 sps:$4 sm:$0xff]  }
  0x49   :  { %4542 = vmatprep.subr.bf16.mxu0 %v7118_v13  ;;  %v7214_v13 = vld [vmem:[%s10136_s1 + $0x79c] ss:$12 sps:$4 sm:$0xff]  }
  0x4b   :  { %4414 = vmatpush1.bf16.msra.mxu1 %v7113_v14  ;;  %v7209_v14 = vld [vmem:[%s10136_s1 + $0x318] ss:$12 sps:$4 sm:$0xff]  }
  0x4c   :  { %4543 = vmatpush1.bf16.msra.mxu0 %v7116_v15  ;;  %4415 = vmatprep.subr.bf16.mxu1 %v7121_v16  ;;  %v7212_v15 = vld [vmem:[%s10136_s1 + $0x798] ss:$12 sps:$4 sm:$0xff]   ;;  %v7217_v16 = vld [vmem:[%s10136_s1 + $0x334] ss:$12 sps:$4 sm:$0xff]  }
  0x4d   :  { %4544 = vmatprep.subr.bf16.mxu0 %v7124_v17  ;;  %v7220_v17 = vld [vmem:[%s10136_s1 + $0x7b4] ss:$12 sps:$4 sm:$0xff]  }
  0x4f   :  { %4416 = vmatpush1.bf16.msra.mxu1 %v7119_v18  ;;  %v7215_v18 = vld [vmem:[%s10136_s1 + $0x330] ss:$12 sps:$4 sm:$0xff]  }
  0x50   :  { %4545 = vmatpush1.bf16.msra.mxu0 %v7122_v19  ;;  %4417 = vmatprep.subr.bf16.mxu1 %v7127_v20  ;;  %v8400_v19 = vld [vmem:[%s10137_s0 + $0x14] ss:$104 sps:$4 sm:$0xff]  }
  0x51   :  { %4546 = vmatprep.subr.bf16.mxu0 %v7130_v21  ;;  %v7218_v20 = vld [vmem:[%s10136_s1 + $0x7b0] ss:$12 sps:$4 sm:$0xff]   ;;  %v7304_v21 = vld [vmem:[%s10137_s0 + $0x2c] ss:$104 sps:$4 sm:$0xff]  }
  0x53   :  { %4418 = vmatpush1.bf16.msra.mxu1 %v7125_v22  ;;  %v7223_v22 = vld [vmem:[%s10136_s1 + $0x34c] ss:$12 sps:$4 sm:$0xff]  }
  0x54   :  { %4547 = vmatpush1.bf16.msra.mxu0 %v7128_v23  ;;  %4419 = vmatprep.subr.bf16.mxu1 %v7133_v24  ;;  %v7226_v23 = vld [vmem:[%s10136_s1 + $0x7cc] ss:$12 sps:$4 sm:$0xff]   ;;  %v7221_v24 = vld [vmem:[%s10136_s1 + $0x348] ss:$12 sps:$4 sm:$0xff]  }
  0x55   :  { %4548 = vmatprep.subr.bf16.mxu0 %v7136_v25  ;;  %v7224_v25 = vld [vmem:[%s10136_s1 + $0x7c8] ss:$12 sps:$4 sm:$0xff]  }
  0x57   :  { %4420 = vmatpush1.bf16.msra.mxu1 %v7131_v26  ;;  %v7229_v26 = vld [vmem:[%s10136_s1 + $0x364] ss:$12 sps:$4 sm:$0xff]  }
  0x58   :  { %4549 = vmatpush1.bf16.msra.mxu0 %v7134_v27  ;;  %4421 = vmatprep.subr.bf16.mxu1 %v7139_v28  ;;  %v7232_v27 = vld [vmem:[%s10136_s1 + $0x7e4] ss:$12 sps:$4 sm:$0xff]   ;;  %v7227_v28 = vld [vmem:[%s10136_s1 + $0x360] ss:$12 sps:$4 sm:$0xff]  }
  0x59   :  { %4550 = vmatprep.subr.bf16.mxu0 %v7142_v29  ;;  %v7230_v29 = vld [vmem:[%s10136_s1 + $0x7e0] ss:$12 sps:$4 sm:$0xff]  }
  0x5b   :  { %4422 = vmatpush1.bf16.msra.mxu1 %v7137_v30  ;;  %v7235_v30 = vld [vmem:[%s10136_s1 + $0x37c] ss:$12 sps:$4 sm:$0xff]  }
  0x5c   :  { %4551 = vmatpush1.bf16.msra.mxu0 %v7140_v31  ;;  %4423 = vmatprep.subr.bf16.mxu1 %v7145_v32  ;;  %v7238_v31 = vld [vmem:[%s10136_s1 + $0x7fc] ss:$12 sps:$4 sm:$0xff]   ;;  %v7233_v32 = vld [vmem:[%s10136_s1 + $0x378] ss:$12 sps:$4 sm:$0xff]  }
  0x5d   :  { %4552 = vmatprep.subr.bf16.mxu0 %v7148_v33  ;;  %v7236_v33 = vld [vmem:[%s10136_s1 + $0x7f8] ss:$12 sps:$4 sm:$0xff]  }
  0x5f   :  { %4424 = vmatpush1.bf16.msra.mxu1 %v7143_v35  ;;  %v7244_v35 = vld [vmem:[%s10136_s1 + $0x814] ss:$12 sps:$4 sm:$0xff]  }
  0x60   :  { %4553 = vmatpush1.bf16.msra.mxu0 %v7146_v36  ;;  %4425 = vmatprep.subr.bf16.mxu1 %v7151_v38  ;;  %v7239_v36 = vld [vmem:[%s10136_s1 + $0x390] ss:$12 sps:$4 sm:$0xff]   ;;  %v7247_v38 = vld [vmem:[%s10136_s1 + $0x3ac] ss:$12 sps:$4 sm:$0xff]  }
  0x61   :  { %4554 = vmatprep.subr.bf16.mxu0 %v7154_v39  ;;  %v7250_v39 = vld [vmem:[%s10136_s1 + $0x82c] ss:$12 sps:$4 sm:$0xff]  }
  0x63   :  { %4426 = vmatpush1.bf16.msra.mxu1 %v7149_v40  ;;  %v7245_v40 = vld [vmem:[%s10136_s1 + $0x3a8] ss:$12 sps:$4 sm:$0xff]  }
  0x64   :  { %4555 = vmatpush1.bf16.msra.mxu0 %v7152_v41  ;;  %4427 = vmatprep.subr.bf16.mxu1 %v7157_v42  ;;  %v7248_v41 = vld [vmem:[%s10136_s1 + $0x828] ss:$12 sps:$4 sm:$0xff]   ;;  %v7253_v42 = vld [vmem:[%s10136_s1 + $0x3c4] ss:$12 sps:$4 sm:$0xff]  }
  0x65   :  { %4556 = vmatprep.subr.bf16.mxu0 %v7160_v43  ;;  %v7256_v43 = vld [vmem:[%s10136_s1 + $0x844] ss:$12 sps:$4 sm:$0xff]  }
  0x67   :  { %4428 = vmatpush1.bf16.msra.mxu1 %v7155_v44  ;;  %v7251_v44 = vld [vmem:[%s10136_s1 + $0x3c0] ss:$12 sps:$4 sm:$0xff]  }
  0x68   :  { %4557 = vmatpush1.bf16.msra.mxu0 %v7158_v45  ;;  %4429 = vmatprep.subr.bf16.mxu1 %v7163_v46  ;;  %v7254_v45 = vld [vmem:[%s10136_s1 + $0x840] ss:$12 sps:$4 sm:$0xff]   ;;  %v7259_v46 = vld [vmem:[%s10136_s1 + $0x3dc] ss:$12 sps:$4 sm:$0xff]  }
  0x69   :  { %4558 = vmatprep.subr.bf16.mxu0 %v7166_v47  ;;  %v7262_v47 = vld [vmem:[%s10136_s1 + $0x85c] ss:$12 sps:$4 sm:$0xff]  }
  0x6b   :  { %4430 = vmatpush1.bf16.msra.mxu1 %v7161_v48  ;;  %v7257_v48 = vld [vmem:[%s10136_s1 + $0x3d8] ss:$12 sps:$4 sm:$0xff]  }
  0x6c   :  { %4559 = vmatpush1.bf16.msra.mxu0 %v7164_v49  ;;  %4431 = vmatprep.subr.bf16.mxu1 %v7169_v50  ;;  %v7260_v49 = vld [vmem:[%s10136_s1 + $0x858] ss:$12 sps:$4 sm:$0xff]   ;;  %v7265_v50 = vld [vmem:[%s10136_s1 + $0x3f4] ss:$12 sps:$4 sm:$0xff]  }
  0x6d   :  { %4560 = vmatprep.subr.bf16.mxu0 %v7172_v51  ;;  %v7268_v51 = vld [vmem:[%s10136_s1 + $0x874] ss:$12 sps:$4 sm:$0xff]  }
  0x6f   :  { %4432 = vmatpush1.bf16.msra.mxu1 %v7167_v52  ;;  %v7263_v52 = vld [vmem:[%s10136_s1 + $0x3f0] ss:$12 sps:$4 sm:$0xff]  }
  0x70   :  { %4561 = vmatpush1.bf16.msra.mxu0 %v7170_v53  ;;  %4433 = vmatprep.subr.bf16.mxu1 %v7175_v54  ;;  %v7266_v53 = vld [vmem:[%s10136_s1 + $0x870] ss:$12 sps:$4 sm:$0xff]   ;;  %v7271_v54 = vld [vmem:[%s10136_s1 + $0x40c] ss:$12 sps:$4 sm:$0xff]  }
  0x71   :  { %4562 = vmatprep.subr.bf16.mxu0 %v7178_v55  ;;  %v7274_v55 = vld [vmem:[%s10136_s1 + $0x88c] ss:$12 sps:$4 sm:$0xff]  }
  0x73   :  { %4434 = vmatpush1.bf16.msra.mxu1 %v7173_v56  ;;  %v7269_v56 = vld [vmem:[%s10136_s1 + $0x408] ss:$12 sps:$4 sm:$0xff]  }
  0x74   :  { %4563 = vmatpush1.bf16.msra.mxu0 %v7176_v57  ;;  %4435 = vmatprep.subr.bf16.mxu1 %v7181_v58  ;;  %v7272_v57 = vld [vmem:[%s10136_s1 + $0x888] ss:$12 sps:$4 sm:$0xff]   ;;  %v7277_v58 = vld [vmem:[%s10136_s1 + $0x424] ss:$12 sps:$4 sm:$0xff]  }
  0x75   :  { %4564 = vmatprep.subr.bf16.mxu0 %v7184_v59  ;;  %v7280_v59 = vld [vmem:[%s10136_s1 + $0x8a4] ss:$12 sps:$4 sm:$0xff]  }
  0x77   :  { %4436 = vmatpush1.bf16.msra.mxu1 %v7179_v60  ;;  %v7275_v60 = vld [vmem:[%s10136_s1 + $0x420] ss:$12 sps:$4 sm:$0xff]  }
  0x78   :  { %4565 = vmatpush1.bf16.msra.mxu0 %v7182_v61  ;;  %4437 = vmatprep.subr.bf16.mxu1 %v7187_v62  ;;  %v7278_v61 = vld [vmem:[%s10136_s1 + $0x8a0] ss:$12 sps:$4 sm:$0xff]   ;;  %v7283_v62 = vld [vmem:[%s10136_s1 + $0x43c] ss:$12 sps:$4 sm:$0xff]  }
  0x79   :  { %4566 = vmatprep.subr.bf16.mxu0 %v7190_v63  ;;  %v7286_v63 = vld [vmem:[%s10136_s1 + $0x8bc] ss:$12 sps:$4 sm:$0xff]  }
  0x7b   :  { %4438 = vmatpush1.bf16.msra.mxu1 %v7185_v0  ;;  %v7281_v0 = vld [vmem:[%s10136_s1 + $0x438] ss:$12 sps:$4 sm:$0xff]  }
  0x7c   :  { %4567 = vmatpush1.bf16.msra.mxu0 %v7188_v1  ;;  %4439 = vmatprep.subr.bf16.mxu1 %v7193_v2  ;;  %v7284_v1 = vld [vmem:[%s10136_s1 + $0x8b8] ss:$12 sps:$4 sm:$0xff]   ;;  %v7289_v2 = vld [vmem:[%s10136_s1 + $0x454] ss:$12 sps:$4 sm:$0xff]  }
  0x7d   :  { %4568 = vmatprep.subr.bf16.mxu0 %v7196_v3  ;;  %v7292_v3 = vld [vmem:[%s10136_s1 + $0x8d4] ss:$12 sps:$4 sm:$0xff]  }
  0x7f   :  { %4440 = vmatpush1.bf16.msra.mxu1 %v7191_v4  ;;  %v7287_v4 = vld [vmem:[%s10136_s1 + $0x450] ss:$12 sps:$4 sm:$0xff]  }
  0x80   :  { %4569 = vmatpush1.bf16.msra.mxu0 %v7194_v5  ;;  %4452 = vmatprep.subr.bf16.mxu1 %v7202_v6  ;;  %v7290_v5 = vld [vmem:[%s10136_s1 + $0x8d0] ss:$12 sps:$4 sm:$0xff]   ;;  %v7295_v6 = vld [vmem:[%s10136_s1 + $0x46c] ss:$12 sps:$4 sm:$0xff]  }
  0x81   :  { %4581 = vmatprep.subr.bf16.mxu0 %v7208_v7  ;;  %v7298_v7 = vld [vmem:[%s10136_s1 + $0x8ec] ss:$12 sps:$4 sm:$0xff]  }
  0x82   :  { %4442 = vmatmul.mubr.bf16.vlgmr.msra.gmra.mrb[0].mxu1 %v7197_v8  ;;  %v7293_v8 = vld [vmem:[%s10136_s1 + $0x468] ss:$12 sps:$4 sm:$0xff]  }
  0x83   :  { %4571 = vmatmul.mubr.bf16.vlgmr.msra.gmra.mrb[0].mxu0 %v7203_v10  ;;  %4453 = vmatpush1.bf16.msra.mxu1 %v7200_v9  ;;  %v7296_v9 = vld [vmem:[%s10136_s1 + $0x8e8] ss:$12 sps:$4 sm:$0xff]   ;;  %v7307_v10 = vld [vmem:[%s10136_s1 + $0x904] ss:$12 sps:$4 sm:$0xff]  }
  0x84   :  { %4582 = vmatpush1.bf16.msra.mxu0 %v7206_v11  ;;  %4454 = vmatprep.subr.bf16.mxu1 %v7211_v12  ;;  %v7308_v11 = vld [vmem:[%s10136_s1 + $0xc8] ss:$12 sps:$4 sm:$0xff]   ;;  %v8574_v12 = vld [vmem:[%s10137_s0 + $0x10] ss:$104 sps:$4 sm:$0xff]  }
  0x85   :  { %4583 = vmatprep.subr.bf16.mxu0 %v7214_v13  ;;  %4484 = vmatprep.mubr.bf16.mxu1 %v8400_v19  ;;  %v7302_v13 = vld [vmem:[%s10137_s0 + $0x28] ss:$104 sps:$4 sm:$0xff]  }
  0x86   :  { %4613 = vmatprep.mubr.bf16.mxu0 %v7304_v21  ;;  %v7314_v21 = vld [vmem:[%s10136_s1 + $0x20] ss:$12 sps:$4 sm:$0xff]  }
  0x87   :  { %4455 = vmatpush1.bf16.msra.mxu1 %v7209_v14  ;;  %v7305_v14 = vld [vmem:[%s10136_s1 + $0x900] ss:$12 sps:$4 sm:$0xff]  }
  0x88   :  { %4584 = vmatpush1.bf16.msra.mxu0 %v7212_v15  ;;  %4456 = vmatprep.subr.bf16.mxu1 %v7217_v16  ;;  %v7309_v15 = vld [vmem:[%s10136_s1 + $0x8] ss:$12 sps:$4 sm:$0xff]  }
  0x89   :  { %4585 = vmatprep.subr.bf16.mxu0 %v7220_v17  ;;  %v7312_v16 = vld [vmem:[%s10136_s1 + $0x91c] ss:$12 sps:$4 sm:$0xff]   ;;  %v7313_v17 = vld [vmem:[%s10136_s1 + $0xe0] ss:$12 sps:$4 sm:$0xff]  }
  0x8b   :  { %4457 = vmatpush1.bf16.msra.mxu1 %v7215_v18  ;;  %v7310_v18 = vld [vmem:[%s10136_s1 + $0x918] ss:$12 sps:$4 sm:$0xff]  }
  0x8c   :  { %4586 = vmatpush1.bf16.msra.mxu0 %v7218_v20  ;;  %4458 = vmatprep.subr.bf16.mxu1 %v7223_v22  ;;  %v7387_v20 = vld [vmem:[%s10137_s0 + $0x34] ss:$104 sps:$4 sm:$0xff]  }
  0x8d   :  { %4587 = vmatprep.subr.bf16.mxu0 %v7226_v23  ;;  %v7317_v22 = vld [vmem:[%s10136_s1 + $0x934] ss:$12 sps:$4 sm:$0xff]   ;;  %v7318_v23 = vld [vmem:[%s10136_s1 + $0xf8] ss:$12 sps:$4 sm:$0xff]  }
  0x8f   :  { %4459 = vmatpush1.bf16.msra.mxu1 %v7221_v24  ;;  %v7888_v24 = vld [vmem:[%s10137_s0 + $0x4] ss:$104 sps:$4 sm:$0xff]  }
  0x90   :  { %4588 = vmatpush1.bf16.msra.mxu0 %v7224_v25  ;;  %4460 = vmatprep.subr.bf16.mxu1 %v7229_v26  ;;  %v7315_v25 = vld [vmem:[%s10136_s1 + $0x930] ss:$12 sps:$4 sm:$0xff]   ;;  %v7319_v26 = vld [vmem:[%s10136_s1 + $0x38] ss:$12 sps:$4 sm:$0xff]  }
  0x91   :  { %4589 = vmatprep.subr.bf16.mxu0 %v7232_v27  ;;  %v7322_v27 = vld [vmem:[%s10136_s1 + $0x94c] ss:$12 sps:$4 sm:$0xff]  }
  0x93   :  { %4461 = vmatpush1.bf16.msra.mxu1 %v7227_v28  ;;  %v7323_v28 = vld [vmem:[%s10136_s1 + $0x110] ss:$12 sps:$4 sm:$0xff]  }
  0x94   :  { %4590 = vmatpush1.bf16.msra.mxu0 %v7230_v29  ;;  %4462 = vmatprep.subr.bf16.mxu1 %v7235_v30  ;;  %v7320_v29 = vld [vmem:[%s10136_s1 + $0x948] ss:$12 sps:$4 sm:$0xff]   ;;  %v7324_v30 = vld [vmem:[%s10136_s1 + $0x50] ss:$12 sps:$4 sm:$0xff]  }
  0x95   :  { %4591 = vmatprep.subr.bf16.mxu0 %v7238_v31  ;;  %v7327_v31 = vld [vmem:[%s10136_s1 + $0x964] ss:$12 sps:$4 sm:$0xff]  }
  0x97   :  { %4463 = vmatpush1.bf16.msra.mxu1 %v7233_v32  ;;  %v7328_v32 = vld [vmem:[%s10136_s1 + $0x128] ss:$12 sps:$4 sm:$0xff]  }
  0x98   :  { %4592 = vmatpush1.bf16.msra.mxu0 %v7236_v33  ;;  %4464 = vmatprep.subr.bf16.mxu1 %v7241_v34  ;;  %v7325_v33 = vld [vmem:[%s10136_s1 + $0x960] ss:$12 sps:$4 sm:$0xff]   ;;  %v7329_v34 = vld [vmem:[%s10136_s1 + $0x68] ss:$12 sps:$4 sm:$0xff]  }
  0x99   :  { %4593 = vmatprep.subr.bf16.mxu0 %v7244_v35  ;;  %v7332_v35 = vld [vmem:[%s10136_s1 + $0x97c] ss:$12 sps:$4 sm:$0xff]  }
  0x9b   :  { %4465 = vmatpush1.bf16.msra.mxu1 %v7239_v36  ;;  %v7333_v36 = vld [vmem:[%s10136_s1 + $0x140] ss:$12 sps:$4 sm:$0xff]  }
  0x9c   :  { %4594 = vmatpush1.bf16.msra.mxu0 %v7242_v37  ;;  %4466 = vmatprep.subr.bf16.mxu1 %v7247_v38  ;;  %v7330_v37 = vld [vmem:[%s10136_s1 + $0x978] ss:$12 sps:$4 sm:$0xff]   ;;  %v7334_v38 = vld [vmem:[%s10136_s1 + $0x80] ss:$12 sps:$4 sm:$0xff]  }
  0x9d   :  { %4595 = vmatprep.subr.bf16.mxu0 %v7250_v39  ;;  %v7337_v39 = vld [vmem:[%s10136_s1 + $0x994] ss:$12 sps:$4 sm:$0xff]  }
  0x9f   :  { %4467 = vmatpush1.bf16.msra.mxu1 %v7245_v40  ;;  %v7338_v40 = vld [vmem:[%s10136_s1 + $0x158] ss:$12 sps:$4 sm:$0xff]  }
  0xa0   :  { %4596 = vmatpush1.bf16.msra.mxu0 %v7248_v41  ;;  %4468 = vmatprep.subr.bf16.mxu1 %v7253_v42  ;;  %v7335_v41 = vld [vmem:[%s10136_s1 + $0x990] ss:$12 sps:$4 sm:$0xff]   ;;  %v7339_v42 = vld [vmem:[%s10136_s1 + $0x98] ss:$12 sps:$4 sm:$0xff]  }
  0xa1   :  { %4597 = vmatprep.subr.bf16.mxu0 %v7256_v43  ;;  %v7342_v43 = vld [vmem:[%s10136_s1 + $0x9ac] ss:$12 sps:$4 sm:$0xff]  }
  0xa3   :  { %4469 = vmatpush1.bf16.msra.mxu1 %v7251_v44  ;;  %v7343_v44 = vld [vmem:[%s10136_s1 + $0x170] ss:$12 sps:$4 sm:$0xff]  }
  0xa4   :  { %4598 = vmatpush1.bf16.msra.mxu0 %v7254_v45  ;;  %4470 = vmatprep.subr.bf16.mxu1 %v7259_v46  ;;  %v7340_v45 = vld [vmem:[%s10136_s1 + $0x9a8] ss:$12 sps:$4 sm:$0xff]   ;;  %v7344_v46 = vld [vmem:[%s10136_s1 + $0xb0] ss:$12 sps:$4 sm:$0xff]  }
  0xa5   :  { %4599 = vmatprep.subr.bf16.mxu0 %v7262_v47  ;;  %v7347_v47 = vld [vmem:[%s10136_s1 + $0x9c4] ss:$12 sps:$4 sm:$0xff]  }
  0xa7   :  { %4471 = vmatpush1.bf16.msra.mxu1 %v7257_v48  ;;  %v7348_v48 = vld [vmem:[%s10136_s1 + $0x248] ss:$12 sps:$4 sm:$0xff]  }
  0xa8   :  { %4600 = vmatpush1.bf16.msra.mxu0 %v7260_v49  ;;  %4472 = vmatprep.subr.bf16.mxu1 %v7265_v50  ;;  %v7345_v49 = vld [vmem:[%s10136_s1 + $0x9c0] ss:$12 sps:$4 sm:$0xff]   ;;  %v7349_v50 = vld [vmem:[%s10136_s1 + $0x188] ss:$12 sps:$4 sm:$0xff]  }
  0xa9   :  { %4601 = vmatprep.subr.bf16.mxu0 %v7268_v51  ;;  %v7352_v51 = vld [vmem:[%s10136_s1 + $0x9dc] ss:$12 sps:$4 sm:$0xff]  }
  0xab   :  { %4473 = vmatpush1.bf16.msra.mxu1 %v7263_v52  ;;  %v7353_v52 = vld [vmem:[%s10136_s1 + $0x260] ss:$12 sps:$4 sm:$0xff]  }
  0xac   :  { %4602 = vmatpush1.bf16.msra.mxu0 %v7266_v53  ;;  %4474 = vmatprep.subr.bf16.mxu1 %v7271_v54  ;;  %v7889_v53 = vld [vmem:[%s10137_s0] ss:$104 sps:$4 sm:$0xff]   ;;  %v7350_v54 = vld [vmem:[%s10136_s1 + $0x9d8] ss:$12 sps:$4 sm:$0xff]  }
  0xad   :  { %4603 = vmatprep.subr.bf16.mxu0 %v7274_v55  ;;  %v7354_v55 = vld [vmem:[%s10136_s1 + $0x1a0] ss:$12 sps:$4 sm:$0xff]  }
  0xaf   :  { %4475 = vmatpush1.bf16.msra.mxu1 %v7269_v56  ;;  %v7357_v56 = vld [vmem:[%s10136_s1 + $0x9f4] ss:$12 sps:$4 sm:$0xff]  }
  0xb0   :  { %4604 = vmatpush1.bf16.msra.mxu0 %v7272_v57  ;;  %4476 = vmatprep.subr.bf16.mxu1 %v7277_v58  ;;  %v7358_v57 = vld [vmem:[%s10136_s1 + $0x278] ss:$12 sps:$4 sm:$0xff]   ;;  %v7890_v58 = vld [vmem:[%s10137_s0 + $0xc] ss:$104 sps:$4 sm:$0xff]  }
  0xb1   :  { %4605 = vmatprep.subr.bf16.mxu0 %v7280_v59  ;;  %v7355_v59 = vld [vmem:[%s10136_s1 + $0x9f0] ss:$12 sps:$4 sm:$0xff]  }
  0xb3   :  { %4477 = vmatpush1.bf16.msra.mxu1 %v7275_v60  ;;  %v7359_v60 = vld [vmem:[%s10136_s1 + $0x1b8] ss:$12 sps:$4 sm:$0xff]  }
  0xb4   :  { %4606 = vmatpush1.bf16.msra.mxu0 %v7278_v61  ;;  %4478 = vmatprep.subr.bf16.mxu1 %v7283_v62  ;;  %v7362_v61 = vld [vmem:[%s10136_s1 + $0xa0c] ss:$12 sps:$4 sm:$0xff]   ;;  %v7363_v62 = vld [vmem:[%s10136_s1 + $0x290] ss:$12 sps:$4 sm:$0xff]  }
  0xb5   :  { %4607 = vmatprep.subr.bf16.mxu0 %v7286_v63  ;;  %v7360_v63 = vld [vmem:[%s10136_s1 + $0xa08] ss:$12 sps:$4 sm:$0xff]  }
  0xb7   :  { %4479 = vmatpush1.bf16.msra.mxu1 %v7281_v0  ;;  %v7364_v0 = vld [vmem:[%s10136_s1 + $0x1d0] ss:$12 sps:$4 sm:$0xff]  }
  0xb8   :  { %4608 = vmatpush1.bf16.msra.mxu0 %v7284_v1  ;;  %4480 = vmatprep.subr.bf16.mxu1 %v7289_v2  ;;  %v7367_v1 = vld [vmem:[%s10136_s1 + $0xa24] ss:$12 sps:$4 sm:$0xff]   ;;  %v7368_v2 = vld [vmem:[%s10136_s1 + $0x2a8] ss:$12 sps:$4 sm:$0xff]  }
  0xb9   :  { %4609 = vmatprep.subr.bf16.mxu0 %v7292_v3  ;;  %v7365_v3 = vld [vmem:[%s10136_s1 + $0xa20] ss:$12 sps:$4 sm:$0xff]  }
  0xbb   :  { %4481 = vmatpush1.bf16.msra.mxu1 %v7287_v4  ;;  %v7369_v4 = vld [vmem:[%s10136_s1 + $0x1e8] ss:$12 sps:$4 sm:$0xff]  }
  0xbc   :  { %4610 = vmatpush1.bf16.msra.mxu0 %v7290_v5  ;;  %4482 = vmatprep.subr.bf16.mxu1 %v7295_v6  ;;  %v7372_v5 = vld [vmem:[%s10136_s1 + $0xa3c] ss:$12 sps:$4 sm:$0xff]   ;;  %v7373_v6 = vld [vmem:[%s10136_s1 + $0x2c0] ss:$12 sps:$4 sm:$0xff]  }
  0xbd   :  { %4611 = vmatprep.subr.bf16.mxu0 %v7298_v7  ;;  %v7370_v7 = vld [vmem:[%s10136_s1 + $0xa38] ss:$12 sps:$4 sm:$0xff]  }
  0xbf   :  { %4483 = vmatpush1.bf16.msra.mxu1 %v7293_v8  ;;  %v7374_v8 = vld [vmem:[%s10136_s1 + $0x200] ss:$12 sps:$4 sm:$0xff]  }
  0xc0   :  { %4612 = vmatpush1.bf16.msra.mxu0 %v7296_v9  ;;  %6576 = vmatprep.subr.bf16.mxu1 %v7308_v11  ;;  %v7377_v9 = vld [vmem:[%s10136_s1 + $0xa54] ss:$12 sps:$4 sm:$0xff]   ;;  %v7375_v11 = vld [vmem:[%s10136_s1 + $0xa50] ss:$12 sps:$4 sm:$0xff]  }
  0xc1   :  { %4624 = vmatprep.subr.bf16.mxu0 %v7307_v10  ;;  %v7378_v10 = vld [vmem:[%s10136_s1 + $0x2d8] ss:$12 sps:$4 sm:$0xff]  }
  0xc2   :  { %4485 = vmatmul.mubr.bf16.vlgmr.msra.gmra.mrb[0].mxu1 %v8574_v12 }
  0xc3   :  { %4614 = vmatmul.mubr.bf16.vlgmr.msra.gmra.mrb[0].mxu0 %v7302_v13  ;;  %6577 = vmatpush3.bf16.msra.mxu1 %v7309_v15  ;;  %v7379_v13 = vld [vmem:[%s10136_s1 + $0x218] ss:$12 sps:$4 sm:$0xff]   ;;  %v7383_v15 = vld [vmem:[%s10136_s1 + $0x2f0] ss:$12 sps:$4 sm:$0xff]  }
  0xc4   :  { %4625 = vmatpush1.bf16.msra.mxu0 %v7305_v14  ;;  %6578 = vmatprep.subr.bf16.mxu1 %v7313_v17  ;;  %v7382_v14 = vld [vmem:[%s10136_s1 + $0xa6c] ss:$12 sps:$4 sm:$0xff]   ;;  %v7384_v17 = vld [vmem:[%s10136_s1 + $0x230] ss:$12 sps:$4 sm:$0xff]  }
  0xc5   :  { %4626 = vmatprep.subr.bf16.mxu0 %v7312_v16  ;;  %4957 = vmatprep.mubr.bf16.mxu1 %v7888_v24  ;;  %v7380_v16 = vld [vmem:[%s10136_s1 + $0xa68] ss:$12 sps:$4 sm:$0xff]  }
  0xc6   :  { %4656 = vmatprep.mubr.bf16.mxu0 %v7387_v20  ;;  %v7391_v20 = vld [vmem:[%s10136_s1 + $0x3c8] ss:$12 sps:$4 sm:$0xff]  }
  0xc7   :  { %6579 = vmatpush3.bf16.msra.mxu1 %v7314_v21  ;;  %v7385_v21 = vld [vmem:[%s10137_s0 + $0x30] ss:$104 sps:$4 sm:$0xff]   ;;  %v7395_v24 = vld [vmem:[%s10136_s1 + $0xa9c] ss:$12 sps:$4 sm:$0xff]  }
  0xc8   :  { %4627 = vmatpush1.bf16.msra.mxu0 %v7310_v18  ;;  %6580 = vmatprep.subr.bf16.mxu1 %v7318_v23  ;;  %v7390_v18 = vld [vmem:[%s10136_s1 + $0xa84] ss:$12 sps:$4 sm:$0xff]   ;;  %v7392_v23 = vld [vmem:[%s10136_s1 + $0x308] ss:$12 sps:$4 sm:$0xff]  }
  0xc9   :  { %4628 = vmatprep.subr.bf16.mxu0 %v7317_v22  ;;  %v7388_v22 = vld [vmem:[%s10136_s1 + $0xa80] ss:$12 sps:$4 sm:$0xff]  }
  0xcb   :  { %6581 = vmatpush3.bf16.msra.mxu1 %v7319_v26  ;;  %v7470_v26 = vld [vmem:[%s10137_s0 + $0x3c] ss:$104 sps:$4 sm:$0xff]  }
  0xcc   :  { %4629 = vmatpush1.bf16.msra.mxu0 %v7315_v25  ;;  %6582 = vmatprep.subr.bf16.mxu1 %v7323_v28  ;;  %v7396_v25 = vld [vmem:[%s10136_s1 + $0x3e0] ss:$12 sps:$4 sm:$0xff]   ;;  %v7393_v28 = vld [vmem:[%s10136_s1 + $0xa98] ss:$12 sps:$4 sm:$0xff]  }
  0xcd   :  { %4630 = vmatprep.subr.bf16.mxu0 %v7322_v27  ;;  %v7891_v27 = vld [vmem:[%s10137_s0 + $0x8] ss:$104 sps:$4 sm:$0xff]  }
  0xcf   :  { %6583 = vmatpush3.bf16.msra.mxu1 %v7324_v30  ;;  %v7400_v30 = vld [vmem:[%s10136_s1 + $0xab4] ss:$12 sps:$4 sm:$0xff]  }
  0xd0   :  { %4631 = vmatpush1.bf16.msra.mxu0 %v7320_v29  ;;  %6584 = vmatprep.subr.bf16.mxu1 %v7328_v32  ;;  %v7397_v29 = vld [vmem:[%s10136_s1 + $0x320] ss:$12 sps:$4 sm:$0xff]   ;;  %v7398_v32 = vld [vmem:[%s10136_s1 + $0xab0] ss:$12 sps:$4 sm:$0xff]  }
  0xd1   :  { %4632 = vmatprep.subr.bf16.mxu0 %v7327_v31  ;;  %v7401_v31 = vld [vmem:[%s10136_s1 + $0x3f8] ss:$12 sps:$4 sm:$0xff]  }
  0xd3   :  { %6585 = vmatpush3.bf16.msra.mxu1 %v7329_v34  ;;  %v7405_v34 = vld [vmem:[%s10136_s1 + $0xacc] ss:$12 sps:$4 sm:$0xff]  }
  0xd4   :  { %4633 = vmatpush1.bf16.msra.mxu0 %v7325_v33  ;;  %6586 = vmatprep.subr.bf16.mxu1 %v7333_v36  ;;  %v7402_v33 = vld [vmem:[%s10136_s1 + $0x338] ss:$12 sps:$4 sm:$0xff]   ;;  %v7407_v36 = vld [vmem:[%s10136_s1 + $0x350] ss:$12 sps:$4 sm:$0xff]  }
  0xd5   :  { %4634 = vmatprep.subr.bf16.mxu0 %v7332_v35  ;;  %v7406_v35 = vld [vmem:[%s10136_s1 + $0x410] ss:$12 sps:$4 sm:$0xff]  }
  0xd7   :  { %6587 = vmatpush3.bf16.msra.mxu1 %v7334_v38  ;;  %v7411_v38 = vld [vmem:[%s10136_s1 + $0x428] ss:$12 sps:$4 sm:$0xff]  }
  0xd8   :  { %4635 = vmatpush1.bf16.msra.mxu0 %v7330_v37  ;;  %6588 = vmatprep.subr.bf16.mxu1 %v7338_v40  ;;  %v7410_v37 = vld [vmem:[%s10136_s1 + $0xae4] ss:$12 sps:$4 sm:$0xff]   ;;  %v7412_v40 = vld [vmem:[%s10136_s1 + $0x368] ss:$12 sps:$4 sm:$0xff]  }
  0xd9   :  { %4636 = vmatprep.subr.bf16.mxu0 %v7337_v39  ;;  %v7408_v39 = vld [vmem:[%s10136_s1 + $0xae0] ss:$12 sps:$4 sm:$0xff]  }
  0xdb   :  { %6589 = vmatpush3.bf16.msra.mxu1 %v7339_v42  ;;  %v7416_v42 = vld [vmem:[%s10136_s1 + $0x440] ss:$12 sps:$4 sm:$0xff]  }
  0xdc   :  { %4637 = vmatpush1.bf16.msra.mxu0 %v7335_v41  ;;  %6590 = vmatprep.subr.bf16.mxu1 %v7343_v44  ;;  %v7415_v41 = vld [vmem:[%s10136_s1 + $0xafc] ss:$12 sps:$4 sm:$0xff]   ;;  %v7417_v44 = vld [vmem:[%s10136_s1 + $0x380] ss:$12 sps:$4 sm:$0xff]  }
  0xdd   :  { %4638 = vmatprep.subr.bf16.mxu0 %v7342_v43  ;;  %v7413_v43 = vld [vmem:[%s10136_s1 + $0xaf8] ss:$12 sps:$4 sm:$0xff]  }
  0xdf   :  { %6591 = vmatpush3.bf16.msra.mxu1 %v7344_v46  ;;  %v7421_v46 = vld [vmem:[%s10136_s1 + $0x458] ss:$12 sps:$4 sm:$0xff]  }
  0xe0   :  { %4639 = vmatpush1.bf16.msra.mxu0 %v7340_v45  ;;  %6598 = vmatprep.subr.bf16.mxu1 %v7348_v48  ;;  %v7420_v45 = vld [vmem:[%s10136_s1 + $0xb14] ss:$12 sps:$4 sm:$0xff]   ;;  %v7422_v48 = vld [vmem:[%s10136_s1 + $0x398] ss:$12 sps:$4 sm:$0xff]  }
  0xe1   :  { %4640 = vmatprep.subr.bf16.mxu0 %v7347_v47  ;;  %v7418_v47 = vld [vmem:[%s10136_s1 + $0xb10] ss:$12 sps:$4 sm:$0xff]  }
  0xe2   :  { %4958 = vmatmul.mubr.bf16.vlgmr.msra.gmra.mrb[4].mxu1 %v7889_v53  ;;  %v7430_v53 = vld [vmem:[%s10136_s1 + $0xb44] ss:$12 sps:$4 sm:$0xff]  }
  0xe3   :  { %6599 = vmatpush3.bf16.msra.mxu1 %v7349_v50  ;;  %4998 = vmatprep.mubr.bf16.mxu1 %v7890_v58  ;;  %v7426_v50 = vld [vmem:[%s10136_s1 + $0x470] ss:$12 sps:$4 sm:$0xff]   ;;  %v7436_v58 = vld [vmem:[%s10136_s1 + $0x560] ss:$12 sps:$4 sm:$0xff]  }
  0xe4   :  { %4641 = vmatpush1.bf16.msra.mxu0 %v7345_v49  ;;  %6600 = vmatprep.subr.bf16.mxu1 %v7353_v52  ;;  %v7425_v49 = vld [vmem:[%s10136_s1 + $0xb2c] ss:$12 sps:$4 sm:$0xff]   ;;  %v7427_v52 = vld [vmem:[%s10136_s1 + $0x3b0] ss:$12 sps:$4 sm:$0xff]  }
  0xe5   :  { %4642 = vmatprep.subr.bf16.mxu0 %v7352_v51  ;;  %v7423_v51 = vld [vmem:[%s10136_s1 + $0xb28] ss:$12 sps:$4 sm:$0xff]  }
  0xe7   :  { %6601 = vmatpush3.bf16.msra.mxu1 %v7354_v55  ;;  %v7428_v55 = vld [vmem:[%s10136_s1 + $0xb40] ss:$12 sps:$4 sm:$0xff]  }
  0xe8   :  { %4643 = vmatpush1.bf16.msra.mxu0 %v7350_v54  ;;  %6602 = vmatprep.subr.bf16.mxu1 %v7358_v57  ;;  %v7431_v54 = vld [vmem:[%s10136_s1 + $0x548] ss:$12 sps:$4 sm:$0xff]  }
  0xe9   :  { %4644 = vmatprep.subr.bf16.mxu0 %v7357_v56  ;;  %v7432_v56 = vld [vmem:[%s10136_s1 + $0x488] ss:$12 sps:$4 sm:$0xff]  }
  0xea   :  { %v7435_v57 = vld [vmem:[%s10136_s1 + $0xb5c] ss:$12 sps:$4 sm:$0xff]  }
  0xeb   :  { %6603 = vmatpush3.bf16.msra.mxu1 %v7359_v60  ;;  %v7437_v60 = vld [vmem:[%s10136_s1 + $0x4a0] ss:$12 sps:$4 sm:$0xff]  }
  0xec   :  { %4645 = vmatpush1.bf16.msra.mxu0 %v7355_v59  ;;  %6604 = vmatprep.subr.bf16.mxu1 %v7363_v62  ;;  %v7433_v59 = vld [vmem:[%s10136_s1 + $0xb58] ss:$12 sps:$4 sm:$0xff]  }
  0xed   :  { %4646 = vmatprep.subr.bf16.mxu0 %v7362_v61  ;;  %v7440_v61 = vld [vmem:[%s10136_s1 + $0xb74] ss:$12 sps:$4 sm:$0xff]   ;;  %v7441_v62 = vld [vmem:[%s10136_s1 + $0x578] ss:$12 sps:$4 sm:$0xff]  }
  0xef   :  { %6605 = vmatpush3.bf16.msra.mxu1 %v7364_v0  ;;  %v7442_v0 = vld [vmem:[%s10136_s1 + $0x4b8] ss:$12 sps:$4 sm:$0xff]  }
  0xf0   :  { %4647 = vmatpush1.bf16.msra.mxu0 %v7360_v63  ;;  %6606 = vmatprep.subr.bf16.mxu1 %v7368_v2  ;;  %v7438_v63 = vld [vmem:[%s10136_s1 + $0xb70] ss:$12 sps:$4 sm:$0xff]  }
  0xf1   :  { %4648 = vmatprep.subr.bf16.mxu0 %v7367_v1  ;;  %v7445_v1 = vld [vmem:[%s10136_s1 + $0xb8c] ss:$12 sps:$4 sm:$0xff]   ;;  %v7446_v2 = vld [vmem:[%s10136_s1 + $0x590] ss:$12 sps:$4 sm:$0xff]  }
  0xf3   :  { %6607 = vmatpush3.bf16.msra.mxu1 %v7369_v4  ;;  %v7447_v4 = vld [vmem:[%s10136_s1 + $0x4d0] ss:$12 sps:$4 sm:$0xff]  }
  0xf4   :  { %4649 = vmatpush1.bf16.msra.mxu0 %v7365_v3  ;;  %6608 = vmatprep.subr.bf16.mxu1 %v7373_v6  ;;  %v7443_v3 = vld [vmem:[%s10136_s1 + $0xb88] ss:$12 sps:$4 sm:$0xff]  }
  0xf5   :  { %4650 = vmatprep.subr.bf16.mxu0 %v7372_v5  ;;  %v7450_v5 = vld [vmem:[%s10136_s1 + $0xba4] ss:$12 sps:$4 sm:$0xff]   ;;  %v7451_v6 = vld [vmem:[%s10136_s1 + $0x5a8] ss:$12 sps:$4 sm:$0xff]  }
  0xf7   :  { %6609 = vmatpush3.bf16.msra.mxu1 %v7374_v8  ;;  %v7452_v8 = vld [vmem:[%s10136_s1 + $0x4e8] ss:$12 sps:$4 sm:$0xff]  }
  0xf8   :  { %4651 = vmatpush1.bf16.msra.mxu0 %v7370_v7  ;;  %6610 = vmatprep.subr.bf16.mxu1 %v7378_v10  ;;  %v7448_v7 = vld [vmem:[%s10136_s1 + $0xba0] ss:$12 sps:$4 sm:$0xff]  }
  0xf9   :  { %4652 = vmatprep.subr.bf16.mxu0 %v7377_v9  ;;  %v7455_v9 = vld [vmem:[%s10136_s1 + $0xbbc] ss:$12 sps:$4 sm:$0xff]   ;;  %v7456_v10 = vld [vmem:[%s10136_s1 + $0x5c0] ss:$12 sps:$4 sm:$0xff]  }
  0xfb   :  { %6611 = vmatpush3.bf16.msra.mxu1 %v7379_v13  ;;  %v7457_v13 = vld [vmem:[%s10136_s1 + $0x500] ss:$12 sps:$4 sm:$0xff]  }
  0xfc   :  { %4653 = vmatpush1.bf16.msra.mxu0 %v7375_v11  ;;  %6612 = vmatprep.subr.bf16.mxu1 %v7383_v15  ;;  %v7453_v11 = vld [vmem:[%s10136_s1 + $0xbb8] ss:$12 sps:$4 sm:$0xff]  }
  0xfd   :  { %4654 = vmatprep.subr.bf16.mxu0 %v7382_v14  ;;  %v7460_v14 = vld [vmem:[%s10136_s1 + $0xbd4] ss:$12 sps:$4 sm:$0xff]   ;;  %v7461_v15 = vld [vmem:[%s10136_s1 + $0x5d8] ss:$12 sps:$4 sm:$0xff]  }
  0xff   :  { %6613 = vmatpush3.bf16.msra.mxu1 %v7384_v17  ;;  %v7462_v17 = vld [vmem:[%s10136_s1 + $0x518] ss:$12 sps:$4 sm:$0xff]  }
 0x100   :  { %4655 = vmatpush1.bf16.msra.mxu0 %v7380_v16  ;;  %6620 = vmatprep.subr.bf16.mxu1 %v7391_v20  ;;  %v7458_v16 = vld [vmem:[%s10136_s1 + $0xbd0] ss:$12 sps:$4 sm:$0xff]  }
 0x101   :  { %4667 = vmatprep.subr.bf16.mxu0 %v7390_v18  ;;  %v7465_v18 = vld [vmem:[%s10136_s1 + $0xbec] ss:$12 sps:$4 sm:$0xff]   ;;  %v7466_v20 = vld [vmem:[%s10136_s1 + $0x5f0] ss:$12 sps:$4 sm:$0xff]  }
 0x102   :  { %4999 = vmatmul.mubr.bf16.vlgmr.msra.gmra.mrb[8].mxu1 %v7891_v27  ;;  %v7475_v27 = vld [vmem:[%s10136_s1 + $0x608] ss:$12 sps:$4 sm:$0xff]  }
 0x103   :  { %4657 = vmatmul.mubr.bf16.vlgmr.msra.gmra.mrb[0].mxu0 %v7385_v21  ;;  %6621 = vmatpush3.bf16.msra.mxu1 %v7392_v23  ;;  %v7463_v21 = vld [vmem:[%s10136_s1 + $0xbe8] ss:$12 sps:$4 sm:$0xff]   ;;  %v7473_v23 = vld [vmem:[%s10136_s1 + $0xc04] ss:$12 sps:$4 sm:$0xff]  }
 0x104   :  { %4668 = vmatpush1.bf16.msra.mxu0 %v7388_v22  ;;  %6622 = vmatprep.subr.bf16.mxu1 %v7396_v25  ;;  %v7467_v22 = vld [vmem:[%s10136_s1 + $0x530] ss:$12 sps:$4 sm:$0xff]   ;;  %v7468_v25 = vld [vmem:[%s10137_s0 + $0x38] ss:$104 sps:$4 sm:$0xff]  }
 0x105   :  { %4669 = vmatprep.subr.bf16.mxu0 %v7395_v24  ;;  %5039 = vmatprep.mubr.bf16.mxu1 %v8400_v19  ;;  %v7403_v19 = vld [vmem:[%s10136_s1 + $0xac8] ss:$12 sps:$4 sm:$0xff]  }
 0x106   :  { %4699 = vmatprep.mubr.bf16.mxu0 %v7470_v26  ;;  %v7474_v24 = vld [vmem:[%s10136_s1 + $0x6c8] ss:$12 sps:$4 sm:$0xff]   ;;  %v7471_v26 = vld [vmem:[%s10136_s1 + $0xc00] ss:$12 sps:$4 sm:$0xff]  }
 0x107   :  { %6623 = vmatpush3.bf16.msra.mxu1 %v7397_v29  ;;  %v7479_v29 = vld [vmem:[%s10136_s1 + $0x6e0] ss:$12 sps:$4 sm:$0xff]  }
 0x108   :  { %4670 = vmatpush1.bf16.msra.mxu0 %v7393_v28  ;;  %6624 = vmatprep.subr.bf16.mxu1 %v7401_v31  ;;  %v7478_v28 = vld [vmem:[%s10136_s1 + $0xc1c] ss:$12 sps:$4 sm:$0xff]   ;;  %v7893_v31 = vld [vmem:[%s10137_s0 + $0x18] ss:$104 sps:$4 sm:$0xff]  }
 0x109   :  { %4671 = vmatprep.subr.bf16.mxu0 %v7400_v30  ;;  %v7553_v30 = vld [vmem:[%s10137_s0 + $0x44] ss:$104 sps:$4 sm:$0xff]  }
 0x10b   :  { %6625 = vmatpush3.bf16.msra.mxu1 %v7402_v33  ;;  %v7480_v33 = vld [vmem:[%s10136_s1 + $0x620] ss:$12 sps:$4 sm:$0xff]  }
 0x10c   :  { %4672 = vmatpush1.bf16.msra.mxu0 %v7398_v32  ;;  %6626 = vmatprep.subr.bf16.mxu1 %v7406_v35  ;;  %v7476_v32 = vld [vmem:[%s10136_s1 + $0xc18] ss:$12 sps:$4 sm:$0xff]  }
 0x10d   :  { %4673 = vmatprep.subr.bf16.mxu0 %v7405_v34  ;;  %v7483_v34 = vld [vmem:[%s10136_s1 + $0xc34] ss:$12 sps:$4 sm:$0xff]   ;;  %v7484_v35 = vld [vmem:[%s10136_s1 + $0x6f8] ss:$12 sps:$4 sm:$0xff]  }
 0x10f   :  { %6627 = vmatpush3.bf16.msra.mxu1 %v7407_v36  ;;  %v7894_v36 = vld [vmem:[%s10137_s0 + $0x24] ss:$104 sps:$4 sm:$0xff]  }
 0x110   :  { %4674 = vmatpush1.bf16.msra.mxu0 %v7403_v19  ;;  %6628 = vmatprep.subr.bf16.mxu1 %v7411_v38  ;;  %v7481_v19 = vld [vmem:[%s10136_s1 + $0xc30] ss:$12 sps:$4 sm:$0xff]   ;;  %v7488_v38 = vld [vmem:[%s10136_s1 + $0xc4c] ss:$12 sps:$4 sm:$0xff]  }
 0x111   :  { %4675 = vmatprep.subr.bf16.mxu0 %v7410_v37  ;;  %v7485_v37 = vld [vmem:[%s10136_s1 + $0x638] ss:$12 sps:$4 sm:$0xff]  }
 0x113   :  { %6629 = vmatpush3.bf16.msra.mxu1 %v7412_v40  ;;  %v7486_v40 = vld [vmem:[%s10136_s1 + $0xc48] ss:$12 sps:$4 sm:$0xff]  }
 0x114   :  { %4676 = vmatpush1.bf16.msra.mxu0 %v7408_v39  ;;  %6630 = vmatprep.subr.bf16.mxu1 %v7416_v42  ;;  %v7489_v39 = vld [vmem:[%s10136_s1 + $0x710] ss:$12 sps:$4 sm:$0xff]  }
 0x115   :  { %4677 = vmatprep.subr.bf16.mxu0 %v7415_v41  ;;  %v7490_v41 = vld [vmem:[%s10136_s1 + $0x650] ss:$12 sps:$4 sm:$0xff]  }
 0x116   :  { %v7493_v42 = vld [vmem:[%s10136_s1 + $0xc64] ss:$12 sps:$4 sm:$0xff]  }
 0x117   :  { %6631 = vmatpush3.bf16.msra.mxu1 %v7417_v44  ;;  %v7491_v44 = vld [vmem:[%s10136_s1 + $0xc60] ss:$12 sps:$4 sm:$0xff]  }
 0x118   :  { %4678 = vmatpush1.bf16.msra.mxu0 %v7413_v43  ;;  %6632 = vmatprep.subr.bf16.mxu1 %v7421_v46  ;;  %v7494_v43 = vld [vmem:[%s10136_s1 + $0x728] ss:$12 sps:$4 sm:$0xff]  }
 0x119   :  { %4679 = vmatprep.subr.bf16.mxu0 %v7420_v45  ;;  %v7495_v45 = vld [vmem:[%s10136_s1 + $0x668] ss:$12 sps:$4 sm:$0xff]  }
 0x11a   :  { %v7498_v46 = vld [vmem:[%s10136_s1 + $0xc7c] ss:$12 sps:$4 sm:$0xff]  }
 0x11b   :  { %6633 = vmatpush3.bf16.msra.mxu1 %v7422_v48  ;;  %v7496_v48 = vld [vmem:[%s10136_s1 + $0xc78] ss:$12 sps:$4 sm:$0xff]  }
 0x11c   :  { %4680 = vmatpush1.bf16.msra.mxu0 %v7418_v47  ;;  %6634 = vmatprep.subr.bf16.mxu1 %v7426_v50  ;;  %v7499_v47 = vld [vmem:[%s10136_s1 + $0x740] ss:$12 sps:$4 sm:$0xff]  }
 0x11d   :  { %4681 = vmatprep.subr.bf16.mxu0 %v7425_v49  ;;  %v7500_v49 = vld [vmem:[%s10136_s1 + $0x680] ss:$12 sps:$4 sm:$0xff]  }
 0x11e   :  { %v7503_v50 = vld [vmem:[%s10136_s1 + $0xc94] ss:$12 sps:$4 sm:$0xff]  }
 0x11f   :  { %6635 = vmatpush3.bf16.msra.mxu1 %v7427_v52  ;;  %v7501_v52 = vld [vmem:[%s10136_s1 + $0xc90] ss:$12 sps:$4 sm:$0xff]  }
 0x120   :  { %4682 = vmatpush1.bf16.msra.mxu0 %v7423_v51  ;;  %6642 = vmatprep.subr.bf16.mxu1 %v7431_v54  ;;  %v7504_v51 = vld [vmem:[%s10136_s1 + $0x758] ss:$12 sps:$4 sm:$0xff]  }
 0x121   :  { %4683 = vmatprep.subr.bf16.mxu0 %v7430_v53  ;;  %v7505_v53 = vld [vmem:[%s10136_s1 + $0x698] ss:$12 sps:$4 sm:$0xff]  }
 0x122   :  { %5040 = vmatmul.mubr.bf16.vlgmr.msra.gmra.mrb[12].mxu1 %v8574_v12  ;;  %v7892_v12 = vld [vmem:[%s10137_s0 + $0x1c] ss:$104 sps:$4 sm:$0xff]   ;;  %v7508_v54 = vld [vmem:[%s10136_s1 + $0xcac] ss:$12 sps:$4 sm:$0xff]  }
 0x123   :  { %6643 = vmatpush3.bf16.msra.mxu1 %v7432_v56  ;;  %5080 = vmatprep.mubr.bf16.mxu1 %v7892_v12  ;;  %v7506_v56 = vld [vmem:[%s10136_s1 + $0xca8] ss:$12 sps:$4 sm:$0xff]   ;;  %v7519_v12 = vld [vmem:[%s10136_s1 + $0x860] ss:$12 sps:$4 sm:$0xff]  }
 0x124   :  { %4684 = vmatpush1.bf16.msra.mxu0 %v7428_v55  ;;  %6644 = vmatprep.subr.bf16.mxu1 %v7436_v58  ;;  %v7509_v55 = vld [vmem:[%s10136_s1 + $0x770] ss:$12 sps:$4 sm:$0xff]  }
 0x125   :  { %4685 = vmatprep.subr.bf16.mxu0 %v7435_v57  ;;  %v7510_v57 = vld [vmem:[%s10136_s1 + $0x6b0] ss:$12 sps:$4 sm:$0xff]  }
 0x126   :  { %v7513_v58 = vld [vmem:[%s10136_s1 + $0xcc4] ss:$12 sps:$4 sm:$0xff]  }
 0x127   :  { %6645 = vmatpush3.bf16.msra.mxu1 %v7437_v60  ;;  %v7511_v60 = vld [vmem:[%s10136_s1 + $0xcc0] ss:$12 sps:$4 sm:$0xff]  }
 0x128   :  { %4686 = vmatpush1.bf16.msra.mxu0 %v7433_v59  ;;  %6646 = vmatprep.subr.bf16.mxu1 %v7441_v62  ;;  %v7514_v59 = vld [vmem:[%s10136_s1 + $0x848] ss:$12 sps:$4 sm:$0xff]  }
 0x129   :  { %4687 = vmatprep.subr.bf16.mxu0 %v7440_v61  ;;  %v7515_v61 = vld [vmem:[%s10136_s1 + $0x788] ss:$12 sps:$4 sm:$0xff]  }
 0x12a   :  { %v7518_v62 = vld [vmem:[%s10136_s1 + $0xcdc] ss:$12 sps:$4 sm:$0xff]  }
 0x12b   :  { %6647 = vmatpush3.bf16.msra.mxu1 %v7442_v0  ;;  %v7895_v0 = vld [vmem:[%s10137_s0 + $0x20] ss:$104 sps:$4 sm:$0xff]  }
 0x12c   :  { %4688 = vmatpush1.bf16.msra.mxu0 %v7438_v63  ;;  %6648 = vmatprep.subr.bf16.mxu1 %v7446_v2  ;;  %v7516_v63 = vld [vmem:[%s10136_s1 + $0xcd8] ss:$12 sps:$4 sm:$0xff]   ;;  %v7523_v2 = vld [vmem:[%s10136_s1 + $0xcf4] ss:$12 sps:$4 sm:$0xff]  }
 0x12d   :  { %4689 = vmatprep.subr.bf16.mxu0 %v7445_v1  ;;  %v7520_v1 = vld [vmem:[%s10136_s1 + $0x7a0] ss:$12 sps:$4 sm:$0xff]  }
 0x12f   :  { %6649 = vmatpush3.bf16.msra.mxu1 %v7447_v4  ;;  %v7896_v4 = vld [vmem:[%s10137_s0 + $0x2c] ss:$104 sps:$4 sm:$0xff]  }
 0x130   :  { %4690 = vmatpush1.bf16.msra.mxu0 %v7443_v3  ;;  %6650 = vmatprep.subr.bf16.mxu1 %v7451_v6  ;;  %v7524_v3 = vld [vmem:[%s10136_s1 + $0x878] ss:$12 sps:$4 sm:$0xff]  }
 0x131   :  { %4691 = vmatprep.subr.bf16.mxu0 %v7450_v5  ;;  %v7521_v5 = vld [vmem:[%s10136_s1 + $0xcf0] ss:$12 sps:$4 sm:$0xff]   ;;  %v7525_v6 = vld [vmem:[%s10136_s1 + $0x7b8] ss:$12 sps:$4 sm:$0xff]  }
 0x133   :  { %6651 = vmatpush3.bf16.msra.mxu1 %v7452_v8  ;;  %v7529_v8 = vld [vmem:[%s10136_s1 + $0x890] ss:$12 sps:$4 sm:$0xff]  }
 0x134   :  { %4692 = vmatpush1.bf16.msra.mxu0 %v7448_v7  ;;  %6652 = vmatprep.subr.bf16.mxu1 %v7456_v10  ;;  %v7528_v7 = vld [vmem:[%s10136_s1 + $0xd0c] ss:$12 sps:$4 sm:$0xff]   ;;  %v7530_v10 = vld [vmem:[%s10136_s1 + $0x7d0] ss:$12 sps:$4 sm:$0xff]  }
 0x135   :  { %4693 = vmatprep.subr.bf16.mxu0 %v7455_v9  ;;  %v7526_v9 = vld [vmem:[%s10136_s1 + $0xd08] ss:$12 sps:$4 sm:$0xff]  }
 0x137   :  { %6653 = vmatpush3.bf16.msra.mxu1 %v7457_v13  ;;  %v7534_v13 = vld [vmem:[%s10136_s1 + $0x8a8] ss:$12 sps:$4 sm:$0xff]  }
 0x138   :  { %4694 = vmatpush1.bf16.msra.mxu0 %v7453_v11  ;;  %6654 = vmatprep.subr.bf16.mxu1 %v7461_v15  ;;  %v7533_v11 = vld [vmem:[%s10136_s1 + $0xd24] ss:$12 sps:$4 sm:$0xff]   ;;  %v7535_v15 = vld [vmem:[%s10136_s1 + $0x7e8] ss:$12 sps:$4 sm:$0xff]  }
 0x139   :  { %4695 = vmatprep.subr.bf16.mxu0 %v7460_v14  ;;  %v7531_v14 = vld [vmem:[%s10136_s1 + $0xd20] ss:$12 sps:$4 sm:$0xff]  }
 0x13b   :  { %6655 = vmatpush3.bf16.msra.mxu1 %v7462_v17  ;;  %v7539_v17 = vld [vmem:[%s10136_s1 + $0x8c0] ss:$12 sps:$4 sm:$0xff]  }
 0x13c   :  { %4696 = vmatpush1.bf16.msra.mxu0 %v7458_v16  ;;  %6656 = vmatprep.subr.bf16.mxu1 %v7466_v20  ;;  %v7538_v16 = vld [vmem:[%s10136_s1 + $0xd3c] ss:$12 sps:$4 sm:$0xff]   ;;  %v7540_v20 = vld [vmem:[%s10136_s1 + $0x800] ss:$12 sps:$4 sm:$0xff]  }
 0x13d   :  { %4697 = vmatprep.subr.bf16.mxu0 %v7465_v18  ;;  %v7536_v18 = vld [vmem:[%s10136_s1 + $0xd38] ss:$12 sps:$4 sm:$0xff]  }
 0x13f   :  { %6657 = vmatpush3.bf16.msra.mxu1 %v7467_v22  ;;  %v7544_v22 = vld [vmem:[%s10136_s1 + $0x8d8] ss:$12 sps:$4 sm:$0xff]  }
 0x140   :  { %4698 = vmatpush1.bf16.msra.mxu0 %v7463_v21  ;;  %6664 = vmatprep.subr.bf16.mxu1 %v7474_v24  ;;  %v7543_v21 = vld [vmem:[%s10136_s1 + $0xd54] ss:$12 sps:$4 sm:$0xff]   ;;  %v7545_v24 = vld [vmem:[%s10136_s1 + $0x818] ss:$12 sps:$4 sm:$0xff]  }
 0x141   :  { %4710 = vmatprep.subr.bf16.mxu0 %v7473_v23  ;;  %v7541_v23 = vld [vmem:[%s10136_s1 + $0xd50] ss:$12 sps:$4 sm:$0xff]  }
 0x142   :  { %5081 = vmatmul.mubr.bf16.vlgmr.msra.gmra.mrb[16].mxu1 %v7893_v31  ;;  %v9203_v31 = vld [vmem:[%s10137_s0 + $0x40] ss:$104 sps:$4 sm:$0xff]  }
 0x143   :  { %4700 = vmatmul.mubr.bf16.vlgmr.msra.gmra.mrb[0].mxu0 %v7468_v25  ;;  %6665 = vmatpush3.bf16.msra.mxu1 %v7475_v27  ;;  %v7548_v25 = vld [vmem:[%s10136_s1 + $0xd6c] ss:$12 sps:$4 sm:$0xff]   ;;  %v7546_v27 = vld [vmem:[%s10136_s1 + $0xd68] ss:$12 sps:$4 sm:$0xff]  }
 0x144   :  { %4711 = vmatpush1.bf16.msra.mxu0 %v7471_v26  ;;  %6666 = vmatprep.subr.bf16.mxu1 %v7479_v29  ;;  %v7549_v26 = vld [vmem:[%s10136_s1 + $0x8f0] ss:$12 sps:$4 sm:$0xff]  }
 0x145   :  { %4712 = vmatprep.subr.bf16.mxu0 %v7478_v28  ;;  %5121 = vmatprep.mubr.bf16.mxu1 %v7894_v36  ;;  %v7550_v28 = vld [vmem:[%s10136_s1 + $0x830] ss:$12 sps:$4 sm:$0xff]  }
 0x146   :  { %4742 = vmatprep.mubr.bf16.mxu0 %v7553_v30  ;;  %v7556_v29 = vld [vmem:[%s10136_s1 + $0xd84] ss:$12 sps:$4 sm:$0xff]   ;;  %v7557_v30 = vld [vmem:[%s10136_s1 + $0x9c8] ss:$12 sps:$4 sm:$0xff]  }
 0x147   :  { %6667 = vmatpush3.bf16.msra.mxu1 %v7480_v33  ;;  %v7558_v33 = vld [vmem:[%s10136_s1 + $0x908] ss:$12 sps:$4 sm:$0xff]  }
 0x148   :  { %4713 = vmatpush1.bf16.msra.mxu0 %v7476_v32  ;;  %6668 = vmatprep.subr.bf16.mxu1 %v7484_v35  ;;  %v7554_v32 = vld [vmem:[%s10136_s1 + $0xd80] ss:$12 sps:$4 sm:$0xff]   ;;  %v7897_v36 = vld [vmem:[%s10137_s0 + $0x28] ss:$104 sps:$4 sm:$0xff]  }
 0x149   :  { %4714 = vmatprep.subr.bf16.mxu0 %v7483_v34  ;;  %v7561_v34 = vld [vmem:[%s10136_s1 + $0xd9c] ss:$12 sps:$4 sm:$0xff]   ;;  %v7562_v35 = vld [vmem:[%s10136_s1 + $0x9e0] ss:$12 sps:$4 sm:$0xff]  }
 0x14b   :  { %6669 = vmatpush3.bf16.msra.mxu1 %v7485_v37  ;;  %v7559_v37 = vld [vmem:[%s10136_s1 + $0xd98] ss:$12 sps:$4 sm:$0xff]  }
 0x14c   :  { %4715 = vmatpush1.bf16.msra.mxu0 %v7481_v19  ;;  %6670 = vmatprep.subr.bf16.mxu1 %v7489_v39  ;;  %v9220_v19 = vld [vmem:[%s10137_s0 + $0x4c] ss:$104 sps:$4 sm:$0xff]  }
 0x14d   :  { %4716 = vmatprep.subr.bf16.mxu0 %v7488_v38  ;;  %v7563_v38 = vld [vmem:[%s10136_s1 + $0x920] ss:$12 sps:$4 sm:$0xff]  }
 0x14e   :  { %v7566_v39 = vld [vmem:[%s10136_s1 + $0xdb4] ss:$12 sps:$4 sm:$0xff]  }
 0x14f   :  { %6671 = vmatpush3.bf16.msra.mxu1 %v7490_v41  ;;  %v7898_v41 = vld [vmem:[%s10137_s0 + $0x34] ss:$104 sps:$4 sm:$0xff]  }
 0x150   :  { %4717 = vmatpush1.bf16.msra.mxu0 %v7486_v40  ;;  %6672 = vmatprep.subr.bf16.mxu1 %v7494_v43  ;;  %v7567_v40 = vld [vmem:[%s10136_s1 + $0x9f8] ss:$12 sps:$4 sm:$0xff]  }
 0x151   :  { %4718 = vmatprep.subr.bf16.mxu0 %v7493_v42  ;;  %v7564_v42 = vld [vmem:[%s10136_s1 + $0xdb0] ss:$12 sps:$4 sm:$0xff]   ;;  %v7568_v43 = vld [vmem:[%s10136_s1 + $0x938] ss:$12 sps:$4 sm:$0xff]  }
 0x153   :  { %6673 = vmatpush3.bf16.msra.mxu1 %v7495_v45  ;;  %v7572_v45 = vld [vmem:[%s10136_s1 + $0xa10] ss:$12 sps:$4 sm:$0xff]  }
 0x154   :  { %4719 = vmatpush1.bf16.msra.mxu0 %v7491_v44  ;;  %6674 = vmatprep.subr.bf16.mxu1 %v7499_v47  ;;  %v7571_v44 = vld [vmem:[%s10136_s1 + $0xdcc] ss:$12 sps:$4 sm:$0xff]   ;;  %v7573_v47 = vld [vmem:[%s10136_s1 + $0x950] ss:$12 sps:$4 sm:$0xff]  }
 0x155   :  { %4720 = vmatprep.subr.bf16.mxu0 %v7498_v46  ;;  %v7569_v46 = vld [vmem:[%s10136_s1 + $0xdc8] ss:$12 sps:$4 sm:$0xff]  }
 0x157   :  { %6675 = vmatpush3.bf16.msra.mxu1 %v7500_v49  ;;  %v7577_v49 = vld [vmem:[%s10136_s1 + $0xa28] ss:$12 sps:$4 sm:$0xff]  }
 0x158   :  { %4721 = vmatpush1.bf16.msra.mxu0 %v7496_v48  ;;  %6676 = vmatprep.subr.bf16.mxu1 %v7504_v51  ;;  %v7576_v48 = vld [vmem:[%s10136_s1 + $0xde4] ss:$12 sps:$4 sm:$0xff]   ;;  %v7578_v51 = vld [vmem:[%s10136_s1 + $0x968] ss:$12 sps:$4 sm:$0xff]  }
 0x159   :  { %4722 = vmatprep.subr.bf16.mxu0 %v7503_v50  ;;  %v7574_v50 = vld [vmem:[%s10136_s1 + $0xde0] ss:$12 sps:$4 sm:$0xff]  }
 0x15b   :  { %6677 = vmatpush3.bf16.msra.mxu1 %v7505_v53  ;;  %v7582_v53 = vld [vmem:[%s10136_s1 + $0xa40] ss:$12 sps:$4 sm:$0xff]  }
 0x15c   :  { %4723 = vmatpush1.bf16.msra.mxu0 %v7501_v52  ;;  %6678 = vmatprep.subr.bf16.mxu1 %v7509_v55  ;;  %v7581_v52 = vld [vmem:[%s10136_s1 + $0xdfc] ss:$12 sps:$4 sm:$0xff]   ;;  %v7583_v55 = vld [vmem:[%s10136_s1 + $0x980] ss:$12 sps:$4 sm:$0xff]  }
 0x15d   :  { %4724 = vmatprep.subr.bf16.mxu0 %v7508_v54  ;;  %v7579_v54 = vld [vmem:[%s10136_s1 + $0xdf8] ss:$12 sps:$4 sm:$0xff]  }
 0x15f   :  { %6679 = vmatpush3.bf16.msra.mxu1 %v7510_v57  ;;  %v7587_v57 = vld [vmem:[%s10136_s1 + $0xa58] ss:$12 sps:$4 sm:$0xff]  }
 0x160   :  { %4725 = vmatpush1.bf16.msra.mxu0 %v7506_v56  ;;  %6686 = vmatprep.subr.bf16.mxu1 %v7514_v59  ;;  %v7586_v56 = vld [vmem:[%s10136_s1 + $0xe14] ss:$12 sps:$4 sm:$0xff]   ;;  %v7584_v59 = vld [vmem:[%s10136_s1 + $0xe10] ss:$12 sps:$4 sm:$0xff]  }
 0x161   :  { %4726 = vmatprep.subr.bf16.mxu0 %v7513_v58 }
 0x162   :  { %5122 = vmatmul.mubr.bf16.vlgmr.msra.gmra.mrb[20].mxu1 %v7895_v0  ;;  %v7592_v0 = vld [vmem:[%s10136_s1 + $0xa70] ss:$12 sps:$4 sm:$0xff]  }
 0x163   :  { %6687 = vmatpush3.bf16.msra.mxu1 %v7515_v61  ;;  %5162 = vmatprep.mubr.bf16.mxu1 %v7896_v4  ;;  %v7588_v61 = vld [vmem:[%s10136_s1 + $0x998] ss:$12 sps:$4 sm:$0xff]   ;;  %v7597_v4 = vld [vmem:[%s10136_s1 + $0xb48] ss:$12 sps:$4 sm:$0xff]  }
 0x164   :  { %4727 = vmatpush1.bf16.msra.mxu0 %v7511_v60  ;;  %6688 = vmatprep.subr.bf16.mxu1 %v7519_v12 }
 0x165   :  { %4728 = vmatprep.subr.bf16.mxu0 %v7518_v62 }
 0x167   :  { %6689 = vmatpush3.bf16.msra.mxu1 %v7520_v1  ;;  %v7589_v1 = vld [vmem:[%s10136_s1 + $0xe28] ss:$12 sps:$4 sm:$0xff]  }
 0x168   :  { %4729 = vmatpush1.bf16.msra.mxu0 %v7516_v63  ;;  %6690 = vmatprep.subr.bf16.mxu1 %v7524_v3  ;;  %v7591_v63 = vld [vmem:[%s10136_s1 + $0xe2c] ss:$12 sps:$4 sm:$0xff]   ;;  %v7596_v3 = vld [vmem:[%s10136_s1 + $0xe44] ss:$12 sps:$4 sm:$0xff]  }
 0x169   :  { %4730 = vmatprep.subr.bf16.mxu0 %v7523_v2  ;;  %v7593_v2 = vld [vmem:[%s10136_s1 + $0x9b0] ss:$12 sps:$4 sm:$0xff]  }
 0x16b   :  { %6691 = vmatpush3.bf16.msra.mxu1 %v7525_v6  ;;  %v7598_v6 = vld [vmem:[%s10136_s1 + $0xa88] ss:$12 sps:$4 sm:$0xff]  }
 0x16c   :  { %4731 = vmatpush1.bf16.msra.mxu0 %v7521_v5  ;;  %6692 = vmatprep.subr.bf16.mxu1 %v7529_v8  ;;  %v7594_v5 = vld [vmem:[%s10136_s1 + $0xe40] ss:$12 sps:$4 sm:$0xff]  }
 0x16d   :  { %4732 = vmatprep.subr.bf16.mxu0 %v7528_v7  ;;  %v7601_v7 = vld [vmem:[%s10136_s1 + $0xe5c] ss:$12 sps:$4 sm:$0xff]   ;;  %v7602_v8 = vld [vmem:[%s10136_s1 + $0xb60] ss:$12 sps:$4 sm:$0xff]  }
 0x16f   :  { %6693 = vmatpush3.bf16.msra.mxu1 %v7530_v10  ;;  %v7599_v10 = vld [vmem:[%s10136_s1 + $0xe58] ss:$12 sps:$4 sm:$0xff]  }
 0x170   :  { %4733 = vmatpush1.bf16.msra.mxu0 %v7526_v9  ;;  %6694 = vmatprep.subr.bf16.mxu1 %v7534_v13  ;;  %v7899_v9 = vld [vmem:[%s10137_s0 + $0x30] ss:$104 sps:$4 sm:$0xff]   ;;  %v7606_v13 = vld [vmem:[%s10136_s1 + $0xe74] ss:$12 sps:$4 sm:$0xff]  }
 0x171   :  { %4734 = vmatprep.subr.bf16.mxu0 %v7533_v11  ;;  %v7603_v11 = vld [vmem:[%s10136_s1 + $0xaa0] ss:$12 sps:$4 sm:$0xff]  }
 0x173   :  { %6695 = vmatpush3.bf16.msra.mxu1 %v7535_v15  ;;  %v7604_v15 = vld [vmem:[%s10136_s1 + $0xe70] ss:$12 sps:$4 sm:$0xff]  }
 0x174   :  { %4735 = vmatpush1.bf16.msra.mxu0 %v7531_v14  ;;  %6696 = vmatprep.subr.bf16.mxu1 %v7539_v17  ;;  %v7607_v14 = vld [vmem:[%s10136_s1 + $0xb78] ss:$12 sps:$4 sm:$0xff]  }
 0x175   :  { %4736 = vmatprep.subr.bf16.mxu0 %v7538_v16  ;;  %v7900_v16 = vld [vmem:[%s10137_s0 + $0x3c] ss:$104 sps:$4 sm:$0xff]  }
 0x176   :  { %v7608_v17 = vld [vmem:[%s10136_s1 + $0xab8] ss:$12 sps:$4 sm:$0xff]  }
 0x177   :  { %6697 = vmatpush3.bf16.msra.mxu1 %v7540_v20  ;;  %v7612_v20 = vld [vmem:[%s10136_s1 + $0xb90] ss:$12 sps:$4 sm:$0xff]  }
 0x178   :  { %4737 = vmatpush1.bf16.msra.mxu0 %v7536_v18  ;;  %6698 = vmatprep.subr.bf16.mxu1 %v7544_v22  ;;  %v7611_v18 = vld [vmem:[%s10136_s1 + $0xe8c] ss:$12 sps:$4 sm:$0xff]   ;;  %v7613_v22 = vld [vmem:[%s10136_s1 + $0xad0] ss:$12 sps:$4 sm:$0xff]  }
 0x179   :  { %4738 = vmatprep.subr.bf16.mxu0 %v7543_v21  ;;  %v7609_v21 = vld [vmem:[%s10136_s1 + $0xe88] ss:$12 sps:$4 sm:$0xff]  }
 0x17b   :  { %6699 = vmatpush3.bf16.msra.mxu1 %v7545_v24  ;;  %v7617_v24 = vld [vmem:[%s10136_s1 + $0xba8] ss:$12 sps:$4 sm:$0xff]  }
 0x17c   :  { %4739 = vmatpush1.bf16.msra.mxu0 %v7541_v23  ;;  %6700 = vmatprep.subr.bf16.mxu1 %v7549_v26  ;;  %v7616_v23 = vld [vmem:[%s10136_s1 + $0xea4] ss:$12 sps:$4 sm:$0xff]   ;;  %v7618_v26 = vld [vmem:[%s10136_s1 + $0xae8] ss:$12 sps:$4 sm:$0xff]  }
 0x17d   :  { %4740 = vmatprep.subr.bf16.mxu0 %v7548_v25  ;;  %v7614_v25 = vld [vmem:[%s10136_s1 + $0xea0] ss:$12 sps:$4 sm:$0xff]  }
 0x17f   :  { %6701 = vmatpush3.bf16.msra.mxu1 %v7550_v28  ;;  %v7622_v28 = vld [vmem:[%s10136_s1 + $0xbc0] ss:$12 sps:$4 sm:$0xff]  }
 0x180   :  { %4741 = vmatpush1.bf16.msra.mxu0 %v7546_v27  ;;  %6708 = vmatprep.subr.bf16.mxu1 %v7557_v30  ;;  %v7621_v27 = vld [vmem:[%s10136_s1 + $0xebc] ss:$12 sps:$4 sm:$0xff]   ;;  %v7623_v30 = vld [vmem:[%s10136_s1 + $0xb00] ss:$12 sps:$4 sm:$0xff]  }
 0x181   :  { %4753 = vmatprep.subr.bf16.mxu0 %v7556_v29  ;;  %v7619_v29 = vld [vmem:[%s10136_s1 + $0xeb8] ss:$12 sps:$4 sm:$0xff]  }
 0x182   :  { %5163 = vmatmul.mubr.bf16.vlgmr.msra.gmra.mrb[24].mxu1 %v7897_v36 }
 0x183   :  { %4743 = vmatmul.mubr.bf16.vlgmr.msra.gmra.mrb[0].mxu0 %v9203_v31  ;;  %6709 = vmatpush3.bf16.msra.mxu1 %v7558_v33  ;;  %v7627_v33 = vld [vmem:[%s10136_s1 + $0xbd8] ss:$12 sps:$4 sm:$0xff]  }
 0x184   :  { %4754 = vmatpush1.bf16.msra.mxu0 %v7554_v32  ;;  %6710 = vmatprep.subr.bf16.mxu1 %v7562_v35  ;;  %v7626_v32 = vld [vmem:[%s10136_s1 + $0xed4] ss:$12 sps:$4 sm:$0xff]  }
 0x185   :  { %4755 = vmatprep.subr.bf16.mxu0 %v7561_v34  ;;  %5203 = vmatprep.mubr.bf16.mxu1 %v7898_v41  ;;  %v7624_v34 = vld [vmem:[%s10136_s1 + $0xed0] ss:$12 sps:$4 sm:$0xff]  }
 0x186   :  { %4785 = vmatprep.mubr.bf16.mxu0 %v9220_v19  ;;  %v7632_v41 = vld [vmem:[%s10136_s1 + $0xbf0] ss:$12 sps:$4 sm:$0xff]  }
 0x187   :  { %6711 = vmatpush3.bf16.msra.mxu1 %v7563_v38  ;;  %v7631_v38 = vld [vmem:[%s10136_s1 + $0xeec] ss:$12 sps:$4 sm:$0xff]  }
 0x188   :  { %4756 = vmatpush1.bf16.msra.mxu0 %v7559_v37  ;;  %6712 = vmatprep.subr.bf16.mxu1 %v7567_v40  ;;  %v7628_v37 = vld [vmem:[%s10136_s1 + $0xb18] ss:$12 sps:$4 sm:$0xff]  }
 0x189   :  { %4757 = vmatprep.subr.bf16.mxu0 %v7566_v39 }
 0x18b   :  { %6713 = vmatpush3.bf16.msra.mxu1 %v7568_v43 }
 0x18c   :  { %4758 = vmatpush1.bf16.msra.mxu0 %v7564_v42  ;;  %6714 = vmatprep.subr.bf16.mxu1 %v7572_v45  ;;  %v7633_v45 = vld [vmem:[%s10136_s1 + $0xb30] ss:$12 sps:$4 sm:$0xff]  }
 0x18d   :  { %4759 = vmatprep.subr.bf16.mxu0 %v7571_v44  ;;  %v7629_v44 = vld [vmem:[%s10136_s1 + $0xee8] ss:$12 sps:$4 sm:$0xff]  }
 0x18f   :  { %6715 = vmatpush3.bf16.msra.mxu1 %v7573_v47  ;;  %v7640_v47 = vld [vmem:[%s10136_s1 + $0xcc8] ss:$12 sps:$4 sm:$0xff]  }
 0x190   :  { %4760 = vmatpush1.bf16.msra.mxu0 %v7569_v46  ;;  %6716 = vmatprep.subr.bf16.mxu1 %v7577_v49  ;;  %v7639_v46 = vld [vmem:[%s10136_s1 + $0xf04] ss:$12 sps:$4 sm:$0xff]   ;;  %v7637_v49 = vld [vmem:[%s10136_s1 + $0xf00] ss:$12 sps:$4 sm:$0xff]  }
 0x191   :  { %4761 = vmatprep.subr.bf16.mxu0 %v7576_v48  ;;  %v9431_v48 = vld [vmem:[%s10137_s0 + $0x48] ss:$104 sps:$4 sm:$0xff]  }
 0x193   :  { %6717 = vmatpush3.bf16.msra.mxu1 %v7578_v51  ;;  %v7644_v51 = vld [vmem:[%s10136_s1 + $0xf1c] ss:$12 sps:$4 sm:$0xff]  }
 0x194   :  { %4762 = vmatpush1.bf16.msra.mxu0 %v7574_v50  ;;  %6718 = vmatprep.subr.bf16.mxu1 %v7582_v53  ;;  %v7641_v50 = vld [vmem:[%s10136_s1 + $0xc08] ss:$12 sps:$4 sm:$0xff]   ;;  %v7642_v53 = vld [vmem:[%s10136_s1 + $0xf18] ss:$12 sps:$4 sm:$0xff]  }
 0x195   :  { %4763 = vmatprep.subr.bf16.mxu0 %v7581_v52  ;;  %v9290_v58 = vpop.f32.mrb[0].mxu1  ;;  %v7645_v52 = vld [vmem:[%s10136_s1 + $0xce0] ss:$12 sps:$4 sm:$0xff]  }
 0x196   :  { %v9295_v60 = vpop.f32.mrb[1].mxu1 }
 0x197   :  { %v9300_v62 = vpop.f32.mrb[2].mxu1  ;;  %6719 = vmatpush3.bf16.msra.mxu1 %v7583_v55  ;;  %v7901_v55 = vld [vmem:[%s10137_s0 + $0x38] ss:$104 sps:$4 sm:$0xff]  }
 0x198   :  { %4764 = vmatpush1.bf16.msra.mxu0 %v7579_v54  ;;  %v9302_v12 = vpop.f32.mrb[3].mxu1  ;;  %6720 = vmatprep.subr.bf16.mxu1 %v7587_v57  ;;  %v9451_v54 = vld [vmem:[%s10137_s0 + $0x54] ss:$104 sps:$4 sm:$0xff]  }
 0x199   :  { %4765 = vmatprep.subr.bf16.mxu0 %v7586_v56  ;;  %v7646_v56 = vld [vmem:[%s10136_s1 + $0xc20] ss:$12 sps:$4 sm:$0xff]  }
 0x19a   :  { %v7649_v57 = vld [vmem:[%s10136_s1 + $0xf34] ss:$12 sps:$4 sm:$0xff]  }
 0x19b   :  { %6721 = vmatpush3.bf16.msra.mxu1 %v7588_v61  ;;  %v7902_v61 = vld [vmem:[%s10137_s0 + $0x44] ss:$104 sps:$4 sm:$0xff]  }
 0x19c   :  { %4766 = vmatpush1.bf16.msra.mxu0 %v7584_v59  ;;  %6722 = vmatprep.subr.bf16.mxu1 %v7592_v0  ;;  %v7650_v59 = vld [vmem:[%s10136_s1 + $0xcf8] ss:$12 sps:$4 sm:$0xff]   ;;  %v893_v0 = vlaneseq }
 0x19d   :  { %4767 = vmatprep.subr.bf16.mxu0 %v7591_v63  ;;  %v7647_v63 = vld [vmem:[%s10136_s1 + $0xf30] ss:$12 sps:$4 sm:$0xff]  }
 0x19f   :  { %6723 = vmatpush3.bf16.msra.mxu1 %v7593_v2  ;;  %v7654_v2 = vld [vmem:[%s10136_s1 + $0xf4c] ss:$12 sps:$4 sm:$0xff]  }
 0x1a0   :  { %4768 = vmatpush1.bf16.msra.mxu0 %v7589_v1  ;;  %6730 = vmatprep.subr.bf16.mxu1 %v7597_v4  ;;  %v7651_v1 = vld [vmem:[%s10136_s1 + $0xc38] ss:$12 sps:$4 sm:$0xff]   ;;  %v7652_v4 = vld [vmem:[%s10136_s1 + $0xf48] ss:$12 sps:$4 sm:$0xff]  }
 0x1a1   :  { %4769 = vmatprep.subr.bf16.mxu0 %v7596_v3  ;;  %v7655_v3 = vld [vmem:[%s10136_s1 + $0xd10] ss:$12 sps:$4 sm:$0xff]  }
 0x1a2   :  { %5204 = vmatmul.mubr.bf16.vlgmr.msra.gmra.mrb[28].mxu1 %v7899_v9 }
 0x1a3   :  { %6731 = vmatpush3.bf16.msra.mxu1 %v7598_v6  ;;  %5244 = vmatprep.mubr.bf16.mxu1 %v7900_v16  ;;  %v7656_v6 = vld [vmem:[%s10136_s1 + $0xc50] ss:$12 sps:$4 sm:$0xff]  }
 0x1a4   :  { %4770 = vmatpush1.bf16.msra.mxu0 %v7594_v5  ;;  %6732 = vmatprep.subr.bf16.mxu1 %v7602_v8  ;;  %v9485_v5 = vshrl.u32 %v893_v0, 7  ;;  %v7660_v8 = vld [vmem:[%s10136_s1 + $0xd28] ss:$12 sps:$4 sm:$0xff]   ;;  %v7702_v0 = vld [vmem:[%s10136_s1 + $0x1038] ss:$12 sps:$4 sm:$0xff]  }
 0x1a5   :  { %4771 = vmatprep.subr.bf16.mxu0 %v7601_v7  ;;  %v7659_v7 = vld [vmem:[%s10136_s1 + $0xf64] ss:$12 sps:$4 sm:$0xff]  }
 0x1a6   :  { %v903_v9 = vsub.s32 2, %v9485_v5 }
 0x1a7   :  { %6733 = vmatpush3.bf16.msra.mxu1 %v7603_v11  ;;  %v7657_v11 = vld [vmem:[%s10136_s1 + $0xf60] ss:$12 sps:$4 sm:$0xff]  }
 0x1a8   :  { %4772 = vmatpush1.bf16.msra.mxu0 %v7599_v10  ;;  %6734 = vmatprep.subr.bf16.mxu1 %v7607_v14  ;;  %v891_v10 = vld [vmem:[%s10138_s2] sm:$0x7]  ;;  %v7664_v14 = vld [vmem:[%s10136_s1 + $0xf7c] ss:$12 sps:$4 sm:$0xff]  }
 0x1a9   :  { %4773 = vmatprep.subr.bf16.mxu0 %v7606_v13  ;;  %v7661_v13 = vld [vmem:[%s10136_s1 + $0xc68] ss:$12 sps:$4 sm:$0xff]   ;;  %v904_v16 = vrot.slane %v891_v10, %v903_v9  ;;  %v7707_v9 = vld [vmem:[%s10136_s1 + $0x1050] ss:$12 sps:$4 sm:$0xff]   ;;  %v7711_v10 = vld [vmem:[%s10136_s1 + $0xe18] ss:$12 sps:$4 sm:$0xff]  }
 0x1ab   :  { %6735 = vmatpush3.bf16.msra.mxu1 %v7608_v17  ;;  %v7662_v17 = vld [vmem:[%s10136_s1 + $0xf78] ss:$12 sps:$4 sm:$0xff]  }
 0x1ac   :  { %4774 = vmatpush1.bf16.msra.mxu0 %v7604_v15  ;;  %6736 = vmatprep.subr.bf16.mxu1 %v7612_v20  ;;  %v7665_v15 = vld [vmem:[%s10136_s1 + $0xd40] ss:$12 sps:$4 sm:$0xff]  }
 0x1ad   :  { %4775 = vmatprep.subr.bf16.mxu0 %v7611_v18  ;;  %v7666_v18 = vld [vmem:[%s10136_s1 + $0xc80] ss:$12 sps:$4 sm:$0xff]  }
 0x1ae   :  { %v7669_v20 = vld [vmem:[%s10136_s1 + $0xf94] ss:$12 sps:$4 sm:$0xff]  }
 0x1af   :  { %6737 = vmatpush3.bf16.msra.mxu1 %v7613_v22 }
 0x1b0   :  { %4776 = vmatpush1.bf16.msra.mxu0 %v7609_v21  ;;  %6738 = vmatprep.subr.bf16.mxu1 %v7617_v24  ;;  %v7670_v21 = vld [vmem:[%s10136_s1 + $0xd58] ss:$12 sps:$4 sm:$0xff]   ;;  %v7667_v24 = vld [vmem:[%s10136_s1 + $0xf90] ss:$12 sps:$4 sm:$0xff]  }
 0x1b1   :  { %4777 = vmatprep.subr.bf16.mxu0 %v7616_v23 }
 0x1b3   :  { %6739 = vmatpush3.bf16.msra.mxu1 %v7618_v26  ;;  %v7671_v26 = vld [vmem:[%s10136_s1 + $0xc98] ss:$12 sps:$4 sm:$0xff]  }
 0x1b4   :  { %4778 = vmatpush1.bf16.msra.mxu0 %v7614_v25  ;;  %6740 = vmatprep.subr.bf16.mxu1 %v7622_v28 }
 0x1b5   :  { %4779 = vmatprep.subr.bf16.mxu0 %v7621_v27  ;;  %v6592_v35 = vpop.f32.mrb[4].mxu1 }
 0x1b6   :  { %v6593_v36 = vpop.f32.mrb[5].mxu1 }
 0x1b7   :  { %6741 = vmatpush3.bf16.msra.mxu1 %v7623_v30  ;;  %v9409_v39 = vadd.f32 %v6593_v36, %v6592_v35  ;;  %v6595_v40 = vpop.f32.mrb[6].mxu1  ;;  %v7674_v30 = vld [vmem:[%s10136_s1 + $0xfac] ss:$12 sps:$4 sm:$0xff]   ;;  %v7672_v36 = vld [vmem:[%s10136_s1 + $0xfa8] ss:$12 sps:$4 sm:$0xff]  }
 0x1b8   :  { %4780 = vmatpush1.bf16.msra.mxu0 %v7619_v29  ;;  %6742 = vmatprep.subr.bf16.mxu1 %v7627_v33  ;;  %v6596_v42 = vpop.f32.mrb[7].mxu1  ;;  %v7675_v33 = vld [vmem:[%s10136_s1 + $0xd70] ss:$12 sps:$4 sm:$0xff]  }
 0x1b9   :  { %4781 = vmatprep.subr.bf16.mxu0 %v7626_v32  ;;  %v9414_v43 = vadd.f32 %v6596_v42, %v6595_v40  ;;  %v4960_v22 = vadd.f32 %v9409_v39, %v904_v16  ;;  %v7679_v39 = vld [vmem:[%s10136_s1 + $0xfc4] ss:$12 sps:$4 sm:$0xff]   ;;  %v7680_v40 = vld [vmem:[%s10136_s1 + $0xe48] ss:$12 sps:$4 sm:$0xff]  }
 0x1ba   :  { %v7681_v42 = vld [vmem:[%s10136_s1 + $0xd88] ss:$12 sps:$4 sm:$0xff]  }
 0x1bb   :  { %6743 = vmatpush3.bf16.msra.mxu1 %v7628_v37  ;;  %v4963_v27 = vadd.f32 %v9414_v43, %v904_v16  ;;  %v7676_v37 = vld [vmem:[%s10136_s1 + $0xcb0] ss:$12 sps:$4 sm:$0xff]  }
 0x1bc   :  { %4782 = vmatpush1.bf16.msra.mxu0 %v7624_v34  ;;  %6744 = vmatprep.subr.bf16.mxu1 %v7632_v41  ;;  %v7677_v41 = vld [vmem:[%s10136_s1 + $0xfc0] ss:$12 sps:$4 sm:$0xff]   ;;  %v7684_v43 = vld [vmem:[%s10136_s1 + $0xfdc] ss:$12 sps:$4 sm:$0xff]  }
 0x1bd   :  { %4783 = vmatprep.subr.bf16.mxu0 %v7631_v38 }
 0x1bf   :  { %6745 = vmatpush3.bf16.msra.mxu1 %v7633_v45  ;;  %v7682_v45 = vld [vmem:[%s10136_s1 + $0xfd8] ss:$12 sps:$4 sm:$0xff]  }
 0x1c0   :  { %4784 = vmatpush1.bf16.msra.mxu0 %v7629_v44  ;;  %6752 = vmatprep.subr.bf16.mxu1 %v7640_v47  ;;  %v7685_v44 = vld [vmem:[%s10136_s1 + $0xe60] ss:$12 sps:$4 sm:$0xff]  }
 0x1c1   :  { %4796 = vmatprep.subr.bf16.mxu0 %v7639_v46  ;;  %v7686_v46 = vld [vmem:[%s10136_s1 + $0xda0] ss:$12 sps:$4 sm:$0xff]  }
 0x1c2   :  { %5245 = vmatmul.mubr.bf16.vlgmr.msra.gmra.mrb[32].mxu1 %v7901_v55  ;;  %v7689_v47 = vld [vmem:[%s10136_s1 + $0xff4] ss:$12 sps:$4 sm:$0xff]   ;;  %v7699_v55 = vld [vmem:[%s10136_s1 + $0x1024] ss:$12 sps:$4 sm:$0xff]  }
 0x1c3   :  { %4786 = vmatmul.mubr.bf16.vlgmr.msra.gmra.mrb[0].mxu0 %v9431_v48  ;;  %6753 = vmatpush3.bf16.msra.mxu1 %v7641_v50  ;;  %v7691_v50 = vld [vmem:[%s10136_s1 + $0xdb8] ss:$12 sps:$4 sm:$0xff]  }
 0x1c4   :  { %4797 = vmatpush1.bf16.msra.mxu0 %v7637_v49  ;;  %6754 = vmatprep.subr.bf16.mxu1 %v7645_v52  ;;  %v7687_v49 = vld [vmem:[%s10136_s1 + $0xff0] ss:$12 sps:$4 sm:$0xff]   ;;  %v7692_v52 = vld [vmem:[%s10136_s1 + $0x1008] ss:$12 sps:$4 sm:$0xff]  }
 0x1c5   :  { %4798 = vmatprep.subr.bf16.mxu0 %v7644_v51  ;;  %5285 = vmatprep.mubr.bf16.mxu1 %v7902_v61  ;;  %v7694_v51 = vld [vmem:[%s10136_s1 + $0x100c] ss:$12 sps:$4 sm:$0xff]   ;;  %v7704_v61 = vld [vmem:[%s10136_s1 + $0x103c] ss:$12 sps:$4 sm:$0xff]  }
 0x1c6   :  { %4828 = vmatprep.mubr.bf16.mxu0 %v9451_v54 }
 0x1c7   :  { %6755 = vmatpush3.bf16.msra.mxu1 %v7646_v56  ;;  %v7700_v56 = vld [vmem:[%s10136_s1 + $0xea8] ss:$12 sps:$4 sm:$0xff]  }
 0x1c8   :  { %4799 = vmatpush1.bf16.msra.mxu0 %v7642_v53  ;;  %6756 = vmatprep.subr.bf16.mxu1 %v7650_v59  ;;  %v7696_v53 = vld [vmem:[%s10136_s1 + $0xdd0] ss:$12 sps:$4 sm:$0xff]   ;;  %v7701_v59 = vld [vmem:[%s10136_s1 + $0xde8] ss:$12 sps:$4 sm:$0xff]  }
 0x1c9   :  { %4800 = vmatprep.subr.bf16.mxu0 %v7649_v57  ;;  %v7697_v57 = vld [vmem:[%s10136_s1 + $0x1020] ss:$12 sps:$4 sm:$0xff]  }
 0x1cb   :  { %6757 = vmatpush3.bf16.msra.mxu1 %v7651_v1  ;;  %v7706_v1 = vld [vmem:[%s10136_s1 + $0xe00] ss:$12 sps:$4 sm:$0xff]  }
 0x1cc   :  { %4801 = vmatpush1.bf16.msra.mxu0 %v7647_v63  ;;  %6758 = vmatprep.subr.bf16.mxu1 %v7655_v3  ;;  %v7705_v63 = vld [vmem:[%s10136_s1 + $0xec0] ss:$12 sps:$4 sm:$0xff]   ;;  %v7710_v3 = vld [vmem:[%s10136_s1 + $0xed8] ss:$12 sps:$4 sm:$0xff]  }
 0x1cd   :  { %4802 = vmatprep.subr.bf16.mxu0 %v7654_v2  ;;  %v7709_v2 = vld [vmem:[%s10136_s1 + $0x1054] ss:$12 sps:$4 sm:$0xff]  }
 0x1cf   :  { %6759 = vmatpush3.bf16.msra.mxu1 %v7656_v6 }
 0x1d0   :  { %4803 = vmatpush1.bf16.msra.mxu0 %v7652_v4  ;;  %6760 = vmatprep.subr.bf16.mxu1 %v7660_v8 }
 0x1d1   :  { %4804 = vmatprep.subr.bf16.mxu0 %v7659_v7 }
 0x1d3   :  { %6761 = vmatpush3.bf16.msra.mxu1 %v7661_v13  ;;  %v7714_v13 = vld [vmem:[%s10136_s1 + $0x106c] ss:$12 sps:$4 sm:$0xff]  }
 0x1d4   :  { %4805 = vmatpush1.bf16.msra.mxu0 %v7657_v11  ;;  %6762 = vmatprep.subr.bf16.mxu1 %v7665_v15 }
 0x1d5   :  { %4806 = vmatprep.subr.bf16.mxu0 %v7664_v14  ;;  %v6614_v23 = vpop.f32.mrb[8].mxu1  ;;  %v7715_v14 = vld [vmem:[%s10136_s1 + $0xef0] ss:$12 sps:$4 sm:$0xff]  }
 0x1d6   :  { %v6615_v25 = vpop.f32.mrb[9].mxu1 }
 0x1d7   :  { %6763 = vmatpush3.bf16.msra.mxu1 %v7666_v18  ;;  %v6616_v28 = vadd.f32 %v6615_v25, %v6614_v23  ;;  %v6617_v29 = vpop.f32.mrb[10].mxu1  ;;  %v7712_v18 = vld [vmem:[%s10136_s1 + $0x1068] ss:$12 sps:$4 sm:$0xff]   ;;  %v9661_v23 = vld [vmem:[%s10137_s0 + $0x50] ss:$104 sps:$4 sm:$0xff]  }
 0x1d8   :  { %4807 = vmatpush1.bf16.msra.mxu0 %v7662_v17  ;;  %6764 = vmatprep.subr.bf16.mxu1 %v7670_v21  ;;  %v6618_v32 = vpop.f32.mrb[11].mxu1  ;;  %v7722_v21 = vld [vmem:[%s10136_s1 + $0x1084] ss:$12 sps:$4 sm:$0xff]   ;;  %v7724_v25 = vld [vmem:[%s10136_s1 + $0xf08] ss:$12 sps:$4 sm:$0xff]  }
 0x1d9   :  { %4808 = vmatprep.subr.bf16.mxu0 %v7669_v20  ;;  %v9538_v34 = vadd.f32 %v6616_v28, %v4960_v22  ;;  %v6619_v35 = vadd.f32 %v6618_v32, %v6617_v29  ;;  %v7716_v20 = vld [vmem:[%s10136_s1 + $0xe30] ss:$12 sps:$4 sm:$0xff]   ;;  %v7723_v22 = vld [vmem:[%s10136_s1 + $0xfc8] ss:$12 sps:$4 sm:$0xff]   ;;  %v7725_v29 = vld [vmem:[%s10136_s1 + $0x1098] ss:$12 sps:$4 sm:$0xff]  }
 0x1da   :  { %v9678_v28 = vld [vmem:[%s10137_s0 + $0x5c] ss:$104 sps:$4 sm:$0xff]   ;;  %v7732_v32 = vld [vmem:[%s10136_s1 + $0x10b4] ss:$12 sps:$4 sm:$0xff]  }
 0x1db   :  { %6765 = vmatpush3.bf16.msra.mxu1 %v7671_v26  ;;  %v9546_v38 = vadd.f32 %v6619_v35, %v4963_v27  ;;  %v7727_v26 = vld [vmem:[%s10136_s1 + $0x109c] ss:$12 sps:$4 sm:$0xff]   ;;  %v7728_v27 = vld [vmem:[%s10136_s1 + $0xfe0] ss:$12 sps:$4 sm:$0xff]  }
 0x1dc   :  { %4809 = vmatpush1.bf16.msra.mxu0 %v7667_v24  ;;  %6766 = vmatprep.subr.bf16.mxu1 %v7675_v33  ;;  %v7720_v24 = vld [vmem:[%s10136_s1 + $0x1080] ss:$12 sps:$4 sm:$0xff]   ;;  %v7730_v33 = vld [vmem:[%s10136_s1 + $0x10b0] ss:$12 sps:$4 sm:$0xff]  }
 0x1dd   :  { %4810 = vmatprep.subr.bf16.mxu0 %v7674_v30  ;;  %v7729_v30 = vld [vmem:[%s10136_s1 + $0xf20] ss:$12 sps:$4 sm:$0xff]  }
 0x1de   :  { %v7737_v35 = vld [vmem:[%s10136_s1 + $0x10cc] ss:$12 sps:$4 sm:$0xff]  }
 0x1df   :  { %6767 = vmatpush3.bf16.msra.mxu1 %v7676_v37  ;;  %v7739_v37 = vld [vmem:[%s10136_s1 + $0xf50] ss:$12 sps:$4 sm:$0xff]  }
 0x1e0   :  { %4811 = vmatpush1.bf16.msra.mxu0 %v7672_v36  ;;  %6774 = vmatprep.subr.bf16.mxu1 %v7680_v40  ;;  %v7735_v36 = vld [vmem:[%s10136_s1 + $0x10c8] ss:$12 sps:$4 sm:$0xff]   ;;  %v7740_v40 = vld [vmem:[%s10136_s1 + $0x10e0] ss:$12 sps:$4 sm:$0xff]  }
 0x1e1   :  { %4812 = vmatprep.subr.bf16.mxu0 %v7679_v39  ;;  %v7743_v39 = vld [vmem:[%s10136_s1 + $0x1028] ss:$12 sps:$4 sm:$0xff]  }
 0x1e2   :  { %5286 = vmatmul.mubr.bf16.vlgmr.msra.gmra.mrb[36].mxu1 %v9203_v31  ;;  %v7690_v31 = vld [vmem:[%s10136_s1 + $0xe78] ss:$12 sps:$4 sm:$0xff]  }
 0x1e3   :  { %6775 = vmatpush3.bf16.msra.mxu1 %v7681_v42  ;;  %5326 = vmatprep.mubr.bf16.mxu1 %v9220_v19  ;;  %v7695_v19 = vld [vmem:[%s10136_s1 + $0xe90] ss:$12 sps:$4 sm:$0xff]  }
 0x1e4   :  { %4813 = vmatpush1.bf16.msra.mxu0 %v7677_v41  ;;  %6776 = vmatprep.subr.bf16.mxu1 %v7685_v44  ;;  %v7744_v41 = vld [vmem:[%s10136_s1 + $0xf68] ss:$12 sps:$4 sm:$0xff]   ;;  %v7745_v44 = vld [vmem:[%s10136_s1 + $0x10f8] ss:$12 sps:$4 sm:$0xff]  }
 0x1e5   :  { %4814 = vmatprep.subr.bf16.mxu0 %v7684_v43  ;;  %v7747_v42 = vld [vmem:[%s10136_s1 + $0x10fc] ss:$12 sps:$4 sm:$0xff]   ;;  %v7748_v43 = vld [vmem:[%s10136_s1 + $0x1040] ss:$12 sps:$4 sm:$0xff]  }
 0x1e7   :  { %6777 = vmatpush3.bf16.msra.mxu1 %v7686_v46  ;;  %v7752_v46 = vld [vmem:[%s10136_s1 + $0x1114] ss:$12 sps:$4 sm:$0xff]  }
 0x1e8   :  { %4815 = vmatpush1.bf16.msra.mxu0 %v7682_v45  ;;  %6778 = vmatprep.subr.bf16.mxu1 %v7690_v31  ;;  %v7749_v45 = vld [vmem:[%s10136_s1 + $0xf80] ss:$12 sps:$4 sm:$0xff]  }
 0x1e9   :  { %4816 = vmatprep.subr.bf16.mxu0 %v7689_v47  ;;  %v7753_v47 = vld [vmem:[%s10136_s1 + $0x1058] ss:$12 sps:$4 sm:$0xff]  }
 0x1eb   :  { %6779 = vmatpush3.bf16.msra.mxu1 %v7691_v50 }
 0x1ec   :  { %4817 = vmatpush1.bf16.msra.mxu0 %v7687_v49  ;;  %6780 = vmatprep.subr.bf16.mxu1 %v7695_v19  ;;  %v7750_v19 = vld [vmem:[%s10136_s1 + $0x1110] ss:$12 sps:$4 sm:$0xff]  }
 0x1ed   :  { %4818 = vmatprep.subr.bf16.mxu0 %v7694_v51 }
 0x1ef   :  { %6781 = vmatpush3.bf16.msra.mxu1 %v7696_v53 }
 0x1f0   :  { %4819 = vmatpush1.bf16.msra.mxu0 %v7692_v52  ;;  %6782 = vmatprep.subr.bf16.mxu1 %v7700_v56  ;;  %v7754_v52 = vld [vmem:[%s10136_s1 + $0xf98] ss:$12 sps:$4 sm:$0xff]   ;;  %v7758_v56 = vld [vmem:[%s10136_s1 + $0x1070] ss:$12 sps:$4 sm:$0xff]  }
 0x1f1   :  { %4820 = vmatprep.subr.bf16.mxu0 %v7699_v55  ;;  %v7757_v55 = vld [vmem:[%s10136_s1 + $0x112c] ss:$12 sps:$4 sm:$0xff]  }
 0x1f3   :  { %6783 = vmatpush3.bf16.msra.mxu1 %v7701_v59 }
 0x1f4   :  { %4821 = vmatpush1.bf16.msra.mxu0 %v7697_v57  ;;  %6784 = vmatprep.subr.bf16.mxu1 %v7705_v63  ;;  %v7755_v63 = vld [vmem:[%s10136_s1 + $0x1128] ss:$12 sps:$4 sm:$0xff]  }
 0x1f5   :  { %4822 = vmatprep.subr.bf16.mxu0 %v7704_v61  ;;  %v6636_v4 = vpop.f32.mrb[12].mxu1 }
 0x1f6   :  { %v6637_v6 = vpop.f32.mrb[13].mxu1 }
 0x1f7   :  { %v6638_v7 = vadd.f32 %v6637_v6, %v6636_v4  ;;  %v6639_v8 = vpop.f32.mrb[14].mxu1  ;;  %6785 = vmatpush3.bf16.msra.mxu1 %v7706_v1  ;;  %v7762_v1 = vld [vmem:[%s10136_s1 + $0x1144] ss:$12 sps:$4 sm:$0xff]   ;;  %v7764_v4 = vld [vmem:[%s10136_s1 + $0x1088] ss:$12 sps:$4 sm:$0xff]  }
 0x1f8   :  { %4823 = vmatpush1.bf16.msra.mxu0 %v7702_v0  ;;  %v6640_v11 = vpop.f32.mrb[15].mxu1  ;;  %6786 = vmatprep.subr.bf16.mxu1 %v7710_v3  ;;  %v7759_v0 = vld [vmem:[%s10136_s1 + $0xfb0] ss:$12 sps:$4 sm:$0xff]   ;;  %v7760_v3 = vld [vmem:[%s10136_s1 + $0x1140] ss:$12 sps:$4 sm:$0xff]  }
 0x1f9   :  { %4824 = vmatprep.subr.bf16.mxu0 %v7709_v2  ;;  %v9641_v15 = vadd.f32 %v6638_v7, %v9538_v34  ;;  %v6641_v16 = vadd.f32 %v6640_v11, %v6639_v8  ;;  %v7734_v34 = vld [vmem:[%s10136_s1 + $0xf38] ss:$12 sps:$4 sm:$0xff]   ;;  %v7763_v2 = vld [vmem:[%s10136_s1 + $0x1148] ss:$12 sps:$4 sm:$0xff]   ;;  %v7768_v7 = vld [vmem:[%s10136_s1 + $0x1160] ss:$12 sps:$4 sm:$0xff]  }
 0x1fa   :  { %v7767_v6 = vld [vmem:[%s10136_s1 + $0x115c] ss:$12 sps:$4 sm:$0xff]   ;;  %v7765_v8 = vld [vmem:[%s10136_s1 + $0x1158] ss:$12 sps:$4 sm:$0xff]  }
 0x1fb   :  { %v9644_v17 = vadd.f32 %v6641_v16, %v9546_v38  ;;  %6787 = vmatpush3.bf16.msra.mxu1 %v7711_v10  ;;  %v7742_v38 = vld [vmem:[%s10136_s1 + $0x10e4] ss:$12 sps:$4 sm:$0xff]   ;;  %v7772_v10 = vld [vmem:[%s10136_s1 + $0x1174] ss:$12 sps:$4 sm:$0xff]  }
 0x1fc   :  { %4825 = vmatpush1.bf16.msra.mxu0 %v7707_v9  ;;  %6788 = vmatprep.subr.bf16.mxu1 %v7715_v14  ;;  %v7769_v9 = vld [vmem:[%s10136_s1 + $0x10a0] ss:$12 sps:$4 sm:$0xff]   ;;  %v7773_v11 = vld [vmem:[%s10136_s1 + $0x1178] ss:$12 sps:$4 sm:$0xff]   ;;  %v7778_v16 = vld [vmem:[%s10136_s1 + $0x1190] ss:$12 sps:$4 sm:$0xff]  }
 0x1fd   :  { %4826 = vmatprep.subr.bf16.mxu0 %v7714_v13  ;;  %v7770_v13 = vld [vmem:[%s10136_s1 + $0x1170] ss:$12 sps:$4 sm:$0xff]   ;;  %v7774_v14 = vld [vmem:[%s10136_s1 + $0x10b8] ss:$12 sps:$4 sm:$0xff]  }
 0x1ff   :  { %6789 = vmatpush3.bf16.msra.mxu1 %v7716_v20  ;;  %v7782_v20 = vld [vmem:[%s10136_s1 + $0x11a4] ss:$12 sps:$4 sm:$0xff]  }
 0x200   :  { %4827 = vmatpush1.bf16.msra.mxu0 %v7712_v18  ;;  %6796 = vmatprep.subr.bf16.mxu1 %v7723_v22  ;;  %v7779_v18 = vld [vmem:[%s10136_s1 + $0x10d0] ss:$12 sps:$4 sm:$0xff]   ;;  %v7780_v22 = vld [vmem:[%s10136_s1 + $0x11a0] ss:$12 sps:$4 sm:$0xff]  }
 0x201   :  { %4839 = vmatprep.subr.bf16.mxu0 %v7722_v21  ;;  %v7783_v21 = vld [vmem:[%s10136_s1 + $0x11a8] ss:$12 sps:$4 sm:$0xff]  }
 0x202   :  { %5327 = vmatmul.mubr.bf16.vlgmr.msra.gmra.mrb[40].mxu1 %v9431_v48  ;;  %v7733_v48 = vld [vmem:[%s10136_s1 + $0xff8] ss:$12 sps:$4 sm:$0xff]  }
 0x203   :  { %4829 = vmatmul.mubr.bf16.vlgmr.msra.gmra.mrb[0].mxu0 %v9661_v23  ;;  %6797 = vmatpush3.bf16.msra.mxu1 %v7724_v25  ;;  %v7788_v25 = vld [vmem:[%s10136_s1 + $0x11c0] ss:$12 sps:$4 sm:$0xff]  }
 0x204   :  { %4840 = vmatpush1.bf16.msra.mxu0 %v7720_v24  ;;  %6798 = vmatprep.subr.bf16.mxu1 %v7728_v27  ;;  %v7787_v24 = vld [vmem:[%s10136_s1 + $0x11bc] ss:$12 sps:$4 sm:$0xff]   ;;  %v7789_v27 = vld [vmem:[%s10136_s1 + $0x1100] ss:$12 sps:$4 sm:$0xff]  }
 0x205   :  { %4841 = vmatprep.subr.bf16.mxu0 %v7727_v26  ;;  %5367 = vmatprep.mubr.bf16.mxu1 %v9451_v54  ;;  %v7738_v54 = vld [vmem:[%s10136_s1 + $0x1010] ss:$12 sps:$4 sm:$0xff]   ;;  %v7785_v26 = vld [vmem:[%s10136_s1 + $0x11b8] ss:$12 sps:$4 sm:$0xff]  }
 0x206   :  { %4871 = vmatprep.mubr.bf16.mxu0 %v9678_v28 }
 0x207   :  { %6799 = vmatpush3.bf16.msra.mxu1 %v7729_v30 }
 0x208   :  { %4842 = vmatpush1.bf16.msra.mxu0 %v7725_v29  ;;  %6800 = vmatprep.subr.bf16.mxu1 %v7733_v48  ;;  %v7793_v29 = vld [vmem:[%s10136_s1 + $0x11d8] ss:$12 sps:$4 sm:$0xff]  }
 0x209   :  { %4843 = vmatprep.subr.bf16.mxu0 %v7732_v32 }
 0x20b   :  { %6801 = vmatpush3.bf16.msra.mxu1 %v7734_v34  ;;  %v7790_v34 = vld [vmem:[%s10136_s1 + $0x11d0] ss:$12 sps:$4 sm:$0xff]  }
 0x20c   :  { %4844 = vmatpush1.bf16.msra.mxu0 %v7730_v33  ;;  %6802 = vmatprep.subr.bf16.mxu1 %v7738_v54 }
 0x20d   :  { %4845 = vmatprep.subr.bf16.mxu0 %v7737_v35  ;;  %v7794_v35 = vld [vmem:[%s10136_s1 + $0x1118] ss:$12 sps:$4 sm:$0xff]  }
 0x20f   :  { %6803 = vmatpush3.bf16.msra.mxu1 %v7739_v37  ;;  %v7798_v37 = vld [vmem:[%s10136_s1 + $0x11f0] ss:$12 sps:$4 sm:$0xff]  }
 0x210   :  { %4846 = vmatpush1.bf16.msra.mxu0 %v7735_v36  ;;  %6804 = vmatprep.subr.bf16.mxu1 %v7743_v39  ;;  %v7797_v36 = vld [vmem:[%s10136_s1 + $0x11ec] ss:$12 sps:$4 sm:$0xff]  }
 0x211   :  { %4847 = vmatprep.subr.bf16.mxu0 %v7742_v38 }
 0x213   :  { %6805 = vmatpush3.bf16.msra.mxu1 %v7744_v41  ;;  %v7795_v41 = vld [vmem:[%s10136_s1 + $0x11e8] ss:$12 sps:$4 sm:$0xff]  }
 0x214   :  { %4848 = vmatpush1.bf16.msra.mxu0 %v7740_v40  ;;  %6806 = vmatprep.subr.bf16.mxu1 %v7748_v43  ;;  %v7805_v43 = vld [vmem:[%s10136_s1 + $0x1204] ss:$12 sps:$4 sm:$0xff]  }
 0x215   :  { %4849 = vmatprep.subr.bf16.mxu0 %v7747_v42  ;;  %v6658_v31 = vpop.f32.mrb[16].mxu1  ;;  %v7799_v42 = vld [vmem:[%s10136_s1 + $0x1130] ss:$12 sps:$4 sm:$0xff]  }
 0x216   :  { %v6659_v49 = vpop.f32.mrb[17].mxu1 }
 0x217   :  { %v6660_v50 = vadd.f32 %v6659_v49, %v6658_v31  ;;  %v6661_v51 = vpop.f32.mrb[18].mxu1  ;;  %6807 = vmatpush3.bf16.msra.mxu1 %v7749_v45  ;;  %v7800_v45 = vld [vmem:[%s10137_s0 + $0x58] ss:$104 sps:$4 sm:$0xff]   ;;  %v7810_v31 = vld [vmem:[%s10136_s1 + $0x121c] ss:$12 sps:$4 sm:$0xff]  }
 0x218   :  { %4850 = vmatpush1.bf16.msra.mxu0 %v7745_v44  ;;  %v6662_v53 = vpop.f32.mrb[19].mxu1  ;;  %6808 = vmatprep.subr.bf16.mxu1 %v7753_v47  ;;  %v7806_v44 = vld [vmem:[%s10136_s1 + $0x12c8] ss:$12 sps:$4 sm:$0xff]   ;;  %v7811_v49 = vld [vmem:[%s10136_s1 + $0x12e0] ss:$12 sps:$4 sm:$0xff]  }
 0x219   :  { %4851 = vmatprep.subr.bf16.mxu0 %v7752_v46  ;;  %v9757_v57 = vadd.f32 %v6660_v50, %v9641_v15  ;;  %v6663_v59 = vadd.f32 %v6662_v53, %v6661_v51  ;;  %v7777_v15 = vld [vmem:[%s10136_s1 + $0x118c] ss:$12 sps:$4 sm:$0xff]   ;;  %v7807_v47 = vld [vmem:[%s10136_s1 + $0x1208] ss:$12 sps:$4 sm:$0xff]  }
 0x21a   :  { %v7803_v46 = vld [vmem:[%s10136_s1 + $0x1200] ss:$12 sps:$4 sm:$0xff]   ;;  %v7808_v51 = vld [vmem:[%s10136_s1 + $0x1218] ss:$12 sps:$4 sm:$0xff]  }
 0x21b   :  { %v9760_v61 = vadd.f32 %v6663_v59, %v9644_v17  ;;  %6809 = vmatpush3.bf16.msra.mxu1 %v7754_v52  ;;  %v7775_v17 = vld [vmem:[%s10136_s1 + $0x1188] ss:$12 sps:$4 sm:$0xff]   ;;  %v7845_v50 = vld [vmem:[%s10137_s0 + $0x64] ss:$104 sps:$4 sm:$0xff]   ;;  %v7821_v59 = vld [vmem:[%s10136_s1 + $0x1310] ss:$12 sps:$4 sm:$0xff]  }
 0x21c   :  { %4852 = vmatpush1.bf16.msra.mxu0 %v7750_v19  ;;  %6810 = vmatprep.subr.bf16.mxu1 %v7758_v56  ;;  %v7812_v19 = vld [vmem:[%s10136_s1 + $0x1220] ss:$12 sps:$4 sm:$0xff]   ;;  %v7816_v53 = vld [vmem:[%s10136_s1 + $0x12f8] ss:$12 sps:$4 sm:$0xff]  }
 0x21d   :  { %4853 = vmatprep.subr.bf16.mxu0 %v7757_v55  ;;  %v7815_v52 = vld [vmem:[%s10136_s1 + $0x1234] ss:$12 sps:$4 sm:$0xff]   ;;  %v7813_v55 = vld [vmem:[%s10136_s1 + $0x1230] ss:$12 sps:$4 sm:$0xff]   ;;  %v7817_v56 = vld [vmem:[%s10136_s1 + $0x1238] ss:$12 sps:$4 sm:$0xff]  }
 0x21f   :  { %6811 = vmatpush3.bf16.msra.mxu1 %v7759_v0  ;;  %v7825_v0 = vld [vmem:[%s10136_s1 + $0x1264] ss:$12 sps:$4 sm:$0xff]  }
 0x220   :  { %4854 = vmatpush1.bf16.msra.mxu0 %v7755_v63  ;;  %6818 = vmatprep.subr.bf16.mxu1 %v7763_v2  ;;  %v7822_v63 = vld [vmem:[%s10136_s1 + $0x1250] ss:$12 sps:$4 sm:$0xff]   ;;  %v7823_v2 = vld [vmem:[%s10136_s1 + $0x1260] ss:$12 sps:$4 sm:$0xff]  }
 0x221   :  { %4855 = vmatprep.subr.bf16.mxu0 %v7762_v1  ;;  %v7826_v1 = vld [vmem:[%s10136_s1 + $0x1328] ss:$12 sps:$4 sm:$0xff]  }
 0x222   :  { %5368 = vmatmul.mubr.bf16.vlgmr.msra.gmra.mrb[44].mxu1 %v9661_v23  ;;  %v7784_v23 = vld [vmem:[%s10136_s1 + $0x10e8] ss:$12 sps:$4 sm:$0xff]  }
 0x223   :  { %6819 = vmatpush3.bf16.msra.mxu1 %v7764_v4  ;;  %5408 = vmatprep.mubr.bf16.mxu1 %v9678_v28  ;;  %v7792_v28 = vld [vmem:[%s10136_s1 + $0x11d4] ss:$12 sps:$4 sm:$0xff]   ;;  %v7830_v4 = vld [vmem:[%s10136_s1 + $0x127c] ss:$12 sps:$4 sm:$0xff]  }
 0x224   :  { %4856 = vmatpush1.bf16.msra.mxu0 %v7760_v3  ;;  %6820 = vmatprep.subr.bf16.mxu1 %v7768_v7  ;;  %v7827_v3 = vld [vmem:[%s10136_s1 + $0x1268] ss:$12 sps:$4 sm:$0xff]   ;;  %v7828_v7 = vld [vmem:[%s10136_s1 + $0x1278] ss:$12 sps:$4 sm:$0xff]  }
 0x225   :  { %4857 = vmatprep.subr.bf16.mxu0 %v7767_v6  ;;  %v7831_v6 = vld [vmem:[%s10136_s1 + $0x1340] ss:$12 sps:$4 sm:$0xff]  }
 0x227   :  { %6821 = vmatpush3.bf16.msra.mxu1 %v7769_v9  ;;  %v7835_v9 = vld [vmem:[%s10136_s1 + $0x1294] ss:$12 sps:$4 sm:$0xff]  }
 0x228   :  { %4858 = vmatpush1.bf16.msra.mxu0 %v7765_v8  ;;  %6822 = vmatprep.subr.bf16.mxu1 %v7773_v11  ;;  %v7832_v8 = vld [vmem:[%s10136_s1 + $0x1280] ss:$12 sps:$4 sm:$0xff]  }
 0x229   :  { %4859 = vmatprep.subr.bf16.mxu0 %v7772_v10  ;;  %v7836_v10 = vld [vmem:[%s10136_s1 + $0x1358] ss:$12 sps:$4 sm:$0xff]  }
 0x22b   :  { %6823 = vmatpush3.bf16.msra.mxu1 %v7774_v14 }
 0x22c   :  { %4860 = vmatpush1.bf16.msra.mxu0 %v7770_v13  ;;  %6824 = vmatprep.subr.bf16.mxu1 %v7778_v16  ;;  %v7833_v16 = vld [vmem:[%s10136_s1 + $0x1290] ss:$12 sps:$4 sm:$0xff]  }
 0x22d   :  { %4861 = vmatprep.subr.bf16.mxu0 %v7777_v15 }
 0x22f   :  { %6825 = vmatpush3.bf16.msra.mxu1 %v7779_v18 }
 0x230   :  { %4862 = vmatpush1.bf16.msra.mxu0 %v7775_v17  ;;  %6826 = vmatprep.subr.bf16.mxu1 %v7783_v21  ;;  %v7837_v17 = vld [vmem:[%s10136_s1 + $0x1298] ss:$12 sps:$4 sm:$0xff]   ;;  %v7841_v21 = vld [vmem:[%s10136_s1 + $0x1370] ss:$12 sps:$4 sm:$0xff]  }
 0x231   :  { %4863 = vmatprep.subr.bf16.mxu0 %v7782_v20  ;;  %v7840_v20 = vld [vmem:[%s10136_s1 + $0x12ac] ss:$12 sps:$4 sm:$0xff]  }
 0x233   :  { %6827 = vmatpush3.bf16.msra.mxu1 %v7784_v23 }
 0x234   :  { %4864 = vmatpush1.bf16.msra.mxu0 %v7780_v22  ;;  %6828 = vmatprep.subr.bf16.mxu1 %v7788_v25  ;;  %v7838_v25 = vld [vmem:[%s10136_s1 + $0x12a8] ss:$12 sps:$4 sm:$0xff]  }
 0x235   :  { %4865 = vmatprep.subr.bf16.mxu0 %v7787_v24  ;;  %v6680_v30 = vpop.f32.mrb[20].mxu1 }
 0x236   :  { %v6681_v32 = vpop.f32.mrb[21].mxu1 }
 0x237   :  { %v6682_v48 = vadd.f32 %v6681_v32, %v6680_v30  ;;  %v6683_v33 = vpop.f32.mrb[22].mxu1  ;;  %6829 = vmatpush3.bf16.msra.mxu1 %v7789_v27  ;;  %v7848_v27 = vld [vmem:[%s10136_s1 + $0x12c4] ss:$12 sps:$4 sm:$0xff]   ;;  %v7851_v30 = vld [vmem:[%s10136_s1 + $0x12dc] ss:$12 sps:$4 sm:$0xff]  }
 0x238   :  { %4866 = vmatpush1.bf16.msra.mxu0 %v7785_v26  ;;  %v6684_v54 = vpop.f32.mrb[23].mxu1  ;;  %6830 = vmatprep.subr.bf16.mxu1 %v7793_v29  ;;  %v7842_v26 = vld [vmem:[%s10136_s1 + $0x12b0] ss:$12 sps:$4 sm:$0xff]   ;;  %v7846_v29 = vld [vmem:[%s10136_s1 + $0x12c0] ss:$12 sps:$4 sm:$0xff]  }
 0x239   :  { %4867 = vmatprep.subr.bf16.mxu0 %v7792_v28  ;;  %v9861_v38 = vadd.f32 %v6682_v48, %v9757_v57  ;;  %v6685_v39 = vadd.f32 %v6684_v54, %v6683_v33  ;;  %v7820_v57 = vld [vmem:[%s10136_s1 + $0x124c] ss:$12 sps:$4 sm:$0xff]   ;;  %v7843_v28 = vld [vmem:[%s10137_s0 + $0x60] ss:$104 sps:$4 sm:$0xff]   ;;  %v7852_v33 = vld [vmem:[%s10136_s1 + $0x12f0] ss:$12 sps:$4 sm:$0xff]  }
 0x23a   :  { %v7849_v32 = vld [vmem:[%s10136_s1 + $0x12d8] ss:$12 sps:$4 sm:$0xff]   ;;  %v7854_v48 = vld [vmem:[%s10136_s1 + $0x12f4] ss:$12 sps:$4 sm:$0xff]  }
 0x23b   :  { %v9864_v40 = vadd.f32 %v6685_v39, %v9760_v61  ;;  %6831 = vmatpush3.bf16.msra.mxu1 %v7794_v35  ;;  %v7818_v61 = vld [vmem:[%s10136_s1 + $0x1248] ss:$12 sps:$4 sm:$0xff]   ;;  %v7860_v54 = vld [vmem:[%s10136_s1 + $0x1324] ss:$12 sps:$4 sm:$0xff]  }
 0x23c   :  { %4868 = vmatpush1.bf16.msra.mxu0 %v7790_v34  ;;  %6832 = vmatprep.subr.bf16.mxu1 %v7798_v37  ;;  %v7857_v34 = vld [vmem:[%s10136_s1 + $0x130c] ss:$12 sps:$4 sm:$0xff]   ;;  %v7855_v35 = vld [vmem:[%s10136_s1 + $0x1308] ss:$12 sps:$4 sm:$0xff]  }
 0x23d   :  { %4869 = vmatprep.subr.bf16.mxu0 %v7797_v36  ;;  %v7858_v36 = vld [vmem:[%s10136_s1 + $0x1320] ss:$12 sps:$4 sm:$0xff]   ;;  %v7863_v37 = vld [vmem:[%s10136_s1 + $0x133c] ss:$12 sps:$4 sm:$0xff]  }
 0x23e   :  { %v7866_v39 = vld [vmem:[%s10136_s1 + $0x1354] ss:$12 sps:$4 sm:$0xff]  }
 0x23f   :  { %6833 = vmatpush3.bf16.msra.mxu1 %v7799_v42 }
 0x240   :  { %4870 = vmatpush1.bf16.msra.mxu0 %v7795_v41  ;;  %6840 = vmatprep.subr.bf16.mxu1 %v7806_v44  ;;  %v7864_v44 = vld [vmem:[%s10136_s1 + $0x1350] ss:$12 sps:$4 sm:$0xff]  }
 0x241   :  { %4882 = vmatprep.subr.bf16.mxu0 %v7805_v43 }
 0x242   :  { %5409 = vmatmul.mubr.bf16.vlgmr.msra.gmra.mrb[48].mxu1 %v7800_v45 }
 0x243   :  { %4872 = vmatmul.mubr.bf16.vlgmr.msra.gmra.mrb[0].mxu0 %v7800_v45  ;;  %6841 = vmatpush3.bf16.msra.mxu1 %v7807_v47 }
 0x244   :  { %4883 = vmatpush1.bf16.msra.mxu0 %v7803_v46  ;;  %6842 = vmatprep.subr.bf16.mxu1 %v7811_v49  ;;  %v7869_v46 = vld [vmem:[%s10136_s1 + $0x136c] ss:$12 sps:$4 sm:$0xff]  }
 0x245   :  { %4884 = vmatprep.subr.bf16.mxu0 %v7810_v31  ;;  %5449 = vmatprep.mubr.bf16.mxu1 %v7845_v50 }
 0x246   :  { %4914 = vmatprep.mubr.bf16.mxu0 %v7845_v50  ;;  %v7867_v50 = vld [vmem:[%s10136_s1 + $0x1368] ss:$12 sps:$4 sm:$0xff]  }
 0x247   :  { %6843 = vmatpush3.bf16.msra.mxu1 %v7812_v19 }
 0x248   :  { %4885 = vmatpush1.bf16.msra.mxu0 %v7808_v51  ;;  %6844 = vmatprep.subr.bf16.mxu1 %v7816_v53 }
 0x249   :  { %4886 = vmatprep.subr.bf16.mxu0 %v7815_v52 }
 0x24b   :  { %6845 = vmatpush3.bf16.msra.mxu1 %v7817_v56 }
 0x24c   :  { %4887 = vmatpush1.bf16.msra.mxu0 %v7813_v55  ;;  %6846 = vmatprep.subr.bf16.mxu1 %v7821_v59 }
 0x24d   :  { %4888 = vmatprep.subr.bf16.mxu0 %v7820_v57 }
 0x24f   :  { %6847 = vmatpush3.bf16.msra.mxu1 %v7822_v63 }
 0x250   :  { %4889 = vmatpush1.bf16.msra.mxu0 %v7818_v61  ;;  %6848 = vmatprep.subr.bf16.mxu1 %v7826_v1 }
 0x251   :  { %4890 = vmatprep.subr.bf16.mxu0 %v7825_v0 }
 0x253   :  { %6849 = vmatpush3.bf16.msra.mxu1 %v7827_v3 }
 0x254   :  { %4891 = vmatpush1.bf16.msra.mxu0 %v7823_v2  ;;  %6850 = vmatprep.subr.bf16.mxu1 %v7831_v6  ;;  %v7904_v6 = vmov 0.0  }
 0x255   :  { %4892 = vmatprep.subr.bf16.mxu0 %v7830_v4  ;;  %v6702_v11 = vpop.f32.mrb[24].mxu1 }
 0x256   :  { %v6703_v13 = vpop.f32.mrb[25].mxu1 }
 0x257   :  { %v6704_v14 = vadd.f32 %v6703_v13, %v6702_v11  ;;  %v6705_v15 = vpop.f32.mrb[26].mxu1  ;;  %6851 = vmatpush3.bf16.msra.mxu1 %v7832_v8  ;;  %v7873_v11 = vld [vmem:[%s10139_s3] sm:$0xff]   ;;  %v7874_v13 = vld [vmem:[%s10139_s3 + $0x48] sm:$0xff]  }
 0x258   :  { %4893 = vmatpush1.bf16.msra.mxu0 %v7828_v7  ;;  %v6706_v18 = vpop.f32.mrb[27].mxu1  ;;  %6852 = vmatprep.subr.bf16.mxu1 %v7836_v10  ;;  %v7870_v7 = vld [vmem:[%s10139_s3 + $0x80] sm:$0xff]  }
 0x259   :  { %4894 = vmatprep.subr.bf16.mxu0 %v7835_v9  ;;  %v5165_v22 = vadd.f32 %v6704_v14, %v9861_v38  ;;  %v6707_v23 = vadd.f32 %v6706_v18, %v6705_v15  ;;  %v7861_v38 = vld [vmem:[%s10136_s1 + $0x1338] ss:$12 sps:$4 sm:$0xff]   ;;  %v7871_v9 = vld [vmem:[%s10139_s3 + $0x88] sm:$0xff]   ;;  %v7876_v15 = vld [vmem:[%s10139_s3 + $0x50] sm:$0xff]  }
 0x25a   :  { %v7872_v10 = vld [vmem:[%s10139_s3 + $0x40] sm:$0xff]   ;;  %v7875_v14 = vld [vmem:[%s10139_s3 + $0x8] sm:$0xff]   ;;  %v7879_v18 = vld [vmem:[%s10139_s3 + $0x18] sm:$0xff]  }
 0x25b   :  { %v5168_v24 = vadd.f32 %v6707_v23, %v9864_v40  ;;  %6853 = vmatpush3.bf16.msra.mxu1 %v7837_v17  ;;  %v7878_v17 = vld [vmem:[%s10139_s3 + $0x58] sm:$0xff]   ;;  %v7883_v23 = vld [vmem:[%s10139_s3 + $0x28] sm:$0xff]  }
 0x25c   :  { %4895 = vmatpush1.bf16.msra.mxu0 %v7833_v16  ;;  %6854 = vmatprep.subr.bf16.mxu1 %v7841_v21  ;;  %v7877_v16 = vld [vmem:[%s10139_s3 + $0x10] sm:$0xff]   ;;  %v7881_v21 = vld [vmem:[%s10139_s3 + $0x20] sm:$0xff]  }
 0x25d   :  { %4896 = vmatprep.subr.bf16.mxu0 %v7840_v20  ;;  %v7880_v20 = vld [vmem:[%s10139_s3 + $0x60] sm:$0xff]  }
 0x25f   :  { %6855 = vmatpush3.bf16.msra.mxu1 %v7842_v26  ;;  %v7884_v26 = vld [vmem:[%s10139_s3 + $0x70] sm:$0xff]  }
 0x260   :  { %4897 = vmatpush1.bf16.msra.mxu0 %v7838_v25  ;;  %6862 = vmatprep.subr.bf16.mxu1 %v7872_v10 }
 0x261   :  { %4898 = vmatprep.subr.bf16.mxu0 %v7848_v27 }
 0x262   :  { %5450 = vmatmul.mubr.bf16.vlgmr.msra.gmra.mrb[52].mxu1 %v7843_v28 }
 0x263   :  { %6863 = vmatpush3.bf16.msra.mxu1 %v7873_v11 }
 0x264   :  { %4899 = vmatpush1.bf16.msra.mxu0 %v7846_v29  ;;  %6864 = vmatprep.subr.bf16.mxu1 %v7874_v13  ;;  %v7885_v29 = vld [vmem:[%s10139_s3 + $0x30] sm:$0xff]  }
 0x265   :  { %4900 = vmatprep.subr.bf16.mxu0 %v7851_v30 }
 0x267   :  { %6865 = vmatpush3.bf16.msra.mxu1 %v7875_v14 }
 0x268   :  { %4901 = vmatpush1.bf16.msra.mxu0 %v7849_v32  ;;  %6866 = vmatprep.subr.bf16.mxu1 %v7876_v15 }
 0x269   :  { %4902 = vmatprep.subr.bf16.mxu0 %v7854_v48 }
 0x26b   :  { %6867 = vmatpush3.bf16.msra.mxu1 %v7877_v16 }
 0x26c   :  { %4903 = vmatpush1.bf16.msra.mxu0 %v7852_v33  ;;  %6868 = vmatprep.subr.bf16.mxu1 %v7878_v17  ;;  %v7886_v33 = vld [vmem:[%s10139_s3 + $0x78] sm:$0xff]  }
 0x26d   :  { %4904 = vmatprep.subr.bf16.mxu0 %v7857_v34 }
 0x26f   :  { %6869 = vmatpush3.bf16.msra.mxu1 %v7879_v18 }
 0x270   :  { %4905 = vmatpush1.bf16.msra.mxu0 %v7855_v35  ;;  %6870 = vmatprep.subr.bf16.mxu1 %v7880_v20  ;;  %v7887_v35 = vld [vmem:[%s10139_s3 + $0x38] sm:$0xff]  }
 0x271   :  { %4906 = vmatprep.subr.bf16.mxu0 %v7860_v54 }
 0x273   :  { %6871 = vmatpush3.bf16.msra.mxu1 %v7881_v21 }
 0x274   :  { %4907 = vmatpush1.bf16.msra.mxu0 %v7858_v36 }
 0x275   :  { %4908 = vmatprep.subr.bf16.mxu0 %v7863_v37  ;;  %v6724_v40 = vpop.f32.mrb[28].mxu1 }
 0x276   :  { %v6725_v41 = vpop.f32.mrb[29].mxu1 }
 0x277   :  { %v6726_v42 = vadd.f32 %v6725_v41, %v6724_v40  ;;  %v6727_v43 = vpop.f32.mrb[30].mxu1 }
 0x278   :  { %4909 = vmatpush1.bf16.msra.mxu0 %v7861_v38  ;;  %v6728_v45 = vpop.f32.mrb[31].mxu1 }
 0x279   :  { %4910 = vmatprep.subr.bf16.mxu0 %v7866_v39  ;;  %v5206_v47 = vadd.f32 %v6726_v42, %v5165_v22  ;;  %v6729_v31 = vadd.f32 %v6728_v45, %v6727_v43  ;;  %v7882_v22 = vld [vmem:[%s10139_s3 + $0x68] sm:$0xff]  }
 0x27a   :  { %6872 = vmatprep.subr.bf16.mxu1 %v7882_v22 }
 0x27b   :  { %v5209_v49 = vadd.f32 %v6729_v31, %v5168_v24  ;;  %6873 = vmatpush3.bf16.msra.mxu1 %v7883_v23 }
 0x27c   :  { %4911 = vmatpush1.bf16.msra.mxu0 %v7864_v44  ;;  %6874 = vmatprep.subr.bf16.mxu1 %v7884_v26  ;;  %v5709_v26 = vld [vmem:[%s10140_s5 + $0x18] sm:$0xff] }
 0x27d   :  { %4912 = vmatprep.subr.bf16.mxu0 %v7869_v46 }
 0x27f   :  { %6875 = vmatpush3.bf16.msra.mxu1 %v7885_v29  ;;  %v5801_v29 = vld [vmem:[%s10141_s7 + $0x8] sm:$0xff] }
 0x280   :  { %4913 = vmatpush1.bf16.msra.mxu0 %v7867_v50  ;;  %6876 = vmatprep.subr.bf16.mxu1 %v7886_v33 }
 0x281   :  { %6899 = vmatprep.subr.bf16.mxu0 %v7904_v6 }
 0x283   :  { %4915 = vmatmul.mubr.bf16.vlgmr.msra.gmra.mrb[0].mxu0 %v7843_v28  ;;  %6877 = vmatpush3.bf16.msra.mxu1 %v7887_v35 }
 0x284   :  { %6900 = vmatpush3.bf16.msra.mxu0 %v7870_v7  ;;  %6903 = vmatprep.mubr.msk.bf16.mxu0 %vm7905_vm0, %v7904_v6 }
 0x285   :  { %6901 = vmatprep.subr.bf16.mxu0 %v7904_v6 }
 0x288   :  { %6902 = vmatpush3.bf16.msra.mxu0 %v7871_v9 }
 0x295   :  { %v6746_v51 = vpop.f32.mrb[32].mxu1 }
 0x296   :  { %v6747_v19 = vpop.f32.mrb[33].mxu1 }
 0x297   :  { %v6748_v52 = vadd.f32 %v6747_v19, %v6746_v51  ;;  %v6749_v53 = vpop.f32.mrb[34].mxu1 }
 0x298   :  { %v6750_v55 = vpop.f32.mrb[35].mxu1 }
 0x299   :  { %v5247_v56 = vadd.f32 %v6748_v52, %v5206_v47  ;;  %v6751_v57 = vadd.f32 %v6750_v55, %v6749_v53 }
 0x29b   :  { %v5250_v59 = vadd.f32 %v6751_v57, %v5209_v49 }
 0x2b5   :  { %v6768_v61 = vpop.f32.mrb[36].mxu1 }
 0x2b6   :  { %v6769_v63 = vpop.f32.mrb[37].mxu1 }
 0x2b7   :  { %v6770_v0 = vadd.f32 %v6769_v63, %v6768_v61  ;;  %v6771_v1 = vpop.f32.mrb[38].mxu1 }
 0x2b8   :  { %v6772_v2 = vpop.f32.mrb[39].mxu1 }
 0x2b9   :  { %v5288_v3 = vadd.f32 %v6770_v0, %v5247_v56  ;;  %v6773_v4 = vadd.f32 %v6772_v2, %v6771_v1  ;;  %v895_v1 = vsub.s32 0, %v9485_v5  ;;  %v899_v2 = vsub.s32 1, %v9485_v5 }
 0x2bb   :  { %v5291_v8 = vadd.f32 %v6773_v4, %v5250_v59 }
 0x2d5   :  { %v6790_v24 = vpop.f32.mrb[40].mxu1 }
 0x2d6   :  { %v6791_v25 = vpop.f32.mrb[41].mxu1 }
 0x2d7   :  { %v6792_v27 = vadd.f32 %v6791_v25, %v6790_v24  ;;  %v6793_v28 = vpop.f32.mrb[42].mxu1  ;;  %v5708_v25 = vld [vmem:[%s10140_s5 + $0x10] sm:$0xff] }
 0x2d8   :  { %v6794_v30 = vpop.f32.mrb[43].mxu1 }
 0x2d9   :  { %v5329_v32 = vadd.f32 %v6792_v27, %v5288_v3  ;;  %v6795_v48 = vadd.f32 %v6794_v30, %v6793_v28  ;;  %v7903_v3 = vld [vmem:[%s10138_s2] sm:$0x7]  ;;  %v6933_v27 = vpack.c.bf16 %v5709_v26, %v5708_v25 }
 0x2da   :  { %v896_v4 = vrot.slane %v7903_v3, %v895_v1  ;;  %v900_v6 = vrot.slane %v7903_v3, %v899_v2  ;;  %v5800_v28 = vld [vmem:[%s10141_s7] sm:$0xff] }
 0x2db   :  { %v5332_v34 = vadd.f32 %v6795_v48, %v5291_v8  ;;  %v6937_v30 = vpack.c.bf16 %v5801_v29, %v5800_v28 }
 0x2dc   :  { %v6945_v7 = vadd.f32 %v9290_v58, %v896_v4  ;;  %v6947_v8 = vadd.f32 %v9295_v60, %v900_v6  ;;  %v6949_v10 = vadd.f32 %v9300_v62, %v896_v4  ;;  %v6951_v14 = vadd.f32 %v9302_v12, %v900_v6  ;;  %v5706_v60 = vld [vmem:[%s10140_s5] sm:$0xff]  ;;  %v5707_v62 = vld [vmem:[%s10140_s5 + $0x8] sm:$0xff] }
 0x2dd   :  { %v6929_v12 = vpack.c.bf16 %v5707_v62, %v5706_v60 }
 0x2df   :  { %6930 = vmatprep.subr.bf16.mxu1 %v6929_v12 }
 0x2f5   :  { %v6812_v54 = vpop.f32.mrb[44].mxu1 }
 0x2f6   :  { %v6813_v36 = vpop.f32.mrb[45].mxu1 }
 0x2f7   :  { %v6814_v37 = vadd.f32 %v6813_v36, %v6812_v54  ;;  %v6815_v38 = vpop.f32.mrb[46].mxu1  ;;  %v6550_v54 = vld [vmem:[%s10142_s4] ss:$0 sm:$0xff] }
 0x2f8   :  { %v6816_v39 = vpop.f32.mrb[47].mxu1 }
 0x2f9   :  { %v5370_v40 = vadd.f32 %v6814_v37, %v5329_v32  ;;  %v6817_v41 = vadd.f32 %v6816_v39, %v6815_v38 }
 0x2fb   :  { %v5373_v42 = vadd.f32 %v6817_v41, %v5332_v34 }
 0x315   :  { %v6834_v43 = vpop.f32.mrb[48].mxu1 }
 0x316   :  { %v6835_v44 = vpop.f32.mrb[49].mxu1 }
 0x317   :  { %v6836_v45 = vadd.f32 %v6835_v44, %v6834_v43  ;;  %v6837_v46 = vpop.f32.mrb[50].mxu1 }
 0x318   :  { %v6838_v47 = vpop.f32.mrb[51].mxu1 }
 0x319   :  { %v5411_v31 = vadd.f32 %v6836_v45, %v5370_v40  ;;  %v6839_v49 = vadd.f32 %v6838_v47, %v6837_v46  ;;  %v5802_v47 = vld [vmem:[%s10141_s7 + $0x10] sm:$0xff] }
 0x31b   :  { %v5414_v50 = vadd.f32 %v6839_v49, %v5373_v42 }
 0x335   :  { %v6856_v51 = vpop.f32.mrb[52].mxu1 }
 0x336   :  { %v6857_v19 = vpop.f32.mrb[53].mxu1 }
 0x337   :  { %v6858_v52 = vadd.f32 %v6857_v19, %v6856_v51  ;;  %v6859_v53 = vpop.f32.mrb[54].mxu1 }
 0x338   :  { %v6860_v55 = vpop.f32.mrb[55].mxu1 }
 0x339   :  { %v5452_v56 = vadd.f32 %v6858_v52, %v5411_v31  ;;  %v6861_v57 = vadd.f32 %v6860_v55, %v6859_v53  ;;  %v5803_v31 = vld [vmem:[%s10141_s7 + $0x18] sm:$0xff] }
 0x33a   :  { %v6941_v49 = vpack.c.bf16 %v5803_v31, %v5802_v47 }
 0x33b   :  { %v5455_v59 = vadd.f32 %v6861_v57, %v5414_v50  ;;  %v5460_v61 = vmax.f32 %v5452_v56, 0.0  ;;  %v6570_v50 = vld [vmem:[%s10143_s6] ss:$0 sm:$0xff] }
 0x33c   :  { %v6573_v57 = vld [vmem:[%s10144_s8] ss:$0 sm:$0xff] }
 0x33d   :  { %v5463_v63 = vmax.f32 %v5455_v59, 0.0 }
 0x33f   :  { %v5466_v0 = vpack.c.bf16 %v5463_v63, %v5460_v61 }
 0x341   :  { %6904 = vmatmul.mubr.msk.bf16.vlgmr.msra.gmra.mrb[4].mxu0 %vm5618_vm1, %v5466_v0 }
 0x356   :  { %v4916_v9 = vpop.f32.mrb[0].mxu0 }
 0x357   :  { %v6946_v11 = vadd.f32 %v6945_v7, %v4916_v9  ;;  %v4918_v13 = vpop.f32.mrb[1].mxu0 }
 0x358   :  { %v6948_v15 = vadd.f32 %v6947_v8, %v4918_v13  ;;  %v4920_v16 = vpop.f32.mrb[2].mxu0 }
 0x359   :  { %v6950_v5 = vadd.f32 %v6949_v10, %v4920_v16  ;;  %v4922_v17 = vpop.f32.mrb[3].mxu0  ;;  %v5458_v20 = vmax.f32 %v6946_v11, 0.0 }
 0x35a   :  { %v6952_v18 = vadd.f32 %v6951_v14, %v4922_v17  ;;  %v5459_v22 = vmax.f32 %v6948_v15, 0.0 }
 0x35b   :  { %v5461_v21 = vmax.f32 %v6950_v5, 0.0 }
 0x35c   :  { %v5462_v23 = vmax.f32 %v6952_v18, 0.0 }
 0x35d   :  { %v5464_v24 = vpack.c.bf16 %v5461_v21, %v5458_v20 }
 0x35e   :  { %v5465_v58 = vpack.c.bf16 %v5462_v23, %v5459_v22 }
 0x360   :  { %5654 = vmatprep.mubr.bf16.mxu1 %v5465_v58 }
 0x361   :  { %5655 = vmatmul.mubr.bf16.vlgmr.msra.gmra.mrb[56].mxu1 %v5464_v24 }
 0x362   :  { %6932 = vmatpush3.bf16.msra.mxu1 %v6929_v12 }
 0x363   :  { %6934 = vmatprep.subr.bf16.mxu1 %v6933_v27 }
 0x366   :  { %6936 = vmatpush3.bf16.msra.mxu1 %v6933_v27 }
 0x367   :  { %6938 = vmatprep.subr.bf16.mxu1 %v6937_v30 }
 0x414   :  { %v5697_v32 = vpop.f32.mrb[4].mxu0 }
 0x415   :  { %v6905_v48 = vpop.f32.mrb[5].mxu0 }
 0x416   :  { %v5700_v33 = vpop.f32.mrb[6].mxu0 }
 0x417   :  { %v6906_v34 = vpop.f32.mrb[7].mxu0 }
 0x434   :  { %v6878_v35 = vpop.f32.mrb[56].mxu1 }
 0x435   :  { %v6879_v36 = vpop.f32.mrb[57].mxu1 }
 0x436   :  { %v6880_v37 = vadd.f32 %v6879_v36, %v6878_v35  ;;  %v6881_v38 = vpop.f32.mrb[58].mxu1 }
 0x437   :  { %v6882_v39 = vpop.f32.mrb[59].mxu1 }
 0x438   :  { %v5657_v40 = vadd.f32 %v6880_v37, %v6550_v54  ;;  %v6883_v41 = vadd.f32 %v6882_v39, %v6881_v38 }
 0x43a   :  { %v5698_v42 = vadd.f32 %v5697_v32, %v5657_v40  ;;  %v5660_v43 = vadd.f32 %v6883_v41, %v6550_v54 }
 0x43c   :  { %v5704_v44 = vmax.f32 %v5698_v42, 0.0  ;;  %v5701_v45 = vadd.f32 %v5700_v33, %v5660_v43 }
 0x43e   :  { %v5705_v46 = vmax.f32 %v5701_v45, 0.0  ;;  %6915 = vmatprep.mubr.msk.f32.mxu1 %vm5618_vm1, %v5704_v44 }
 0x440   :  { %6916 = vmatmul.mubr.msk.f32.vlgmr.msra.gmra.mrb[60].mxu1 %vm5618_vm1, %v5705_v46 }
 0x441   :  { %6940 = vmatpush3.bf16.msra.mxu1 %v6937_v30 }
 0x442   :  { %6942 = vmatprep.subr.bf16.mxu1 %v6941_v49 }
 0x445   :  { %6944 = vmatpush3.bf16.msra.mxu1 %v6941_v49 }
 0x513   :  { %v6917_v51 = vpop.f32.mrb[60].mxu1 }
 0x514   :  { %v5795_v19 = vadd.f32 %v6917_v51, %v6570_v50  ;;  %v5789_v52 = vpop.f32.mrb[61].mxu1 }
 0x515   :  { %v5790_v53 = vadd.f32 %v6570_v50, %v5789_v52 }
 0x516   :  { %v5799_v56 = vmax.f32 %v5795_v19, 0.0 }
 0x517   :  { %v5798_v55 = vmax.f32 %v5790_v53, 0.0 }
 0x519   :  { %6926 = vmatprep.mubr.msk.f32.mxu1 %vm5618_vm1, %v5798_v55 }
 0x51a   :  { %6927 = vmatmul.mubr.msk.f32.vlgmr.msra.gmra.mrb[62].mxu1 %vm5618_vm1, %v5799_v56 }
 0x5ed   :  { %v6928_v59 = vpop.f32.mrb[62].mxu1 }
 0x5ee   :  { %v5889_v61 = vadd.f32 %v6928_v59, %v6573_v57  ;;  %v5883_v63 = vpop.f32.mrb[63].mxu1 }
 0x5ef   :  { %v5884_v0 = vadd.f32 %v6573_v57, %v5883_v63 }
 0x5f0   :  { %v5893_v1 = vmax.f32 %v5889_v61, 0.0 }
 0x5f1   :  { %v5892_v2 = vmax.f32 %v5884_v0, 0.0 }
 0x5f2   :  { %5895 = vst.msk [vmem:[%s10145_s9 + $0x8] sm:$0xff] %vm5618_vm1, %v5893_v1 }
 0x5f3   :  { %5894 = vst.msk [vmem:[%s10145_s9] sm:$0xff] %vm5618_vm1, %v5892_v2 }

</bundles_post_ra>
